<compile_context>
chip_gen: v6e
topology: v6e:2x2x1
jax: 0.10.0
libtpu: 0.0.40
codegen_flags: <defaults>
</compile_context>

<pallas_src>
import jax
import jax.numpy as jnp
from jax.experimental import pallas as pl
from jax.experimental.pallas import tpu as pltpu

EPS = 1e-5  # torch.nn.InstanceNorm2d default


# ----------------------------- kernel helpers ------------------------------

def _reflect_pad(x):
    """torch.nn.ReflectionPad2d(1) on an (H, W, C) tile via cheap concats."""
    H, W, _ = x.shape
    rows = jnp.concatenate([x[1:2], x, x[H - 2:H - 1]], axis=0)        # (H+2, W, C)
    return jnp.concatenate(
        [rows[:, 1:2, :], rows, rows[:, W - 2:W - 1, :]], axis=1)      # (H+2, W+2, C)


def _conv3x3_im2col(xp, w_flat, H, W, C):
    """3x3 'valid' conv on a padded (H+2, W+2, C) bf16 tile.

    im2col: concat the 9 taps along the lane axis -> (H*W, 9C), then a single
    (H*W, 9C) @ (9C, C) MXU matmul with f32 accumulation.
    """
    taps = [
        xp[dy:dy + H, dx:dx + W, :].reshape(H * W, C)
        for dy in range(3)
        for dx in range(3)
    ]
    patch = jnp.concatenate(taps, axis=1)                              # (H*W, 9C)
    return jnp.dot(patch, w_flat, preferred_element_type=jnp.float32)  # (H*W, C) f32


def _instance_norm(y, gamma, beta, hw):
    """Per-channel InstanceNorm2d (biased variance), single-pass sum/sumsq."""
    inv_hw = 1.0 / float(hw)
    mean = jnp.sum(y, axis=0, keepdims=True) * inv_hw                  # (1, C)
    mean_sq = jnp.sum(y * y, axis=0, keepdims=True) * inv_hw           # (1, C)
    var = jnp.maximum(mean_sq - mean * mean, 0.0)
    scale = jax.lax.rsqrt(var + EPS) * gamma
    return (y - mean) * scale + beta


# ------------------------------ fused kernel --------------------------------

def residual_block_kernel(x_ref, w1_ref, w2_ref, gamma_ref, beta_ref, out_ref):
    _, H, W, C = x_ref.shape
    x = x_ref[0]                       # (H, W, C) f32 -- input AND residual
    gamma = gamma_ref[...]             # (1, C) f32
    beta = beta_ref[...]               # (1, C) f32
    hw = H * W

    # stage 1: relu(norm1(conv1(refl_pad(x))))
    y = _conv3x3_im2col(_reflect_pad(x.astype(jnp.bfloat16)),
                        w1_ref[...], H, W, C)
    y = _instance_norm(y, gamma, beta, hw)
    y = jnp.maximum(y, 0.0)

    # stage 2: norm1(conv2(refl_pad(out))) + residual   (norm1 reused on purpose)
    y = _conv3x3_im2col(_reflect_pad(y.reshape(H, W, C).astype(jnp.bfloat16)),
                        w2_ref[...], H, W, C)
    y = _instance_norm(y, gamma, beta, hw)
    y = y.reshape(H, W, C) + x

    out_ref[...] = y.reshape(1, H, W, C).astype(out_ref.dtype)


# ------------------------------ module wrapper ------------------------------

def residual_block_forward(x_nchw, style_idx, params):
    """Pallas implementation of ResidualBlock.forward(x, style_idx)."""
    x = jnp.transpose(x_nchw, (0, 2, 3, 1)).astype(jnp.float32)  # NCHW -> NHWC
    N, H, W, C = x.shape

    # ConditionalInstanceNorm2d affine params for the chosen style.
    # NOTE: the PyTorch forward applies `norm1` TWICE; reproduced faithfully.
    gamma = params["norm1_weight"][style_idx][None, :]
    beta = params["norm1_bias"][style_idx][None, :]

    # Pre-flatten HWIO (3,3,C,C) -> (9C, C) and cast to bf16 for the MXU.
    # Conv biases are intentionally omitted: InstanceNorm cancels them exactly.
    w1 = params["w1"].reshape(9 * C, C).astype(jnp.bfloat16)
    w2 = params["w2"].reshape(9 * C, C).astype(jnp.bfloat16)

    # TODO(synk): for large images (e.g. 256x256+) the full-image block exceeds
    # VMEM; switch to row-strip tiling with a 1-row halo and a two-pass IN.
    out = pl.pallas_call(
        residual_block_kernel,
        out_shape=jax.ShapeDtypeStruct((N, H, W, C), x.dtype),
        grid_spec=pltpu.PrefetchScalarGridSpec(
            num_scalar_prefetch=0,
            grid=(N,),
            in_specs=[
                pl.BlockSpec((1, H, W, C), lambda n: (n, 0, 0, 0)),  # x / residual
                pl.BlockSpec((9 * C, C), lambda n: (0, 0)),          # conv1 weight
                pl.BlockSpec((9 * C, C), lambda n: (0, 0)),          # conv2 weight
                pl.BlockSpec((1, C), lambda n: (0, 0)),              # IN gamma
                pl.BlockSpec((1, C), lambda n: (0, 0)),              # IN beta
            ],
            out_specs=pl.BlockSpec((1, H, W, C), lambda n: (n, 0, 0, 0)),
        ),
        compiler_params=pltpu.CompilerParams(
            dimension_semantics=("parallel",),   # batch across TCs on v7x
            vmem_limit_bytes=48 * 1024 * 1024,
        ),
    )(x, w1, w2, gamma, beta)

    return jnp.transpose(out, (0, 3, 1, 2))  # NHWC -> NCHW


# ------------------------- deterministic parameters -------------------------

def init_params(key, num_styles, C=128):
    k1, k2, k3, k4, k5, k6 = jax.random.split(key, 6)
    scale = 1.0 / jnp.sqrt(C * 9.0)  # kaiming-uniform-ish fan_in bound
    return dict(
        # conv weights stored HWIO = (3, 3, Cin, Cout)
        w1=jax.random.uniform(k1, (3, 3, C, C), jnp.float32, -scale, scale),
        b1=jax.random.uniform(k2, (C,), jnp.float32, -scale, scale),
        w2=jax.random.uniform(k3, (3, 3, C, C), jnp.float32, -scale, scale),
        b2=jax.random.uniform(k4, (C,), jnp.float32, -scale, scale),
        # per-style affine params for norm1 (perturbed so styles differ)
        norm1_weight=1.0 + 0.1 * jax.random.normal(k5, (num_styles, C),
                                                   jnp.float32),
        norm1_bias=0.1 * jax.random.normal(k6, (num_styles, C), jnp.float32),
        # norm2 params exist in __init__ but are never used in forward
        # (PyTorch module applies norm1 twice); kept for shape parity.
        norm2_weight=jnp.ones((num_styles, C), jnp.float32),
        norm2_bias=jnp.zeros((num_styles, C), jnp.float32),
    )


# ------------------------------ pure-JAX reference ---------------------------

def _reflect_pad_hw(x_nhwc):
    return jnp.pad(x_nhwc, ((0, 0), (1, 1), (1, 1), (0, 0)), mode="reflect")


def reference_forward(x_nchw, style_idx, params):
    x = jnp.transpose(x_nchw, (0, 2, 3, 1)).astype(jnp.float32)
    gamma = params["norm1_weight"][style_idx]
    beta = params["norm1_bias"][style_idx]

    def conv(h, w, b):
        hp = _reflect_pad_hw(h)
        y = jax.lax.conv_general_dilated(
            hp, w, (1, 1), "VALID",
            dimension_numbers=("NHWC", "HWIO", "NHWC"))
        return y + b  # bias kept here; it is cancelled by the InstanceNorm

    def inorm(y):
        mean = jnp.mean(y, axis=(1, 2), keepdims=True)
        var = jnp.var(y, axis=(1, 2), keepdims=True)
        return (y - mean) / jnp.sqrt(var + EPS) * gamma + beta

    out = jax.nn.relu(inorm(conv(x, params["w1"], params["b1"])))
    out = inorm(conv(out, params["w2"], params["b2"])) + x
    return jnp.transpose(out, (0, 3, 1, 2))


# ----------------------------------- main -----------------------------------

if __name__ == "__main__":
    key = jax.random.PRNGKey(0)
    kx, kp = jax.random.split(key)

    num_styles = 3
    style_idx = 1
    # channels must be 128 (fixed by the module); small batch / spatial.
    x = jax.random.normal(kx, (2, 128, 16, 16), jnp.float32)
    params = init_params(kp, num_styles)

    out = residual_block_forward(x, style_idx, params)
    out = jax.block_until_ready(out)

    ref = reference_forward(x, style_idx, params)
    assert out.shape == x.shape, (out.shape, x.shape)
    max_err = float(jnp.max(jnp.abs(out - ref)))
    # Tolerance accounts for bf16 MXU operands (f32 accumulation) vs f32 ref.
    assert jnp.allclose(out, ref, atol=5e-2, rtol=5e-2), max_err

    print("KERNEL_OK")
</pallas_src>

<mosaic_0001>
module attributes {stable_mosaic.version = 11 : i64} {
  func.func @residual_block_kernel(%arg0: i32, %arg1: memref<1x16x16x128xf32, #tpu.memory_space<vmem>>, %arg2: memref<1152x128xbf16, #tpu.memory_space<vmem>>, %arg3: memref<1152x128xbf16, #tpu.memory_space<vmem>>, %arg4: memref<1x128xf32, #tpu.memory_space<vmem>>, %arg5: memref<1x128xf32, #tpu.memory_space<vmem>>, %arg6: memref<1x16x16x128xf32, #tpu.memory_space<vmem>>) attributes {dimension_semantics = [#tpu.dimension_semantics<parallel>], iteration_bounds = array<i64: 2>, scalar_prefetch = 0 : i64, scratch_operands = 0 : i64, tpu.core_type = #tpu.core_type<tc>, window_params = [{transform_indices = @transform_0, window_bounds = array<i64: 1, 16, 16, 128>}, {pipeline_mode = #tpu.pipeline_mode<synchronous>, transform_indices = @transform_1, window_bounds = array<i64: 1152, 128>}, {pipeline_mode = #tpu.pipeline_mode<synchronous>, transform_indices = @transform_2, window_bounds = array<i64: 1152, 128>}, {pipeline_mode = #tpu.pipeline_mode<synchronous>, transform_indices = @transform_3, window_bounds = array<i64: 1, 128>}, {pipeline_mode = #tpu.pipeline_mode<synchronous>, transform_indices = @transform_4, window_bounds = array<i64: 1, 128>}, {transform_indices = @transform_5, window_bounds = array<i64: 1, 16, 16, 128>}]} {
    %c0 = arith.constant 0 : index
    %c0_0 = arith.constant 0 : index
    %c0_1 = arith.constant 0 : index
    %c0_2 = arith.constant 0 : index
    %0 = vector.load %arg1[%c0, %c0_0, %c0_1, %c0_2] : memref<1x16x16x128xf32, #tpu.memory_space<vmem>>, vector<1x16x16x128xf32>
    %1 = vector.shape_cast %0 : vector<1x16x16x128xf32> to vector<16x16x128xf32>
    %c0_3 = arith.constant 0 : index
    %c0_4 = arith.constant 0 : index
    %2 = vector.load %arg4[%c0_3, %c0_4] : memref<1x128xf32, #tpu.memory_space<vmem>>, vector<1x128xf32>
    %c0_5 = arith.constant 0 : index
    %c0_6 = arith.constant 0 : index
    %3 = vector.load %arg5[%c0_5, %c0_6] : memref<1x128xf32, #tpu.memory_space<vmem>>, vector<1x128xf32>
    %4 = arith.truncf %1 : vector<16x16x128xf32> to vector<16x16x128xbf16>
    %5 = vector.extract_strided_slice %4 {offsets = [1, 0, 0], sizes = [1, 16, 128], strides = [1, 1, 1]} : vector<16x16x128xbf16> to vector<1x16x128xbf16>
    %6 = vector.extract_strided_slice %4 {offsets = [14, 0, 0], sizes = [1, 16, 128], strides = [1, 1, 1]} : vector<16x16x128xbf16> to vector<1x16x128xbf16>
    %7 = tpu.concatenate %5, %4, %6 in 0 : vector<1x16x128xbf16>, vector<16x16x128xbf16>, vector<1x16x128xbf16> -> vector<18x16x128xbf16>
    %8 = vector.extract_strided_slice %7 {offsets = [0, 1, 0], sizes = [18, 1, 128], strides = [1, 1, 1]} : vector<18x16x128xbf16> to vector<18x1x128xbf16>
    %9 = vector.extract_strided_slice %7 {offsets = [0, 14, 0], sizes = [18, 1, 128], strides = [1, 1, 1]} : vector<18x16x128xbf16> to vector<18x1x128xbf16>
    %10 = tpu.concatenate %8, %7, %9 in 1 : vector<18x1x128xbf16>, vector<18x16x128xbf16>, vector<18x1x128xbf16> -> vector<18x18x128xbf16>
    %c0_7 = arith.constant 0 : index
    %c0_8 = arith.constant 0 : index
    %11 = vector.load %arg2[%c0_7, %c0_8] : memref<1152x128xbf16, #tpu.memory_space<vmem>>, vector<1152x128xbf16>
    %12 = vector.extract_strided_slice %10 {offsets = [0, 0, 0], sizes = [16, 16, 128], strides = [1, 1, 1]} : vector<18x18x128xbf16> to vector<16x16x128xbf16>
    %13 = vector.shape_cast %12 : vector<16x16x128xbf16> to vector<256x128xbf16>
    %14 = vector.extract_strided_slice %10 {offsets = [0, 1, 0], sizes = [16, 16, 128], strides = [1, 1, 1]} : vector<18x18x128xbf16> to vector<16x16x128xbf16>
    %15 = vector.shape_cast %14 : vector<16x16x128xbf16> to vector<256x128xbf16>
    %16 = vector.extract_strided_slice %10 {offsets = [0, 2, 0], sizes = [16, 16, 128], strides = [1, 1, 1]} : vector<18x18x128xbf16> to vector<16x16x128xbf16>
    %17 = vector.shape_cast %16 : vector<16x16x128xbf16> to vector<256x128xbf16>
    %18 = vector.extract_strided_slice %10 {offsets = [1, 0, 0], sizes = [16, 16, 128], strides = [1, 1, 1]} : vector<18x18x128xbf16> to vector<16x16x128xbf16>
    %19 = vector.shape_cast %18 : vector<16x16x128xbf16> to vector<256x128xbf16>
    %20 = vector.extract_strided_slice %10 {offsets = [1, 1, 0], sizes = [16, 16, 128], strides = [1, 1, 1]} : vector<18x18x128xbf16> to vector<16x16x128xbf16>
    %21 = vector.shape_cast %20 : vector<16x16x128xbf16> to vector<256x128xbf16>
    %22 = vector.extract_strided_slice %10 {offsets = [1, 2, 0], sizes = [16, 16, 128], strides = [1, 1, 1]} : vector<18x18x128xbf16> to vector<16x16x128xbf16>
    %23 = vector.shape_cast %22 : vector<16x16x128xbf16> to vector<256x128xbf16>
    %24 = vector.extract_strided_slice %10 {offsets = [2, 0, 0], sizes = [16, 16, 128], strides = [1, 1, 1]} : vector<18x18x128xbf16> to vector<16x16x128xbf16>
    %25 = vector.shape_cast %24 : vector<16x16x128xbf16> to vector<256x128xbf16>
    %26 = vector.extract_strided_slice %10 {offsets = [2, 1, 0], sizes = [16, 16, 128], strides = [1, 1, 1]} : vector<18x18x128xbf16> to vector<16x16x128xbf16>
    %27 = vector.shape_cast %26 : vector<16x16x128xbf16> to vector<256x128xbf16>
    %28 = vector.extract_strided_slice %10 {offsets = [2, 2, 0], sizes = [16, 16, 128], strides = [1, 1, 1]} : vector<18x18x128xbf16> to vector<16x16x128xbf16>
    %29 = vector.shape_cast %28 : vector<16x16x128xbf16> to vector<256x128xbf16>
    %30 = tpu.concatenate %13, %15, %17, %19, %21, %23, %25, %27, %29 in 1 : vector<256x128xbf16>, vector<256x128xbf16>, vector<256x128xbf16>, vector<256x128xbf16>, vector<256x128xbf16>, vector<256x128xbf16>, vector<256x128xbf16>, vector<256x128xbf16>, vector<256x128xbf16> -> vector<256x1152xbf16>
    %cst = arith.constant dense<0.000000e+00> : vector<256x128xf32>
    %31 = tpu.matmul %30, %11, %cst {dimension_numbers = #tpu.dot_dimension_numbers<[1], [0], [0], [1], [0, 0, 1, 1], [], []>} : vector<256x1152xbf16>, vector<1152x128xbf16>, vector<256x128xf32> -> vector<256x128xf32>
    %cst_9 = arith.constant dense<0.000000e+00> : vector<128xf32>
    %32 = vector.multi_reduction <add>, %31, %cst_9 [0] : vector<256x128xf32> to vector<128xf32>
    %33 = vector.shape_cast %32 : vector<128xf32> to vector<1x128xf32>
    %cst_10 = arith.constant 3.906250e-03 : f32
    %34 = vector.broadcast %cst_10 : f32 to vector<1x128xf32>
    %35 = arith.mulf %33, %34 : vector<1x128xf32>
    %36 = arith.mulf %31, %31 : vector<256x128xf32>
    %cst_11 = arith.constant dense<0.000000e+00> : vector<128xf32>
    %37 = vector.multi_reduction <add>, %36, %cst_11 [0] : vector<256x128xf32> to vector<128xf32>
    %38 = vector.shape_cast %37 : vector<128xf32> to vector<1x128xf32>
    %cst_12 = arith.constant 3.906250e-03 : f32
    %39 = vector.broadcast %cst_12 : f32 to vector<1x128xf32>
    %40 = arith.mulf %38, %39 : vector<1x128xf32>
    %41 = arith.mulf %35, %35 : vector<1x128xf32>
    %42 = arith.subf %40, %41 : vector<1x128xf32>
    %cst_13 = arith.constant 0.000000e+00 : f32
    %43 = vector.broadcast %cst_13 : f32 to vector<1x128xf32>
    %44 = arith.maximumf %42, %43 : vector<1x128xf32>
    %cst_14 = arith.constant 9.99999974E-6 : f32
    %45 = vector.broadcast %cst_14 : f32 to vector<1x128xf32>
    %46 = arith.addf %44, %45 : vector<1x128xf32>
    %47 = math.rsqrt %46 : vector<1x128xf32>
    %48 = arith.mulf %47, %2 : vector<1x128xf32>
    %49 = vector.broadcast %35 : vector<1x128xf32> to vector<256x128xf32>
    %50 = arith.subf %31, %49 : vector<256x128xf32>
    %51 = vector.broadcast %48 : vector<1x128xf32> to vector<256x128xf32>
    %52 = arith.mulf %50, %51 : vector<256x128xf32>
    %53 = vector.broadcast %3 : vector<1x128xf32> to vector<256x128xf32>
    %54 = arith.addf %52, %53 : vector<256x128xf32>
    %cst_15 = arith.constant 0.000000e+00 : f32
    %55 = vector.broadcast %cst_15 : f32 to vector<256x128xf32>
    %56 = arith.maximumf %54, %55 : vector<256x128xf32>
    %57 = vector.shape_cast %56 : vector<256x128xf32> to vector<16x16x128xf32>
    %58 = arith.truncf %57 : vector<16x16x128xf32> to vector<16x16x128xbf16>
    %59 = vector.extract_strided_slice %58 {offsets = [1, 0, 0], sizes = [1, 16, 128], strides = [1, 1, 1]} : vector<16x16x128xbf16> to vector<1x16x128xbf16>
    %60 = vector.extract_strided_slice %58 {offsets = [14, 0, 0], sizes = [1, 16, 128], strides = [1, 1, 1]} : vector<16x16x128xbf16> to vector<1x16x128xbf16>
    %61 = tpu.concatenate %59, %58, %60 in 0 : vector<1x16x128xbf16>, vector<16x16x128xbf16>, vector<1x16x128xbf16> -> vector<18x16x128xbf16>
    %62 = vector.extract_strided_slice %61 {offsets = [0, 1, 0], sizes = [18, 1, 128], strides = [1, 1, 1]} : vector<18x16x128xbf16> to vector<18x1x128xbf16>
    %63 = vector.extract_strided_slice %61 {offsets = [0, 14, 0], sizes = [18, 1, 128], strides = [1, 1, 1]} : vector<18x16x128xbf16> to vector<18x1x128xbf16>
    %64 = tpu.concatenate %62, %61, %63 in 1 : vector<18x1x128xbf16>, vector<18x16x128xbf16>, vector<18x1x128xbf16> -> vector<18x18x128xbf16>
    %c0_16 = arith.constant 0 : index
    %c0_17 = arith.constant 0 : index
    %65 = vector.load %arg3[%c0_16, %c0_17] : memref<1152x128xbf16, #tpu.memory_space<vmem>>, vector<1152x128xbf16>
    %66 = vector.extract_strided_slice %64 {offsets = [0, 0, 0], sizes = [16, 16, 128], strides = [1, 1, 1]} : vector<18x18x128xbf16> to vector<16x16x128xbf16>
    %67 = vector.shape_cast %66 : vector<16x16x128xbf16> to vector<256x128xbf16>
    %68 = vector.extract_strided_slice %64 {offsets = [0, 1, 0], sizes = [16, 16, 128], strides = [1, 1, 1]} : vector<18x18x128xbf16> to vector<16x16x128xbf16>
    %69 = vector.shape_cast %68 : vector<16x16x128xbf16> to vector<256x128xbf16>
    %70 = vector.extract_strided_slice %64 {offsets = [0, 2, 0], sizes = [16, 16, 128], strides = [1, 1, 1]} : vector<18x18x128xbf16> to vector<16x16x128xbf16>
    %71 = vector.shape_cast %70 : vector<16x16x128xbf16> to vector<256x128xbf16>
    %72 = vector.extract_strided_slice %64 {offsets = [1, 0, 0], sizes = [16, 16, 128], strides = [1, 1, 1]} : vector<18x18x128xbf16> to vector<16x16x128xbf16>
    %73 = vector.shape_cast %72 : vector<16x16x128xbf16> to vector<256x128xbf16>
    %74 = vector.extract_strided_slice %64 {offsets = [1, 1, 0], sizes = [16, 16, 128], strides = [1, 1, 1]} : vector<18x18x128xbf16> to vector<16x16x128xbf16>
    %75 = vector.shape_cast %74 : vector<16x16x128xbf16> to vector<256x128xbf16>
    %76 = vector.extract_strided_slice %64 {offsets = [1, 2, 0], sizes = [16, 16, 128], strides = [1, 1, 1]} : vector<18x18x128xbf16> to vector<16x16x128xbf16>
    %77 = vector.shape_cast %76 : vector<16x16x128xbf16> to vector<256x128xbf16>
    %78 = vector.extract_strided_slice %64 {offsets = [2, 0, 0], sizes = [16, 16, 128], strides = [1, 1, 1]} : vector<18x18x128xbf16> to vector<16x16x128xbf16>
    %79 = vector.shape_cast %78 : vector<16x16x128xbf16> to vector<256x128xbf16>
    %80 = vector.extract_strided_slice %64 {offsets = [2, 1, 0], sizes = [16, 16, 128], strides = [1, 1, 1]} : vector<18x18x128xbf16> to vector<16x16x128xbf16>
    %81 = vector.shape_cast %80 : vector<16x16x128xbf16> to vector<256x128xbf16>
    %82 = vector.extract_strided_slice %64 {offsets = [2, 2, 0], sizes = [16, 16, 128], strides = [1, 1, 1]} : vector<18x18x128xbf16> to vector<16x16x128xbf16>
    %83 = vector.shape_cast %82 : vector<16x16x128xbf16> to vector<256x128xbf16>
    %84 = tpu.concatenate %67, %69, %71, %73, %75, %77, %79, %81, %83 in 1 : vector<256x128xbf16>, vector<256x128xbf16>, vector<256x128xbf16>, vector<256x128xbf16>, vector<256x128xbf16>, vector<256x128xbf16>, vector<256x128xbf16>, vector<256x128xbf16>, vector<256x128xbf16> -> vector<256x1152xbf16>
    %cst_18 = arith.constant dense<0.000000e+00> : vector<256x128xf32>
    %85 = tpu.matmul %84, %65, %cst_18 {dimension_numbers = #tpu.dot_dimension_numbers<[1], [0], [0], [1], [0, 0, 1, 1], [], []>} : vector<256x1152xbf16>, vector<1152x128xbf16>, vector<256x128xf32> -> vector<256x128xf32>
    %cst_19 = arith.constant dense<0.000000e+00> : vector<128xf32>
    %86 = vector.multi_reduction <add>, %85, %cst_19 [0] : vector<256x128xf32> to vector<128xf32>
    %87 = vector.shape_cast %86 : vector<128xf32> to vector<1x128xf32>
    %cst_20 = arith.constant 3.906250e-03 : f32
    %88 = vector.broadcast %cst_20 : f32 to vector<1x128xf32>
    %89 = arith.mulf %87, %88 : vector<1x128xf32>
    %90 = arith.mulf %85, %85 : vector<256x128xf32>
    %cst_21 = arith.constant dense<0.000000e+00> : vector<128xf32>
    %91 = vector.multi_reduction <add>, %90, %cst_21 [0] : vector<256x128xf32> to vector<128xf32>
    %92 = vector.shape_cast %91 : vector<128xf32> to vector<1x128xf32>
    %cst_22 = arith.constant 3.906250e-03 : f32
    %93 = vector.broadcast %cst_22 : f32 to vector<1x128xf32>
    %94 = arith.mulf %92, %93 : vector<1x128xf32>
    %95 = arith.mulf %89, %89 : vector<1x128xf32>
    %96 = arith.subf %94, %95 : vector<1x128xf32>
    %cst_23 = arith.constant 0.000000e+00 : f32
    %97 = vector.broadcast %cst_23 : f32 to vector<1x128xf32>
    %98 = arith.maximumf %96, %97 : vector<1x128xf32>
    %cst_24 = arith.constant 9.99999974E-6 : f32
    %99 = vector.broadcast %cst_24 : f32 to vector<1x128xf32>
    %100 = arith.addf %98, %99 : vector<1x128xf32>
    %101 = math.rsqrt %100 : vector<1x128xf32>
    %102 = arith.mulf %101, %2 : vector<1x128xf32>
    %103 = vector.broadcast %89 : vector<1x128xf32> to vector<256x128xf32>
    %104 = arith.subf %85, %103 : vector<256x128xf32>
    %105 = vector.broadcast %102 : vector<1x128xf32> to vector<256x128xf32>
    %106 = arith.mulf %104, %105 : vector<256x128xf32>
    %107 = vector.broadcast %3 : vector<1x128xf32> to vector<256x128xf32>
    %108 = arith.addf %106, %107 : vector<256x128xf32>
    %109 = vector.shape_cast %108 : vector<256x128xf32> to vector<16x16x128xf32>
    %110 = arith.addf %109, %1 : vector<16x16x128xf32>
    %111 = vector.shape_cast %110 : vector<16x16x128xf32> to vector<1x16x16x128xf32>
    %c0_25 = arith.constant 0 : index
    %c0_26 = arith.constant 0 : index
    %c0_27 = arith.constant 0 : index
    %c0_28 = arith.constant 0 : index
    %112 = vector.load %arg6[%c0_25, %c0_26, %c0_27, %c0_28] : memref<1x16x16x128xf32, #tpu.memory_space<vmem>>, vector<1x16x16x128xf32>
    tpu.vector_store %arg6[%c0_25, %c0_26, %c0_27, %c0_28], %111 {strides = array<i32>} : memref<1x16x16x128xf32, #tpu.memory_space<vmem>>, vector<1x16x16x128xf32>,
    return
  }
  func.func @transform_0(%arg0: i32) -> (i32, i32, i32, i32) {
    %c0_i32 = arith.constant 0 : i32
    %c0_i32_0 = arith.constant 0 : i32
    %c0_i32_1 = arith.constant 0 : i32
    %c0_i32_2 = arith.constant 0 : i32
    return %arg0, %c0_i32, %c0_i32_0, %c0_i32_1 : i32, i32, i32, i32
  }
  func.func @transform_1(%arg0: i32) -> (i32, i32) {
    %c0_i32 = arith.constant 0 : i32
    %c0_i32_0 = arith.constant 0 : i32
    %c0_i32_1 = arith.constant 0 : i32
    return %c0_i32, %c0_i32_0 : i32, i32
  }
  func.func @transform_2(%arg0: i32) -> (i32, i32) {
    %c0_i32 = arith.constant 0 : i32
    %c0_i32_0 = arith.constant 0 : i32
    %c0_i32_1 = arith.constant 0 : i32
    return %c0_i32, %c0_i32_0 : i32, i32
  }
  func.func @transform_3(%arg0: i32) -> (i32, i32) {
    %c0_i32 = arith.constant 0 : i32
    %c0_i32_0 = arith.constant 0 : i32
    %c0_i32_1 = arith.constant 0 : i32
    return %c0_i32, %c0_i32_0 : i32, i32
  }
  func.func @transform_4(%arg0: i32) -> (i32, i32) {
    %c0_i32 = arith.constant 0 : i32
    %c0_i32_0 = arith.constant 0 : i32
    %c0_i32_1 = arith.constant 0 : i32
    return %c0_i32, %c0_i32_0 : i32, i32
  }
  func.func @transform_5(%arg0: i32) -> (i32, i32, i32, i32) {
    %c0_i32 = arith.constant 0 : i32
    %c0_i32_0 = arith.constant 0 : i32
    %c0_i32_1 = arith.constant 0 : i32
    %c0_i32_2 = arith.constant 0 : i32
    return %arg0, %c0_i32, %c0_i32_0, %c0_i32_1 : i32, i32, i32, i32
  }
}

</mosaic_0001>

<bundles_post_ra>
// kernel: tpu_custom_call.1
= control target key start
LH: loop header
LB: loop body
LE: loop exit
PB: predicated region body
PF: predicated region fallthrough
CT: control target
= control target key end

     0   :  { %10 = vsyncpa [#allocation3], 0  ;;  %s9060_s0 = inlined_call_operand.hbm [shape: f32[2,16,16,128], index: 0, kind: input, shape index: {}]   ;;  %s9061_s1 = inlined_call_operand.hbm [shape: bf16[1152,128], index: 1, kind: input, shape index: {}]   ;;  %s9062_s2 = inlined_call_operand.hbm [shape: bf16[1152,128], index: 2, kind: input, shape index: {}]   ;;  %s9063_s3 = inlined_call_operand.vmem [shape: f32[1,128], index: 3, kind: input, shape index: {}]   ;;  %s9064_s4 = inlined_call_operand.vmem [shape: f32[1,128], index: 4, kind: input, shape index: {}]   ;;  %s9065_s5 = inlined_call_operand.hbm [shape: f32[2,16,16,128], index: 5, kind: output, shape index: {}]  }
   0x1   :  { %12 = vsyncpa [#allocation3 + $0x1], 0 }
   0x2   :  { %13 = vsyncpa [#allocation6], 0 }
   0x3   :  { %14 = vsyncpa [#allocation4], 0 }
   0x4   :  { %16 = vsyncpa [#allocation4 + $0x1], 0  ;;  %s6448_s18 = smov 0   ;;  %s6450_s19 = smov 0  }
   0x5   :  { %s6452_s20 = smov 0   ;;  %s6454_s21 = smov 0  }
   0x6 LB: > { %s6469_s22 = sadd.s32 4294967295, %s6406_s21   ;;  %s4798_s23 = sadd.s32 4294967294, %s6406_s21   ;;  %s6406_s21 = sphi %s6454_s21, %s9231_s21   ;;  %s6402_s20 = sphi %s6452_s20, %s9230_s20   ;;  %s6398_s19 = sphi %s6450_s19, %s9229_s19   ;;  %s6394_s18 = sphi %s6448_s18, %s9228_s18  }
   0x7   : > { %p42_p0 = scmp.ne.s32.totalorder %s6398_s19, %s6394_s18  ;;  %p9066_p1 = scmp.eq.s32.totalorder %s6469_s22, 0 }
   0x8   : > { %p156_p3 = scmp.eq.s32.totalorder %s4798_s23, 1  ;;  %p4799_p5 = scmp.ge.s32.totalorder %s6406_s21, 1 }
   0x9   : > { %p6478_p4 = por %p9066_p1, %p42_p0  ;;  %p163_p7 = scmp.lt.s32.totalorder %s6406_s21, 3 }
   0xa   : > { %p6483_p6 = por %p156_p3, %p42_p0  ;;  %s6408_s27 = smov [#allocation5]  }
   0xb   : > { %s9078_s24 = scalar_select %p6478_p4, 1, 0 }
   0xc   : > { %s9079_s25 = scalar_select %p6483_p6, 1, 0 }
   0xd   : > { %p6488_p8 = pnand %p4799_p5, %p163_p7  ;;  %s175_s28 = sshll.u32 %s6408_s27, 4  ;;  %s176_s28 = int_to_ptr.vmem [resolvable:$true] %s175_s28 }
   0xe   : > { %s6409_s30 = smov [#allocation7]   ;;  %s6269_s7 = scalar_lea.vmem %s176_s28, 9216 }
   0xf   : > { %s9080_s26 = scalar_select %p6488_p8, 1, 0 }
  0x10   : > { %p6015_p9 = pneg %p6488_p8  ;;  %s188_s6 = sshll.u32 %s6409_s30, 4  ;;  %s189_s6 = int_to_ptr.vmem [resolvable:$true] %s188_s6 }
  0x11   : > { %p6270_p13 = scmp.ne.s32.totalorder %s176_s28, %s6269_s7  ;;  %p6277_p5 = scmp.lt.s32.totalorder %s176_s28, %s176_s28 }
  0x12   : > { %p6497_p11 = pnand %p6015_p9, %p9066_p1  ;;  %p6278_p7 = scmp.lt.s32.totalorder %s6269_s7, %s6269_s7 }
  0x14   : > { %p6260_p12 = pneg %p6497_p11  ;;  %p6279_p10 = por %p6278_p7, %p6277_p5 }
  0x16   : > { %p6272_p0 = pnand %p6270_p13, %p6260_p12 }
  0x18   : > { %p6273_p3 = pneg %p6272_p0 }
  0x1a   : > { %p6280_p9 = pnand %p6279_p10, %p6273_p3 }
  0x1c   : > { %6283 = shalt.err (!%p6280_p9)
}
  0x1d   : > { %s6410_s8 = smov 64   ;;  %s6411_s9 = smov 4  }
  0x1e   : > { %6018 = dma.hbm_to_vmem [thread:$0]  (!%p6497_p11), %s9061_s1, 9216, %s176_s28, [#allocation6], %s6410_s8, %s6410_s8, %s6411_s9  }
  0x1f   : > { %s6295_s12 = scalar_lea.vmem %s189_s6, 9216  ;;  %p6303_p2 = scmp.lt.s32.totalorder %s189_s6, %s189_s6 }
  0x20   : > { %p6296_p1 = scmp.ne.s32.totalorder %s189_s6, %s6295_s12  ;;  %p6304_p6 = scmp.lt.s32.totalorder %s6295_s12, %s6295_s12 }
  0x22   : > { %p6298_p13 = pnand %p6296_p1, %p6260_p12  ;;  %p6305_p5 = por %p6304_p6, %p6303_p2 }
  0x24   : > { %p6299_p0 = pneg %p6298_p13 }
  0x26   : > { %p6306_p10 = pnand %p6305_p5, %p6299_p0 }
  0x28   : > { %6309 = shalt.err (!%p6306_p10)
}
  0x29   : > { %6021 = dma.hbm_to_vmem [thread:$0]  (!%p6497_p11), %s9062_s2, 9216, %s189_s6, [#allocation6], %s6410_s8, %s6410_s8, %s6411_s9  }
  0x2a   : > { %s6520_s15 = sadd.s32 1, %s6406_s21   ;;  %s29_s16 = sadd.s32 1, %s6402_s20 }
  0x2b   : > { %s26_s17 = ssub.s32 %s6406_s21, %s6520_s15  ;;  %p36_p1 = scmp.ne.s32.totalorder %s6402_s20, %s6398_s19 }
  0x2c   : > { %p27_p2 = scmp.eq.s32.totalorder %s26_s17, 0  ;;  %p37_p6 = scmp.eq.s32.totalorder %s6406_s21, 0 }
  0x2d   : > { %p9082_p12 = scmp.eq.s32.totalorder %s6469_s22, 1  ;;  %p6032_p7 = scmp.lt.s32.totalorder %s6406_s21, 2 }
  0x2e   : > { %s6536_s27 = scalar_select %p27_p2, %s6402_s20, %s29_s16  }
  0x2f   : > { %p6530_p3 = por %p9082_p12, %p36_p1  ;;  %p38_p9 = por %p37_p6, %p36_p1 }
  0x30   : > { %s208_s28 = sand.u32 1, %s6402_s20   ;;  %s4961_s30 = sshll.u32 %s6406_s21, 12 }
  0x31   : > { %s9083_s23 = scalar_select %p6530_p3, 1, 0 }
  0x32   : > { %s4803_s29 = sshll.u32 %s208_s28, 8  ;;  %s6543_s8 = scalar_lea.hbm %s9060_s0, %s4961_s30 }
  0x33   : > { %s212_s9 = scalar_lea.vmem [#allocation2], %s4803_s29  ;;  %p6547_p11 = pnand %p6032_p7, %p38_p9 }
  0x34   : > { %s219_s10 = sshll.u32 %s212_s9, 4  ;;  %s6551_s12 = scalar_lea.sflag [#allocation3], %s208_s28  ;;  %s6545_s10 = int_to_ptr.vmem [resolvable:$true] %s219_s10 }
  0x35   : > { %s6310_s13 = scalar_lea.hbm %s6543_s8, 4096  ;;  %p6312_p0 = pneg %p6547_p11 }
  0x36   : > { %p6311_p13 = scmp.ne.s32.totalorder %s6543_s8, %s6310_s13  ;;  %s6315_s17 = scalar_lea.hbm %s9060_s0, 8192 }
  0x37   : > { %p6316_p1 = scmp.lt.s32.totalorder %s6543_s8, %s9060_s0  ;;  %p6317_p2 = scmp.lt.s32.totalorder %s6315_s17, %s6310_s13 }
  0x38   : > { %p6313_p5 = pnand %p6312_p0, %p6311_p13 }
  0x39   : > { %p6318_p6 = por %p6317_p2, %p6316_p1 }
  0x3a   : > { %p6314_p10 = pneg %p6313_p5 }
  0x3c   : > { %p6319_p12 = pnand %p6318_p6, %p6314_p10 }
  0x3e   : > { %6322 = shalt.err (!%p6319_p12)
}
  0x3f   : > { %s6323_s28 = scalar_lea.vmem %s6545_s10, 4096  ;;  %s6412_s6 = smov [#allocation2]  }
  0x40   : > { %p6324_p7 = scmp.ne.s32.totalorder %s6545_s10, %s6323_s28  ;;  %s6328_s7 = sshll.u32 %s6412_s6, 4  ;;  %s6329_s7 = int_to_ptr.vmem [resolvable:$false] %s6328_s7 }
  0x41   : > { %s6330_s9 = scalar_lea.vmem %s6329_s7, 8192  ;;  %p6331_p5 = scmp.lt.s32.totalorder %s6545_s10, %s6329_s7 }
  0x42   : > { %p6326_p9 = pnand %p6324_p7, %p6312_p0  ;;  %p6332_p3 = scmp.lt.s32.totalorder %s6330_s9, %s6323_s28 }
  0x44   : > { %p6327_p13 = pneg %p6326_p9  ;;  %p6333_p4 = por %p6332_p3, %p6331_p5 }
  0x46   : > { %p6334_p8 = pnand %p6333_p4, %p6327_p13 }
  0x48   : > { %6337 = shalt.err (!%p6334_p8)
}
  0x49   : > { %s6413_s13 = smov 128   ;;  %s6414_s14 = smov 8  }
  0x4a   : > { %6025 = dma.hbm_to_vmem [thread:$0]  (!%p6547_p11), %s6543_s8, 4096, %s6545_s10, %s6551_s12, %s6413_s13, %s6413_s13, %s6414_s14  }
  0x4b   : > { %p9085_p0 = scmp.ne.s32.totalorder %s9080_s26, 0 }
  0x4d   : > { %231 = sbr.rel (%p9085_p0) target bundleno = 1330 (0x532), region = 40 }
  0x52   : > { %s6575_s16 = sand.u32 1, %s6398_s19   ;;  %p9086_p4 = scmp.ne.s32.totalorder %s9078_s24, 0 }
  0x53   : > { %s4807_s17 = sshll.u32 %s6575_s16, 8  ;;  %s234_s29 = scalar_lea.sflag [#allocation3], %s6575_s16 }
  0x54   : > { %s6581_s30 = scalar_lea.vmem [#allocation2], %s4807_s17 }
  0x55   : > { %6381 = dma.done.wait (%p9086_p4), %s234_s29, 4096  }
  0x56   : > { %6383 = vsyncadd (%p9086_p4), %s234_s29, 4294963200  ;;  %p9087_p8 = scmp.eq.s32.totalorder %s6469_s22, 0 }
  0x58   : > { %6385 = dma.done.wait (%p9087_p8), [#allocation6], 18432   ;;  %p9088_p3 = pmov %p9087_p8 }
  0x59   : > { %v6076_v0 = vld [vmem:[#allocation5 + $0x78] sm:$0xff]   ;;  %v6080_v4 = vld [vmem:[#allocation5 + $0x70] sm:$0xff]   ;;  %v6084_v8 = vld [vmem:[#allocation5 + $0x68] sm:$0xff]   ;;  %vm515_vm0 = vcmask 1040384   ;;  %vm516_vm1 = vsmask.f32 256 }
  0x5a   : > { %6387 = vsyncadd (%p9088_p3), [#allocation6], 4294948864  ;;  %v6077_v1 = vld [vmem:[#allocation5 + $0xf8] sm:$0xff]   ;;  %4963 = vmatprep.subr.bf16.mxu0 %v6076_v0  ;;  %v6081_v5 = vld [vmem:[#allocation5 + $0xf0] sm:$0xff]   ;;  %v9089_v48 = vmov 0  ;;  %vm920_vm4 = vcmask 1046528  }
  0x5b   : > { %v6078_v2 = vld [vmem:[#allocation5 + $0x38] sm:$0xff]   ;;  %5075 = vmatprep.subr.bf16.mxu1 %v6077_v1  ;;  %v6082_v6 = vld [vmem:[#allocation5 + $0x30] sm:$0xff]   ;;  %v6085_v9 = vld [vmem:[#allocation5 + $0xe8] sm:$0xff]   ;;  %vm694_vm3 = vsmask.f32 7424  ;;  %s8905_s7 = scalar_lea.vmem [#allocation8], %s4807_s17 }
  0x5c   : > { %v6079_v3 = vld [vmem:[#allocation5 + $0xb8] sm:$0xff]   ;;  %4964 = vmatpush3.bf16.msra.mxu0 %v6078_v2  ;;  %v6083_v7 = vld [vmem:[#allocation5 + $0xb0] sm:$0xff]   ;;  %v6086_v10 = vld [vmem:[#allocation5 + $0x28] sm:$0xff]   ;;  %s4962_s9 = sshll.u32 %s6469_s22, 12  ;;  %s4706_s13 = sshll.u32 %s8905_s7, 4  ;;  %s8997_s13 = int_to_ptr.vmem [resolvable:$true] %s4706_s13 }
  0x5d   : > { %5076 = vmatpush3.bf16.msra.mxu1 %v6079_v3  ;;  %4965 = vmatprep.subr.bf16.mxu0 %v6080_v4  ;;  %v6087_v11 = vld [vmem:[#allocation5 + $0xa8] sm:$0xff]   ;;  %v6088_v12 = vld [vmem:[#allocation5 + $0x60] sm:$0xff]   ;;  %v6092_v16 = vld [vmem:[#allocation5 + $0x58] sm:$0xff]   ;;  %s8993_s29 = scalar_lea.hbm %s9065_s5, %s4962_s9  ;;  %s4693_s22 = scalar_lea.sflag [#allocation4], %s6575_s16 }
  0x5e   : > { %5077 = vmatprep.subr.bf16.mxu1 %v6081_v5  ;;  %v6089_v13 = vld [vmem:[#allocation5 + $0xe0] sm:$0xff]   ;;  %v6093_v17 = vld [vmem:[#allocation5 + $0xd8] sm:$0xff]   ;;  %v6096_v20 = vld [vmem:[#allocation5 + $0x50] sm:$0xff]   ;;  %s6338_s24 = scalar_lea.vmem %s8997_s13, 4096  ;;  %p9225_p10 = scmp.ne.s32.totalorder %s9083_s23, 0 }
  0x5f   : > { %v6090_v14 = vld [vmem:[#allocation5 + $0x20] sm:$0xff]   ;;  %v6094_v18 = vld [vmem:[#allocation5 + $0x18] sm:$0xff]   ;;  %v6097_v21 = vld [vmem:[#allocation5 + $0xd0] sm:$0xff]   ;;  %p6339_p11 = scmp.ne.s32.totalorder %s8997_s13, %s6338_s24 }
  0x60   : > { %4966 = vmatpush3.bf16.msra.mxu0 %v6082_v6  ;;  %v6091_v15 = vld [vmem:[#allocation5 + $0xa0] sm:$0xff]   ;;  %v6095_v19 = vld [vmem:[#allocation5 + $0x98] sm:$0xff]   ;;  %v6098_v22 = vld [vmem:[#allocation5 + $0x10] sm:$0xff]  }
  0x61   : > { %5078 = vmatpush3.bf16.msra.mxu1 %v6083_v7  ;;  %4967 = vmatprep.subr.bf16.mxu0 %v6084_v8  ;;  %v6099_v23 = vld [vmem:[#allocation5 + $0x90] sm:$0xff]   ;;  %v6100_v24 = vld [vmem:[#allocation5 + $0x48] sm:$0xff]   ;;  %v6104_v28 = vld [vmem:[#allocation5 + $0x40] sm:$0xff]   ;;  %p6340_p1 = pnand %p6339_p11, %p9225_p10 }
  0x62   : > { %5079 = vmatprep.subr.bf16.mxu1 %v6085_v9  ;;  %v6101_v25 = vld [vmem:[#allocation5 + $0xc8] sm:$0xff]   ;;  %v6105_v29 = vld [vmem:[#allocation5 + $0xc0] sm:$0xff]   ;;  %v275_v32 = vld [vmem:[%s6581_s30 + $0x10] sm:$0xff] }
  0x63   : > { %v6102_v26 = vld [vmem:[#allocation5 + $0x8] sm:$0xff]   ;;  %v6106_v30 = vld [vmem:[#allocation5] sm:$0xff]   ;;  %v276_v33 = vld [vmem:[%s6581_s30 + $0x18] sm:$0xff]  ;;  %p6341_p2 = pneg %p6340_p1 }
  0x64   : > { %4968 = vmatpush3.bf16.msra.mxu0 %v6086_v10  ;;  %v6103_v27 = vld [vmem:[#allocation5 + $0x88] sm:$0xff]   ;;  %v6107_v31 = vld [vmem:[#allocation5 + $0x80] sm:$0xff]   ;;  %v308_v35 = vpack.c.bf16 %v276_v33, %v275_v32  ;;  %v6108_v38 = vld [vmem:[#allocation5 + $0x178] sm:$0xff]  }
  0x65   : > { %5080 = vmatpush3.bf16.msra.mxu1 %v6087_v11  ;;  %4969 = vmatprep.subr.bf16.mxu0 %v6088_v12  ;;  %v273_v34 = vld [vmem:[%s6581_s30] sm:$0xff]  ;;  %v274_v36 = vld [vmem:[%s6581_s30 + $0x8] sm:$0xff]  ;;  %vm6597_vm2 = vmand %vm515_vm0, %vm516_vm1 }
  0x66   : > { %5081 = vmatprep.subr.bf16.mxu1 %v6089_v13  ;;  %v307_v37 = vpack.c.bf16 %v274_v36, %v273_v34  ;;  %v324_v39 = vshrl.u32 %v308_v35, 16  ;;  %v388_v40 = vshll.u32 %v308_v35, 16  ;;  %v277_v41 = vld [vmem:[%s6581_s30 + $0x20] sm:$0xff]  ;;  %v278_v42 = vld [vmem:[%s6581_s30 + $0x28] sm:$0xff]  ;;  %v9090_v48 = vsel %vm6597_vm2, 4294967295, %v9089_v48  ;;  %v279_v62 = vld [vmem:[%s6581_s30 + $0x30] sm:$0xff] }
  0x67   : > { %v309_v45 = vpack.c.bf16 %v278_v42, %v277_v41  ;;  %9091 = vst [vmem:[#allocation12_spill] sm:$0xff] %v9090_v48  ;;  %v280_v2 = vld [vmem:[%s6581_s30 + $0x38] sm:$0xff]  ;;  %v281_v3 = vld [vmem:[%s6581_s30 + $0x40] sm:$0xff]  ;;  %v282_v7 = vld [vmem:[%s6581_s30 + $0x48] sm:$0xff] }
  0x68   : > { %4970 = vmatpush3.bf16.msra.mxu0 %v6090_v14  ;;  %v327_v43 = vshrl.u32 %v307_v37, 16  ;;  %v392_v44 = vshll.u32 %v307_v37, 16  ;;  %v387_v46 = vrot.slane %v324_v39, 7  ;;  %v483_v47 = vrot.slane %v388_v40, 7  ;;  %v6112_v36 = vld [vmem:[#allocation5 + $0x168] sm:$0xff]  }
  0x69   : > { %5082 = vmatpush3.bf16.msra.mxu1 %v6091_v15  ;;  %4971 = vmatprep.subr.bf16.mxu0 %v6092_v16  ;;  %v330_v51 = vshrl.u32 %v309_v45, 16  ;;  %v396_v57 = vshll.u32 %v309_v45, 16  ;;  %v310_v15 = vpack.c.bf16 %v280_v2, %v279_v62  ;;  %v6119_v45 = vld [vmem:[#allocation5 + $0x1b8] sm:$0xff]  }
  0x6a   : > { %5083 = vmatprep.subr.bf16.mxu1 %v6093_v17  ;;  %v391_v49 = vrot.slane %v327_v43, 7  ;;  %v484_v50 = vrot.slane %v392_v44, 7  ;;  %v390_v52 = vor.u32 %v388_v40, %v387_v46  ;;  %v534_v53 = vsel %vm6597_vm2, %v387_v46, %v483_v47  ;;  %v6117_v40 = vld [vmem:[#allocation5 + $0x1f8] sm:$0xff]  }
  0x6b   : > { %v703_v54 = vshll.u32 %v534_v53, 16  ;;  %v922_v59 = vrot.slane %v534_v53, 1  ;;  %v395_v61 = vrot.slane %v330_v51, 7  ;;  %v485_v14 = vrot.slane %v396_v57, 7  ;;  %v288_v62 = vld [vmem:[%s6581_s30 + $0x78] sm:$0xff] }
  0x6c   : > { %4972 = vmatpush3.bf16.msra.mxu0 %v6094_v18  ;;  %v394_v55 = vor.u32 %v392_v44, %v391_v49  ;;  %v535_v56 = vsel %vm6597_vm2, %v391_v49, %v484_v50  ;;  %v6607_v58 = vsel %vm6597_vm2, %v324_v39, %v390_v52  ;;  %v6631_v18 = vpack.c.bf16 %v282_v7, %v281_v3  ;;  %v6113_v50 = vld [vmem:[#allocation5 + $0x128] sm:$0xff]   ;;  %v285_v52 = vld [vmem:[%s6581_s30 + $0x60] sm:$0xff] }
  0x6d   : > { %5084 = vmatpush3.bf16.msra.mxu1 %v6095_v19  ;;  %4973 = vmatprep.subr.bf16.mxu0 %v6096_v20  ;;  %v715_v60 = vshll.u32 %v535_v56, 16  ;;  %v696_v63 = vshrl.u32 %v6607_v58, 16  ;;  %v698_v0 = vshll.u32 %v6607_v58, 16  ;;  %v921_v4 = vrot.slane %v6607_v58, 1  ;;  %v6109_v19 = vld [vmem:[#allocation5 + $0x138] sm:$0xff]  }
  0x6e   : > { %5085 = vmatprep.subr.bf16.mxu1 %v6097_v21  ;;  %v6614_v1 = vsel %vm6597_vm2, %v327_v43, %v394_v55  ;;  %v705_v9 = vrot.slane %v703_v54, 1  ;;  %v398_v11 = vor.u32 %v396_v57, %v395_v61  ;;  %v6647_v32 = vsel %vm6597_vm2, %v395_v61, %v485_v14  ;;  %v286_v55 = vld [vmem:[%s6581_s30 + $0x68] sm:$0xff]  ;;  %v287_v57 = vld [vmem:[%s6581_s30 + $0x70] sm:$0xff] }
  0x6f   : > { %1625 = vmatprep.mubr.bf16.mxu1 %v6614_v1  ;;  %v708_v5 = vshrl.u32 %v6614_v1, 16  ;;  %v710_v6 = vshll.u32 %v6614_v1, 16  ;;  %v700_v8 = vrot.slane %v698_v0, 1  ;;  %v717_v10 = vrot.slane %v715_v60, 1 }
  0x70   : > { %4974 = vmatpush3.bf16.msra.mxu0 %v6098_v22  ;;  %v6624_v12 = vsel %vm920_vm4, %v921_v4, %v922_v59  ;;  %v6629_v17 = vsel %vm6597_vm2, %v330_v51, %v398_v11  ;;  %v924_v21 = vrot.slane %v6614_v1, 1  ;;  %v925_v22 = vrot.slane %v535_v56, 1  ;;  %v6114_v56 = vld [vmem:[#allocation5 + $0x160] sm:$0xff]   ;;  %v6123_v11 = vld [vmem:[#allocation5 + $0x1b0] sm:$0xff]  }
  0x71   : > { %5086 = vmatpush3.bf16.msra.mxu1 %v6099_v23  ;;  %4975 = vmatprep.subr.bf16.mxu0 %v6100_v24  ;;  %v712_v13 = vrot.slane %v710_v6, 1  ;;  %v701_v16 = vor.u32 %v700_v8, %v696_v63  ;;  %v6110_v23 = vld [vmem:[#allocation5 + $0x170] sm:$0xff]   ;;  %v336_v35 = vshrl.u32 %v6631_v18, 16  ;;  %v727_v42 = vshll.u32 %v6647_v32, 16  ;;  %v6115_v4 = vld [vmem:[#allocation5 + $0x120] sm:$0xff]   ;;  %v290_v6 = vld [vmem:[%s6581_s30 + $0x88] sm:$0xff] }
  0x72   : > { %5087 = vmatprep.subr.bf16.mxu1 %v6101_v25  ;;  %v283_v24 = vld [vmem:[%s6581_s30 + $0x50] sm:$0xff]  ;;  %v6653_v37 = vsel %vm920_vm4, %v924_v21, %v925_v22  ;;  %v404_v44 = vshll.u32 %v6631_v18, 16  ;;  %v927_v0 = vrot.slane %v6629_v17, 1  ;;  %v928_v7 = vrot.slane %v6647_v32, 1 }
  0x73   : > { %v713_v20 = vor.u32 %v712_v13, %v708_v5  ;;  %v6637_v25 = vsel %vm694_vm3, %v701_v16, %v705_v9  ;;  %v403_v46 = vrot.slane %v336_v35, 7  ;;  %v729_v60 = vrot.slane %v727_v42, 1  ;;  %v6121_v63 = vld [vmem:[#allocation5 + $0x1f0] sm:$0xff]   ;;  %v289_v5 = vld [vmem:[%s6581_s30 + $0x80] sm:$0xff]  ;;  %v6116_v16 = vld [vmem:[#allocation5 + $0x158] sm:$0xff]  }
  0x74   : > { %4976 = vmatpush3.bf16.msra.mxu0 %v6102_v26  ;;  %v722_v26 = vshll.u32 %v6629_v17, 16  ;;  %1464 = vmatprep.mubr.bf16.mxu0 %v6637_v25  ;;  %v487_v51 = vrot.slane %v404_v44, 7 }
  0x75   : > { %5088 = vmatpush3.bf16.msra.mxu1 %v6103_v27  ;;  %4977 = vmatprep.subr.bf16.mxu0 %v6104_v28  ;;  %v333_v27 = vshrl.u32 %v310_v15, 16  ;;  %v400_v28 = vshll.u32 %v310_v15, 16  ;;  %v406_v3 = vor.u32 %v404_v44, %v403_v46  ;;  %v6689_v15 = vpack.c.bf16 %v286_v55, %v285_v52 }
  0x76   : > { %5089 = vmatprep.subr.bf16.mxu1 %v6105_v29  ;;  %v284_v29 = vld [vmem:[%s6581_s30 + $0x58] sm:$0xff]  ;;  %v724_v41 = vrot.slane %v722_v26, 1 }
  0x77   : > { %v399_v33 = vrot.slane %v333_v27, 7  ;;  %v486_v34 = vrot.slane %v400_v28, 7  ;;  %v6656_v39 = vpack.c.bf16 %v284_v29, %v283_v24  ;;  %v6701_v21 = vsel %vm6597_vm2, %v336_v35, %v406_v3 }
  0x78   : > { %4978 = vmatpush3.bf16.msra.mxu0 %v6106_v30  ;;  %v6643_v30 = vsel %vm694_vm3, %v713_v20, %v717_v10  ;;  %v6686_v10 = vsel %vm6597_vm2, %v403_v46, %v487_v51  ;;  %v342_v24 = vshrl.u32 %v6689_v15, 16  ;;  %v412_v26 = vshll.u32 %v6689_v15, 16  ;;  %v6122_v51 = vld [vmem:[#allocation5 + $0x110] sm:$0xff]   ;;  %v6126_v15 = vld [vmem:[#allocation5 + $0x108] sm:$0xff]  }
  0x79   : > { %5090 = vmatpush3.bf16.msra.mxu1 %v6107_v31  ;;  %5187 = vmatprep.subr.bf16.mxu0 %v6108_v38  ;;  %v6111_v31 = vld [vmem:[#allocation5 + $0x130] sm:$0xff]   ;;  %v720_v38 = vshrl.u32 %v6629_v17, 16  ;;  %v402_v43 = vor.u32 %v400_v28, %v399_v33  ;;  %v339_v47 = vshrl.u32 %v6656_v39, 16  ;;  %v6664_v49 = vsel %vm6597_vm2, %v399_v33, %v486_v34  ;;  %v6118_v33 = vld [vmem:[#allocation5 + $0x118] sm:$0xff]  }
  0x7a   : > { %5299 = vmatprep.subr.bf16.mxu1 %v6117_v40  ;;  %v408_v54 = vshll.u32 %v6656_v39, 16  ;;  %v739_v2 = vshll.u32 %v6664_v49, 16  ;;  %v931_v9 = vrot.slane %v6664_v49, 1  ;;  %v744_v34 = vshrl.u32 %v6701_v21, 16  ;;  %v6120_v39 = vld [vmem:[#allocation5 + $0x150] sm:$0xff]  }
  0x7b   : > { %1465 = vmatmul.mubr.bf16.vlgmr.msra.gmra.mxu0 %v6607_v58  ;;  %v6670_v53 = vsel %vm6597_vm2, %v333_v27, %v402_v43  ;;  %v725_v59 = vor.u32 %v724_v41, %v720_v38  ;;  %v407_v61 = vrot.slane %v339_v47, 7  ;;  %v6708_v27 = vpack.c.bf16 %v290_v6, %v289_v5  ;;  %v6125_v43 = vld [vmem:[#allocation5 + $0x1e8] sm:$0xff]  }
  0x7c   : > { %1626 = vmatmul.mubr.bf16.vlgmr.msra.gmra.mxu1 %v6624_v12  ;;  %5188 = vmatpush3.bf16.msra.mxu0 %v6109_v19  ;;  %v734_v8 = vshll.u32 %v6670_v53, 16  ;;  %v488_v14 = vrot.slane %v408_v54, 7  ;;  %v732_v19 = vshrl.u32 %v6670_v53, 16  ;;  %v6697_v20 = vrot.slane %v739_v2, 1 }
  0x7d   : > { %1633 = vmatprep.mubr.bf16.mxu1 %v6607_v58  ;;  %1472 = vmatprep.mubr.bf16.mxu0 %v6643_v30  ;;  %v410_v13 = vor.u32 %v408_v54, %v407_v61  ;;  %v6694_v18 = vsel %vm694_vm3, %v725_v59, %v729_v60  ;;  %v930_v22 = vrot.slane %v6670_v53, 1  ;;  %v489_v38 = vrot.slane %v412_v26, 7  ;;  %v6127_v59 = vld [vmem:[#allocation5 + $0x1a8] sm:$0xff]  }
  0x7e   : > { %5189 = vmatprep.subr.bf16.mxu0 %v6110_v23  ;;  %5300 = vmatpush3.bf16.msra.mxu1 %v6119_v45  ;;  %v751_v23 = vshll.u32 %v6686_v10, 16  ;;  %v736_v28 = vrot.slane %v734_v8, 1  ;;  %v6720_v35 = vsel %vm6597_vm2, %v407_v61, %v488_v14  ;;  %v746_v40 = vshll.u32 %v6701_v21, 16  ;;  %v292_v14 = vld [vmem:[%s6581_s30 + $0x98] sm:$0xff] }
  0x7f   : > { %5301 = vmatprep.subr.bf16.mxu1 %v6121_v63  ;;  %v6713_v29 = vsel %vm6597_vm2, %v339_v47, %v410_v13  ;;  %v348_v45 = vshrl.u32 %v6708_v27, 16  ;;  %v6729_v46 = vsel %vm920_vm4, %v927_v0, %v928_v7  ;;  %v763_v47 = vshll.u32 %v6720_v35, 16  ;;  %v6128_v0 = vld [vmem:[#allocation5 + $0x1e0] sm:$0xff]   ;;  %v291_v13 = vld [vmem:[%s6581_s30 + $0x90] sm:$0xff] }
  0x80   : > { %5190 = vmatpush3.bf16.msra.mxu0 %v6111_v31  ;;  %v934_v31 = vrot.slane %v6686_v10, 1  ;;  %v758_v44 = vshll.u32 %v6713_v29, 16  ;;  %v737_v52 = vor.u32 %v736_v28, %v732_v19  ;;  %v6732_v54 = vrot.slane %v751_v23, 1  ;;  %v293_v19 = vld [vmem:[%s6581_s30 + $0xa0] sm:$0xff]  ;;  %v294_v23 = vld [vmem:[%s6581_s30 + $0xa8] sm:$0xff]  ;;  %v296_v28 = vld [vmem:[%s6581_s30 + $0xb8] sm:$0xff] }
  0x81   : > { %5191 = vmatprep.subr.bf16.mxu0 %v6112_v36  ;;  %v411_v36 = vrot.slane %v342_v24, 7  ;;  %v933_v55 = vrot.slane %v6701_v21, 1  ;;  %v748_v60 = vrot.slane %v746_v40, 1  ;;  %v756_v61 = vshrl.u32 %v6713_v29, 16 }
  0x82   : > { %5302 = vmatpush3.bf16.msra.mxu1 %v6123_v11  ;;  %v6741_v2 = vrot.slane %v758_v44, 1  ;;  %v936_v3 = vrot.slane %v6713_v29, 1  ;;  %v420_v5 = vshll.u32 %v6708_v27, 16  ;;  %v6748_v6 = vrot.slane %v763_v47, 1 }
  0x83   : > { %1473 = vmatmul.mubr.bf16.gmra.mxu0 %v6614_v1  ;;  %v6691_v1 = vpack.c.bf16 %v288_v62, %v287_v57  ;;  %v6124_v57 = vld [vmem:[#allocation5 + $0x148] sm:$0xff]   ;;  %5303 = vmatprep.subr.bf16.mxu1 %v6125_v43  ;;  %v937_v8 = vrot.slane %v6720_v35, 1  ;;  %v749_v43 = vor.u32 %v748_v60, %v744_v34  ;;  %v6132_v34 = vld [vmem:[#allocation5 + $0x1d8] sm:$0xff]  }
  0x84   : > { %1634 = vmatmul.mubr.bf16.gmra.mxu1 %v6653_v37  ;;  %1480 = vmatprep.mubr.bf16.mxu0 %v6637_v25 }
  0x85   : > { %1641 = vmatprep.mubr.bf16.mxu1 %v6629_v17  ;;  %5192 = vmatpush3.bf16.msra.mxu0 %v6113_v50  ;;  %v345_v32 = vshrl.u32 %v6691_v1, 16  ;;  %v416_v42 = vshll.u32 %v6691_v1, 16  ;;  %v414_v50 = vor.u32 %v412_v26, %v411_v36  ;;  %v6760_v1 = vsel %vm694_vm3, %v737_v52, %v6697_v20  ;;  %v295_v26 = vld [vmem:[%s6581_s30 + $0xb0] sm:$0xff] }
  0x86   : > { %5193 = vmatprep.subr.bf16.mxu0 %v6114_v56  ;;  %v6737_v56 = vsel %vm6597_vm2, %v411_v36, %v489_v38  ;;  %5304 = vmatpush3.bf16.msra.mxu1 %v6127_v59  ;;  %v6829_v27 = vsel %vm694_vm3, %v749_v43, %v6732_v54 }
  0x87   : > { %v415_v41 = vrot.slane %v345_v32, 7  ;;  %v490_v63 = vrot.slane %v416_v42, 7  ;;  %v6752_v7 = vsel %vm6597_vm2, %v342_v24, %v414_v50  ;;  %v775_v11 = vshll.u32 %v6737_v56, 16  ;;  %v6129_v24 = vld [vmem:[#allocation5 + $0x1a0] sm:$0xff]   ;;  %5305 = vmatprep.subr.bf16.mxu1 %v6128_v0  ;;  %v6133_v0 = vld [vmem:[#allocation5 + $0x198] sm:$0xff]  }
  0x88   : > { %v940_v36 = vrot.slane %v6737_v56, 1  ;;  %v768_v49 = vshrl.u32 %v6752_v7, 16  ;;  %v770_v40 = vshll.u32 %v6752_v7, 16  ;;  %v939_v44 = vrot.slane %v6752_v7, 1  ;;  %v6131_v50 = vld [vmem:[#allocation5 + $0x100] sm:$0xff]  }
  0x89   : > { %5194 = vmatpush3.bf16.msra.mxu0 %v6115_v4  ;;  %v418_v62 = vor.u32 %v416_v42, %v415_v41  ;;  %v419_v4 = vrot.slane %v348_v45, 7  ;;  %v6780_v38 = vsel %vm6597_vm2, %v415_v41, %v490_v63  ;;  %v297_v42 = vld [vmem:[%s6581_s30 + $0xc0] sm:$0xff]  ;;  %v6792_v41 = vrot.slane %v775_v11, 1 }
  0x8a   : > { %5195 = vmatprep.subr.bf16.mxu0 %v6116_v16  ;;  %v491_v16 = vrot.slane %v420_v5, 7  ;;  %v787_v52 = vshll.u32 %v6780_v38, 16  ;;  %5306 = vmatpush3.bf16.msra.mxu1 %v6129_v24  ;;  %v6806_v63 = vpack.c.bf16 %v296_v28, %v295_v26  ;;  %v6135_v24 = vld [vmem:[#allocation5 + $0x190] sm:$0xff]  }
  0x8b   : > { %1481 = vmatmul.mubr.bf16.gmra.mxu0 %v6607_v58  ;;  %v6775_v20 = vsel %vm6597_vm2, %v345_v32, %v418_v62  ;;  %v298_v32 = vld [vmem:[%s6581_s30 + $0xc8] sm:$0xff]  ;;  %v6804_v62 = vpack.c.bf16 %v294_v23, %v293_v19  ;;  %5307 = vmatprep.subr.bf16.mxu1 %v6132_v34  ;;  %v943_v19 = vrot.slane %v6780_v38, 1 }
  0x8c   : > { %1642 = vmatmul.mubr.bf16.gmra.mxu1 %v6624_v12  ;;  %1488 = vmatprep.mubr.bf16.mxu0 %v6694_v18  ;;  %v780_v47 = vshrl.u32 %v6775_v20, 16  ;;  %v6838_v26 = vrot.slane %v787_v52, 1  ;;  %v357_v54 = vshrl.u32 %v6806_v63, 16  ;;  %v6137_v34 = vld [vmem:[#allocation5 + $0x188] sm:$0xff]  }
  0x8d   : > { %1649 = vmatprep.mubr.bf16.mxu1 %v6670_v53  ;;  %5196 = vmatpush3.bf16.msra.mxu0 %v6118_v33  ;;  %v6771_v33 = vsel %vm920_vm4, %v930_v22, %v931_v9  ;;  %v422_v9 = vor.u32 %v420_v5, %v419_v4  ;;  %v6785_v22 = vpack.c.bf16 %v292_v14, %v291_v13  ;;  %v772_v5 = vrot.slane %v770_v40, 1 }
  0x8e   : > { %5197 = vmatprep.subr.bf16.mxu0 %v6120_v39  ;;  %v6130_v39 = vld [vmem:[#allocation5 + $0x140] sm:$0xff]   ;;  %v354_v10 = vshrl.u32 %v6804_v62, 16  ;;  %5308 = vmatpush3.bf16.msra.mxu1 %v6133_v0  ;;  %v428_v28 = vshll.u32 %v6804_v62, 16  ;;  %v431_v62 = vrot.slane %v357_v54, 7  ;;  %v432_v0 = vshll.u32 %v6806_v63, 16 }
  0x8f   : > { %v351_v59 = vshrl.u32 %v6785_v22, 16  ;;  %v424_v60 = vshll.u32 %v6785_v22, 16  ;;  %v6820_v11 = vsel %vm6597_vm2, %v348_v45, %v422_v9  ;;  %v761_v45 = vor.u32 %v6741_v2, %v756_v61  ;;  %v299_v22 = vld [vmem:[%s6581_s30 + $0xd0] sm:$0xff] }
  0x90   : > { %v794_v2 = vshll.u32 %v6820_v11, 16  ;;  %v427_v9 = vrot.slane %v354_v10, 7  ;;  %v493_v43 = vrot.slane %v428_v28, 7 }
  0x91   : > { %5198 = vmatpush3.bf16.msra.mxu0 %v6122_v51  ;;  %v782_v51 = vshll.u32 %v6775_v20, 16  ;;  %v423_v13 = vrot.slane %v351_v59, 7 }
  0x92   : > { %5199 = vmatprep.subr.bf16.mxu0 %v6124_v57  ;;  %v6800_v57 = vsel %vm6597_vm2, %v419_v4, %v491_v16  ;;  %v6814_v4 = vsel %vm920_vm4, %v933_v55, %v934_v31  ;;  %v6825_v16 = vpack.c.bf16 %v298_v32, %v297_v42  ;;  %v6134_v31 = vld [vmem:[#allocation5 + $0x1d0] sm:$0xff]   ;;  %v942_v55 = vrot.slane %v6775_v20, 1 }
  0x93   : > { %1489 = vmatmul.mubr.bf16.gmra.mxu0 %v6629_v17  ;;  %v799_v14 = vshll.u32 %v6800_v57, 16  ;;  %v6836_v23 = vrot.slane %v782_v51, 1  ;;  %5309 = vmatprep.subr.bf16.mxu1 %v6134_v31  ;;  %v426_v40 = vor.u32 %v424_v60, %v423_v13  ;;  %v300_v51 = vld [vmem:[%s6581_s30 + $0xd8] sm:$0xff]  ;;  %v430_v52 = vor.u32 %v428_v28, %v427_v9 }
  0x94   : > { %1650 = vmatmul.mubr.bf16.gmra.mxu1 %v6729_v46  ;;  %1496 = vmatprep.mubr.bf16.mxu0 %v6760_v1  ;;  %v6861_v31 = vld [vmem:[#allocation5 + $0x238] sm:$0xff]   ;;  %v6875_v63 = vsel %vm6597_vm2, %v427_v9, %v493_v43  ;;  %v436_v28 = vshll.u32 %v6825_v16, 16  ;;  %v434_v43 = vor.u32 %v432_v0, %v431_v62 }
  0x95   : > { %1657 = vmatprep.mubr.bf16.mxu1 %v6701_v21  ;;  %5200 = vmatpush3.bf16.msra.mxu0 %v6126_v15  ;;  %v492_v15 = vrot.slane %v424_v60, 7  ;;  %v6847_v42 = vrot.slane %v799_v14, 1  ;;  %v6858_v60 = vsel %vm694_vm3, %v761_v45, %v6748_v6  ;;  %v6138_v14 = vld [vmem:[#allocation5 + $0x1c0] sm:$0xff]   ;;  %v6871_v6 = vrot.slane %v794_v2, 1 }
  0x96   : > { %5201 = vmatprep.subr.bf16.mxu0 %v6130_v39  ;;  %v6136_v39 = vld [vmem:[#allocation5 + $0x1c8] sm:$0xff]   ;;  %5310 = vmatpush3.bf16.msra.mxu1 %v6135_v24  ;;  %v6139_v2 = vld [vmem:[#allocation5 + $0x180] sm:$0xff]  }
  0x97   : > { %v6851_v32 = vsel %vm6597_vm2, %v423_v13, %v492_v15  ;;  %5311 = vmatprep.subr.bf16.mxu1 %v6136_v39  ;;  %v6866_v13 = vsel %vm6597_vm2, %v351_v59, %v426_v40  ;;  %v320_v39 = vpack.c.bf16 %v300_v51, %v299_v22  ;;  %v773_v59 = vor.u32 %v772_v5, %v768_v49  ;;  %v301_v51 = vld [vmem:[%s6581_s30 + $0xe0] sm:$0xff]  ;;  %v302_v40 = vld [vmem:[%s6581_s30 + $0xe8] sm:$0xff] }
  0x98   : > { %v811_v24 = vshll.u32 %v6851_v32, 16  ;;  %v494_v15 = vrot.slane %v432_v0, 7  ;;  %v806_v9 = vshll.u32 %v6866_v13, 16  ;;  %v6890_v49 = vsel %vm920_vm4, %v936_v3, %v937_v8 }
  0x99   : > { %5202 = vmatpush3.bf16.msra.mxu0 %v6131_v50  ;;  %v360_v50 = vshrl.u32 %v6825_v16, 16  ;;  %v6896_v16 = vsel %vm6597_vm2, %v354_v10, %v430_v52  ;;  %v823_v22 = vshll.u32 %v6875_v63, 16  ;;  %v495_v0 = vrot.slane %v436_v28, 7 }
  0x9a   : > { %5907 = vmatprep.subr.bf16.mxu0 %v6861_v31  ;;  %5312 = vmatpush3.bf16.msra.mxu1 %v6137_v34  ;;  %v6892_v5 = vrot.slane %v811_v24, 1  ;;  %v440_v35 = vshll.u32 %v320_v39, 16  ;;  %v6904_v3 = vsel %vm694_vm3, %v773_v59, %v6792_v41  ;;  %v6909_v10 = vsel %vm6597_vm2, %v357_v54, %v434_v43 }
  0x9b   : > { %1497 = vmatmul.mubr.bf16.gmra.mxu0 %v6670_v53  ;;  %v435_v45 = vrot.slane %v360_v50, 7  ;;  %5313 = vmatprep.subr.bf16.mxu1 %v6138_v14  ;;  %v363_v14 = vshrl.u32 %v320_v39, 16  ;;  %v6913_v52 = vsel %vm6597_vm2, %v431_v62, %v494_v15  ;;  %v808_v39 = vrot.slane %v806_v9, 1 }
  0x9c   : > { %1658 = vmatmul.mubr.bf16.gmra.mxu1 %v6771_v33  ;;  %1504 = vmatprep.mubr.bf16.mxu0 %v6829_v27  ;;  %v818_v41 = vshll.u32 %v6896_v16, 16  ;;  %v6927_v15 = vpack.c.bf16 %v302_v40, %v301_v51  ;;  %v830_v9 = vshll.u32 %v6909_v10, 16  ;;  %v835_v43 = vshll.u32 %v6913_v52, 16 }
  0x9d   : > { %1665 = vmatprep.mubr.bf16.mxu1 %v6713_v29  ;;  %v438_v34 = vor.u32 %v436_v28, %v435_v45  ;;  %v439_v24 = vrot.slane %v363_v14, 7  ;;  %v6933_v28 = vsel %vm6597_vm2, %v435_v45, %v495_v0  ;;  %v496_v8 = vrot.slane %v440_v35, 7 }
  0x9e   : > { %5314 = vmatpush3.bf16.msra.mxu1 %v6139_v2  ;;  %v6920_v2 = vrot.slane %v823_v22, 1  ;;  %v828_v22 = vshrl.u32 %v6909_v10, 16  ;;  %v820_v54 = vrot.slane %v818_v41, 1  ;;  %v6946_v45 = vsel %vm920_vm4, %v939_v44, %v940_v36 }
  0x9f   : > { %v6925_v62 = vsel %vm6597_vm2, %v360_v50, %v438_v34  ;;  %v442_v59 = vor.u32 %v440_v35, %v439_v24  ;;  %v785_v34 = vor.u32 %v6836_v23, %v780_v47  ;;  %v847_v0 = vshll.u32 %v6933_v28, 16 }
  0xa0   : > { %v842_v51 = vshll.u32 %v6925_v62, 16  ;;  %v9070_v35 = vshrl.u32 %v6927_v15, 16  ;;  %v832_v41 = vrot.slane %v830_v9, 1  ;;  %v837_v50 = vrot.slane %v835_v43, 1 }
  0xa1   : > { %v840_v40 = vshrl.u32 %v6925_v62, 16  ;;  %v6956_v56 = vsel %vm6597_vm2, %v363_v14, %v442_v59  ;;  %v6960_v36 = vsel %vm6597_vm2, %v439_v24, %v496_v8  ;;  %v957_v47 = vrot.slane %v6925_v62, 1 }
  0xa2   : > { %v844_v44 = vrot.slane %v842_v51, 1  ;;  %v958_v23 = vrot.slane %v6933_v28, 1  ;;  %v444_v9 = vshll.u32 %v6927_v15, 16  ;;  %v849_v43 = vrot.slane %v847_v0, 1 }
  0xa3   : > { %1505 = vmatmul.mubr.bf16.gmra.mxu0 %v6701_v21  ;;  %v852_v61 = vshrl.u32 %v6956_v56, 16  ;;  %v854_v14 = vshll.u32 %v6956_v56, 16  ;;  %v443_v8 = vrot.slane %v9070_v35, 7  ;;  %v6973_v24 = vsel %vm694_vm3, %v785_v34, %v6838_v26 }
  0xa4   : > { %1666 = vmatmul.mubr.bf16.gmra.mxu1 %v6814_v4  ;;  %1512 = vmatprep.mubr.bf16.mxu0 %v6858_v60  ;;  %v859_v59 = vshll.u32 %v6960_v36, 16  ;;  %v497_v51 = vrot.slane %v444_v9, 7  ;;  %v6983_v28 = vsel %vm920_vm4, %v942_v55, %v943_v19  ;;  %v9093_v0 = vshrl.u32 %v6820_v11, 16 }
  0xa5   : > { %1673 = vmatprep.mubr.bf16.mxu1 %v6752_v7  ;;  %9092 = vst [vmem:[#allocation13_spill] sm:$0xff] %v6983_v28  ;;  %v856_v38 = vrot.slane %v854_v14, 1  ;;  %v9094_v55 = vrot.slane %v6800_v57, 1  ;;  %v9095_v19 = vrot.slane %v6820_v11, 1  ;;  %v303_v14 = vld [vmem:[%s6581_s30 + $0xf0] sm:$0xff]  ;;  %v304_v57 = vld [vmem:[%s6581_s30 + $0xf8] sm:$0xff] }
  0xa6   : > { %v797_v26 = vor.u32 %v6871_v6, %v9093_v0  ;;  %v861_v35 = vrot.slane %v859_v59, 1  ;;  %v9096_v0 = vshrl.u32 %v6866_v13, 16  ;;  %v9097_v59 = vrot.slane %v6851_v32, 1 }
  0xa7   : > { %v7001_v6 = vsel %vm920_vm4, %v9095_v19, %v9094_v55  ;;  %v9099_v55 = vshrl.u32 %v6896_v16, 16  ;;  %v9100_v32 = vrot.slane %v6875_v63, 1  ;;  %v9102_v63 = vrot.slane %v6913_v52, 1 }
  0xa8   : > { %v6992_v34 = vsel %vm694_vm3, %v797_v26, %v6847_v42  ;;  %v9098_v26 = vrot.slane %v6866_v13, 1  ;;  %v7067_v52 = vsel %vm920_vm4, %v957_v47, %v958_v23 }
  0xa9   : > { %v821_v19 = vor.u32 %v820_v54, %v9099_v55  ;;  %v833_v55 = vor.u32 %v832_v41, %v828_v22  ;;  %v446_v22 = vor.u32 %v444_v9, %v443_v8  ;;  %v9104_v41 = vshrl.u32 %v6927_v15, 16 }
  0xaa   : > { %v857_v9 = vor.u32 %v856_v38, %v852_v61  ;;  %v960_v15 = vrot.slane %v6956_v56, 1 }
  0xab   : > { %1513 = vmatmul.mubr.bf16.gmra.mxu0 %v6713_v29 }
  0xac   : > { %1674 = vmatmul.mubr.bf16.gmra.mxu1 %v6890_v49  ;;  %1520 = vmatprep.mubr.bf16.mxu0 %v6904_v3  ;;  %v7078_v47 = vsel %vm694_vm3, %v857_v9, %v861_v35 }
  0xad   : > { %1681 = vmatprep.mubr.bf16.mxu1 %v6775_v20 }
  0xb3   : > { %1521 = vmatmul.mubr.bf16.gmra.mxu0 %v6752_v7 }
  0xb4   : > { %1682 = vmatmul.mubr.bf16.gmra.mxu1 %v6946_v45  ;;  %1528 = vmatprep.mubr.bf16.mxu0 %v6973_v24 }
  0xb5   : > { %1689 = vmatprep.mubr.bf16.mxu1 %v6820_v11 }
  0xbb   : > { %1529 = vmatmul.mubr.bf16.gmra.mxu0 %v6775_v20 }
  0xbc   : > { %1690 = vmatmul.mubr.bf16.gmra.mxu1 %v6983_v28  ;;  %1536 = vmatprep.mubr.bf16.mxu0 %v6992_v34  ;;  %v809_v28 = vor.u32 %v808_v39, %v9096_v0  ;;  %v7020_v39 = vsel %vm920_vm4, %v9098_v26, %v9097_v59  ;;  %v9101_v0 = vrot.slane %v6896_v16, 1 }
  0xbd   : > { %1697 = vmatprep.mubr.bf16.mxu1 %v6866_v13 }
  0xbe   : > { %v7009_v42 = vsel %vm694_vm3, %v809_v28, %v6892_v5  ;;  %v322_v5 = vpack.c.bf16 %v304_v57, %v303_v14  ;;  %v7028_v28 = vsel %vm694_vm3, %v821_v19, %v6920_v2  ;;  %v7037_v59 = vsel %vm920_vm4, %v9101_v0, %v9100_v32 }
  0xbf   : > { %v7042_v2 = vsel %vm694_vm3, %v833_v55, %v837_v50  ;;  %v9103_v14 = vrot.slane %v6909_v10, 1  ;;  %v845_v19 = vor.u32 %v844_v44, %v840_v40  ;;  %v961_v32 = vrot.slane %v6960_v36, 1 }
  0xc0   : > { %v369_v54 = vshrl.u32 %v322_v5, 16  ;;  %v448_v26 = vshll.u32 %v322_v5, 16  ;;  %v7062_v5 = vsel %vm6597_vm2, %v9104_v41, %v446_v22  ;;  %v6142_v41 = vld [vmem:[#allocation5 + $0x228] sm:$0xff]  }
  0xc1   : > { %v7051_v57 = vsel %vm920_vm4, %v9103_v14, %v9102_v63  ;;  %v7056_v50 = vsel %vm694_vm3, %v845_v19, %v849_v43  ;;  %v866_v40 = vshll.u32 %v7062_v5, 16  ;;  %v548_v43 = vsel %vm6597_vm2, %v443_v8, %v497_v51 }
  0xc2   : > { %v447_v44 = vrot.slane %v369_v54, 7  ;;  %v864_v0 = vshrl.u32 %v7062_v5, 16  ;;  %v871_v55 = vshll.u32 %v548_v43, 16  ;;  %v7083_v61 = vsel %vm920_vm4, %v960_v15, %v961_v32 }
  0xc3   : > { %1537 = vmatmul.mubr.bf16.gmra.mxu0 %v6820_v11  ;;  %v868_v23 = vrot.slane %v866_v40, 1  ;;  %v498_v8 = vrot.slane %v448_v26, 7  ;;  %v963_v14 = vrot.slane %v7062_v5, 1  ;;  %v964_v19 = vrot.slane %v548_v43, 1 }
  0xc4   : > { %1698 = vmatmul.mubr.bf16.gmra.mxu1 %v7001_v6  ;;  %1544 = vmatprep.mubr.bf16.mxu0 %v7009_v42  ;;  %v450_v63 = vor.u32 %v448_v26, %v447_v44  ;;  %v873_v38 = vrot.slane %v871_v55, 1  ;;  %v6141_v26 = vld [vmem:[#allocation5 + $0x230] sm:$0xff]  }
  0xc5   : > { %1705 = vmatprep.mubr.bf16.mxu1 %v6896_v16  ;;  %v869_v51 = vor.u32 %v868_v23, %v864_v0  ;;  %v7091_v35 = vsel %vm6597_vm2, %v447_v44, %v498_v8 }
  0xc6   : > { %v7087_v36 = vsel %vm6597_vm2, %v369_v54, %v450_v63  ;;  %v7102_v54 = vsel %vm920_vm4, %v963_v14, %v964_v19 }
  0xc7   : > { %v7097_v22 = vsel %vm694_vm3, %v869_v51, %v873_v38 }
  0xcb   : > { %1545 = vmatmul.mubr.bf16.gmra.mxu0 %v6866_v13 }
  0xcc   : > { %1706 = vmatmul.mubr.bf16.gmra.mxu1 %v7020_v39  ;;  %1552 = vmatprep.mubr.bf16.mxu0 %v7028_v28 }
  0xcd   : > { %1713 = vmatprep.mubr.bf16.mxu1 %v6909_v10 }
  0xd3   : > { %1553 = vmatmul.mubr.bf16.gmra.mxu0 %v6896_v16 }
  0xd4   : > { %1714 = vmatmul.mubr.bf16.gmra.mxu1 %v7037_v59  ;;  %1560 = vmatprep.mubr.bf16.mxu0 %v7042_v2 }
  0xd5   : > { %1721 = vmatprep.mubr.bf16.mxu1 %v6925_v62 }
  0xdb   : > { %1561 = vmatmul.mubr.bf16.gmra.mxu0 %v6909_v10 }
  0xdc   : > { %1722 = vmatmul.mubr.bf16.gmra.mxu1 %v7051_v57  ;;  %1568 = vmatprep.mubr.bf16.mxu0 %v7056_v50 }
  0xdd   : > { %1729 = vmatprep.mubr.bf16.mxu1 %v6956_v56 }
  0xe3   : > { %1569 = vmatmul.mubr.bf16.gmra.mxu0 %v6925_v62 }
  0xe4   : > { %1730 = vmatmul.mubr.bf16.gmra.mxu1 %v7067_v52  ;;  %1576 = vmatprep.mubr.bf16.mxu0 %v7078_v47 }
  0xe5   : > { %1737 = vmatprep.mubr.bf16.mxu1 %v7062_v5 }
  0xeb   : > { %1577 = vmatmul.mubr.bf16.gmra.mxu0 %v6956_v56 }
  0xec   : > { %1738 = vmatmul.mubr.bf16.gmra.mxu1 %v7083_v61  ;;  %1584 = vmatprep.mubr.bf16.mxu0 %v7097_v22 }
  0xed   : > { %1745 = vmatprep.mubr.bf16.mxu1 %v7087_v36 }
  0xf3   : > { %1585 = vmatmul.mubr.bf16.gmra.mxu0 %v7062_v5 }
  0xf4   : > { %1746 = vmatmul.mubr.bf16.gmra.mxu1 %v7102_v54  ;;  %1786 = vmatprep.mubr.bf16.mxu0 %v6653_v37  ;;  %v6143_v37 = vld [vmem:[#allocation5 + $0x220] sm:$0xff]  }
  0xf5   : > { %1947 = vmatprep.mubr.bf16.mxu1 %v6637_v25 }
  0xfb   : > { %1787 = vmatmul.mubr.bf16.vlgmr.msra.gmra.mxu0 %v6643_v30  ;;  %v6145_v30 = vld [vmem:[#allocation5 + $0x210] sm:$0xff]  }
  0xfc   : > { %1948 = vmatmul.mubr.bf16.vlgmr.msra.gmra.mxu1 %v6607_v58  ;;  %5908 = vmatpush3.bf16.msra.mxu0 %v6861_v31  ;;  %v6144_v58 = vld [vmem:[#allocation5 + $0x218] sm:$0xff]  }
  0xfd   : > { %1955 = vmatprep.mubr.bf16.mxu1 %v6694_v18  ;;  %1794 = vmatprep.mubr.bf16.mxu0 %v6624_v12 }
  0xfe   : > { %5909 = vmatprep.subr.bf16.mxu0 %v6141_v26 }
 0x100   : > { %5910 = vmatpush3.bf16.msra.mxu0 %v6141_v26 }
 0x101   : > { %5911 = vmatprep.subr.bf16.mxu0 %v6142_v41 }
 0x103   : > { %1795 = vmatmul.mubr.bf16.gmra.mxu0 %v6637_v25  ;;  %v6147_v25 = vld [vmem:[#allocation5 + $0x200] sm:$0xff]  }
 0x104   : > { %1956 = vmatmul.mubr.bf16.gmra.mxu1 %v6629_v17  ;;  %1802 = vmatprep.mubr.bf16.mxu0 %v6729_v46  ;;  %v6146_v17 = vld [vmem:[#allocation5 + $0x208] sm:$0xff]  }
 0x105   : > { %1963 = vmatprep.mubr.bf16.mxu1 %v6760_v1  ;;  %5912 = vmatpush3.bf16.msra.mxu0 %v6142_v41 }
 0x106   : > { %5913 = vmatprep.subr.bf16.mxu0 %v6143_v37 }
 0x109   : > { %5914 = vmatpush3.bf16.msra.mxu0 %v6143_v37 }
 0x10a   : > { %5915 = vmatprep.subr.bf16.mxu0 %v6144_v58 }
 0x10b   : > { %1803 = vmatmul.mubr.bf16.gmra.mxu0 %v6694_v18 }
 0x10c   : > { %1964 = vmatmul.mubr.bf16.gmra.mxu1 %v6670_v53  ;;  %1810 = vmatprep.mubr.bf16.mxu0 %v6771_v33  ;;  %v9105_v53 = vld [vmem:[#allocation13_spill] sm:$0xff] }
 0x10d   : > { %1971 = vmatprep.mubr.bf16.mxu1 %v6829_v27  ;;  %5916 = vmatpush3.bf16.msra.mxu0 %v6144_v58 }
 0x10e   : > { %5917 = vmatprep.subr.bf16.mxu0 %v6145_v30 }
 0x111   : > { %5918 = vmatpush3.bf16.msra.mxu0 %v6145_v30 }
 0x112   : > { %5919 = vmatprep.subr.bf16.mxu0 %v6146_v17 }
 0x113   : > { %1811 = vmatmul.mubr.bf16.gmra.mxu0 %v6760_v1 }
 0x114   : > { %1972 = vmatmul.mubr.bf16.gmra.mxu1 %v6701_v21  ;;  %1818 = vmatprep.mubr.bf16.mxu0 %v6814_v4 }
 0x115   : > { %1979 = vmatprep.mubr.bf16.mxu1 %v6858_v60  ;;  %5920 = vmatpush3.bf16.msra.mxu0 %v6146_v17 }
 0x116   : > { %5921 = vmatprep.subr.bf16.mxu0 %v6147_v25 }
 0x119   : > { %5922 = vmatpush3.bf16.msra.mxu0 %v6147_v25 }
 0x11b   : > { %1819 = vmatmul.mubr.bf16.gmra.mxu0 %v6829_v27 }
 0x11c   : > { %1980 = vmatmul.mubr.bf16.gmra.mxu1 %v6713_v29  ;;  %1826 = vmatprep.mubr.bf16.mxu0 %v6890_v49 }
 0x11d   : > { %1987 = vmatprep.mubr.bf16.mxu1 %v6904_v3 }
 0x123   : > { %1827 = vmatmul.mubr.bf16.gmra.mxu0 %v6858_v60 }
 0x124   : > { %1988 = vmatmul.mubr.bf16.gmra.mxu1 %v6752_v7  ;;  %1834 = vmatprep.mubr.bf16.mxu0 %v6946_v45 }
 0x125   : > { %1995 = vmatprep.mubr.bf16.mxu1 %v6973_v24 }
 0x12b   : > { %1835 = vmatmul.mubr.bf16.gmra.mxu0 %v6904_v3 }
 0x12c   : > { %1996 = vmatmul.mubr.bf16.gmra.mxu1 %v6775_v20  ;;  %1842 = vmatprep.mubr.bf16.mxu0 %v9105_v53 }
 0x12d   : > { %2003 = vmatprep.mubr.bf16.mxu1 %v6992_v34 }
 0x133   : > { %1843 = vmatmul.mubr.bf16.gmra.mxu0 %v6973_v24 }
 0x134   : > { %2004 = vmatmul.mubr.bf16.gmra.mxu1 %v6820_v11  ;;  %1850 = vmatprep.mubr.bf16.mxu0 %v7001_v6 }
 0x135   : > { %2011 = vmatprep.mubr.bf16.mxu1 %v7009_v42 }
 0x13b   : > { %v4979_v7 = vpop.f32.mrf.mxu0  ;;  %1851 = vmatmul.mubr.bf16.gmra.mxu0 %v6992_v34 }
 0x13c   : > { %v5091_v18 = vpop.f32.mrf.mxu1  ;;  %2012 = vmatmul.mubr.bf16.gmra.mxu1 %v6866_v13  ;;  %1858 = vmatprep.mubr.bf16.mxu0 %v7020_v39 }
 0x13d   : > { %2019 = vmatprep.mubr.bf16.mxu1 %v7028_v28  ;;  %v4980_v20 = vpop.f32.mrf.mxu0 }
 0x13e   : > { %v5092_v21 = vpop.f32.mrf.mxu1  ;;  %v4981_v27 = vadd.f32 %v4980_v20, %v4979_v7 }
 0x13f   : > { %v5093_v29 = vadd.f32 %v5092_v21, %v5091_v18  ;;  %v4982_v31 = vpop.f32.mrf.mxu0 }
 0x140   : > { %v5094_v1 = vpop.f32.mrf.mxu1 }
 0x141   : > { %v7146_v24 = vadd.f32 %v5093_v29, %v4981_v27  ;;  %v4983_v13 = vpop.f32.mrf.mxu0 }
 0x142   : > { %v5095_v11 = vpop.f32.mrf.mxu1  ;;  %v4984_v44 = vadd.f32 %v4983_v13, %v4982_v31  ;;  %v982_v31 = vshrl.u32 %v7087_v36, 16  ;;  %v989_v13 = vshll.u32 %v7091_v35, 16 }
 0x143   : > { %v5096_v60 = vadd.f32 %v5095_v11, %v5094_v1  ;;  %v4985_v34 = vpop.f32.mrf.mxu0  ;;  %1859 = vmatmul.mubr.bf16.gmra.mxu0 %v7009_v42 }
 0x144   : > { %v5097_v3 = vpop.f32.mrf.mxu1  ;;  %2020 = vmatmul.mubr.bf16.gmra.mxu1 %v6896_v16  ;;  %1866 = vmatprep.mubr.bf16.mxu0 %v7037_v59 }
 0x145   : > { %2027 = vmatprep.mubr.bf16.mxu1 %v7042_v2  ;;  %v7150_v15 = vadd.f32 %v5096_v60, %v4984_v44  ;;  %v4986_v32 = vpop.f32.mrf.mxu0 }
 0x146   : > { %v5098_v40 = vpop.f32.mrf.mxu1  ;;  %v4987_v23 = vadd.f32 %v4986_v32, %v4985_v34 }
 0x147   : > { %v5099_v9 = vadd.f32 %v5098_v40, %v5097_v3  ;;  %v4988_v55 = vpop.f32.mrf.mxu0 }
 0x148   : > { %v5100_v43 = vpop.f32.mrf.mxu1 }
 0x149   : > { %v7154_v8 = vadd.f32 %v5099_v9, %v4987_v23  ;;  %v4989_v51 = vpop.f32.mrf.mxu0  ;;  %v991_v23 = vrot.slane %v989_v13, 1 }
 0x14a   : > { %v5101_v0 = vpop.f32.mrf.mxu1  ;;  %v4990_v42 = vadd.f32 %v4989_v51, %v4988_v55 }
 0x14b   : > { %v5102_v16 = vadd.f32 %v5101_v0, %v5100_v43  ;;  %v4991_v19 = vpop.f32.mrf.mxu0  ;;  %1867 = vmatmul.mubr.bf16.gmra.mxu0 %v7028_v28  ;;  %v984_v28 = vshll.u32 %v7087_v36, 16 }
 0x14c   : > { %v5103_v63 = vpop.f32.mrf.mxu1  ;;  %2028 = vmatmul.mubr.bf16.gmra.mxu1 %v6909_v10  ;;  %1874 = vmatprep.mubr.bf16.mxu0 %v7051_v57 }
 0x14d   : > { %2035 = vmatprep.mubr.bf16.mxu1 %v7056_v50  ;;  %v7158_v41 = vadd.f32 %v5102_v16, %v4990_v42  ;;  %v4992_v37 = vpop.f32.mrf.mxu0  ;;  %v986_v3 = vrot.slane %v984_v28, 1 }
 0x14e   : > { %v5104_v38 = vpop.f32.mrf.mxu1  ;;  %v4993_v30 = vadd.f32 %v4992_v37, %v4991_v19 }
 0x14f   : > { %v5105_v14 = vadd.f32 %v5104_v38, %v5103_v63  ;;  %v4994_v17 = vpop.f32.mrf.mxu0  ;;  %v987_v0 = vor.u32 %v986_v3, %v982_v31 }
 0x150   : > { %v5106_v26 = vpop.f32.mrf.mxu1 }
 0x151   : > { %v7162_v18 = vadd.f32 %v5105_v14, %v4993_v30  ;;  %v4995_v21 = vpop.f32.mrf.mxu0  ;;  %v992_v14 = vsel %vm694_vm3, %v987_v0, %v991_v23 }
 0x152   : > { %v5107_v58 = vpop.f32.mrf.mxu1  ;;  %v4996_v7 = vadd.f32 %v4995_v21, %v4994_v17 }
 0x153   : > { %v5108_v10 = vadd.f32 %v5107_v58, %v5106_v26  ;;  %v4997_v20 = vpop.f32.mrf.mxu0  ;;  %1875 = vmatmul.mubr.bf16.gmra.mxu0 %v7042_v2 }
 0x154   : > { %v5109_v25 = vpop.f32.mrf.mxu1  ;;  %2036 = vmatmul.mubr.bf16.gmra.mxu1 %v6925_v62  ;;  %1882 = vmatprep.mubr.bf16.mxu0 %v7067_v52 }
 0x155   : > { %2043 = vmatprep.mubr.bf16.mxu1 %v7078_v47  ;;  %v7167_v27 = vadd.f32 %v5108_v10, %v4996_v7  ;;  %v4998_v60 = vpop.f32.mrf.mxu0 }
 0x156   : > { %v5110_v29 = vpop.f32.mrf.mxu1  ;;  %v4999_v40 = vadd.f32 %v4998_v60, %v4997_v20  ;;  %v996_v20 = vrot.slane %v7087_v36, 1 }
 0x157   : > { %v5111_v1 = vadd.f32 %v5110_v29, %v5109_v25  ;;  %v5000_v9 = vpop.f32.mrf.mxu0 }
 0x158   : > { %v5112_v11 = vpop.f32.mrf.mxu1 }
 0x159   : > { %v7173_v43 = vadd.f32 %v5111_v1, %v4999_v40  ;;  %v5001_v2 = vpop.f32.mrf.mxu0 }
 0x15a   : > { %v5113_v62 = vpop.f32.mrf.mxu1  ;;  %v5002_v16 = vadd.f32 %v5001_v2, %v5000_v9 }
 0x15b   : > { %v5114_v44 = vadd.f32 %v5113_v62, %v5112_v11  ;;  %v5003_v63 = vpop.f32.mrf.mxu0  ;;  %1883 = vmatmul.mubr.bf16.gmra.mxu0 %v7056_v50  ;;  %v997_v11 = vrot.slane %v7091_v35, 1 }
 0x15c   : > { %v5115_v34 = vpop.f32.mrf.mxu1  ;;  %2044 = vmatmul.mubr.bf16.gmra.mxu1 %v6956_v56  ;;  %1890 = vmatprep.mubr.bf16.mxu0 %v7083_v61 }
 0x15d   : > { %2051 = vmatprep.mubr.bf16.mxu1 %v7097_v22  ;;  %v7177_v38 = vadd.f32 %v5114_v44, %v5002_v16  ;;  %v5004_v42 = vpop.f32.mrf.mxu0  ;;  %v7195_v44 = vsel %vm920_vm4, %v996_v20, %v997_v11 }
 0x15e   : > { %v5116_v32 = vpop.f32.mrf.mxu1  ;;  %v5005_v19 = vadd.f32 %v5004_v42, %v5003_v63 }
 0x15f   : > { %v5117_v55 = vadd.f32 %v5116_v32, %v5115_v34  ;;  %v5006_v26 = vpop.f32.mrf.mxu0 }
 0x160   : > { %v5118_v51 = vpop.f32.mrf.mxu1 }
 0x161   : > { %v7182_v58 = vadd.f32 %v5117_v55, %v5005_v19  ;;  %v5007_v10 = vpop.f32.mrf.mxu0 }
 0x162   : > { %v5119_v56 = vpop.f32.mrf.mxu1  ;;  %v5008_v17 = vadd.f32 %v5007_v10, %v5006_v26 }
 0x163   : > { %v5120_v30 = vadd.f32 %v5119_v56, %v5118_v51  ;;  %v5009_v21 = vpop.f32.mrf.mxu0  ;;  %1891 = vmatmul.mubr.bf16.gmra.mxu0 %v7078_v47 }
 0x164   : > { %v5121_v37 = vpop.f32.mrf.mxu1  ;;  %2052 = vmatmul.mubr.bf16.gmra.mxu1 %v7062_v5  ;;  %1898 = vmatprep.mubr.bf16.mxu0 %v7102_v54 }
 0x165   : > { %2059 = vmatprep.mubr.bf16.mxu1 %v992_v14  ;;  %v7185_v28 = vadd.f32 %v5120_v30, %v5008_v17  ;;  %v5010_v7 = vpop.f32.mrf.mxu0 }
 0x166   : > { %v5122_v50 = vpop.f32.mrf.mxu1  ;;  %v5011_v60 = vadd.f32 %v5010_v7, %v5009_v21 }
 0x167   : > { %v5123_v25 = vadd.f32 %v5122_v50, %v5121_v37  ;;  %v5012_v62 = vpop.f32.mrf.mxu0 }
 0x168   : > { %v5124_v29 = vpop.f32.mrf.mxu1 }
 0x169   : > { %v7191_v3 = vadd.f32 %v5123_v25, %v5011_v60  ;;  %v5013_v47 = vpop.f32.mrf.mxu0 }
 0x16a   : > { %v5125_v1 = vpop.f32.mrf.mxu1  ;;  %v5014_v9 = vadd.f32 %v5013_v47, %v5012_v62 }
 0x16b   : > { %v5126_v13 = vadd.f32 %v5125_v1, %v5124_v29  ;;  %v5015_v2 = vpop.f32.mrf.mxu0  ;;  %1899 = vmatmul.mubr.bf16.gmra.mxu0 %v7097_v22 }
 0x16c   : > { %v5127_v31 = vpop.f32.mrf.mxu1  ;;  %2060 = vmatmul.mubr.bf16.gmra.mxu1 %v7087_v36  ;;  %1906 = vmatprep.mubr.bf16.mxu0 %v7195_v44 }
 0x16d   : > { %2067 = vmatprep.mubr.bf16.mxu1 %v7097_v22  ;;  %v7198_v32 = vadd.f32 %v5126_v13, %v5014_v9  ;;  %v5016_v36 = vpop.f32.mrf.mxu0 }
 0x16e   : > { %v5128_v40 = vpop.f32.mrf.mxu1  ;;  %v5017_v23 = vadd.f32 %v5016_v36, %v5015_v2 }
 0x16f   : > { %v5129_v34 = vadd.f32 %v5128_v40, %v5127_v31  ;;  %v5018_v16 = vpop.f32.mrf.mxu0 }
 0x170   : > { %v5130_v35 = vpop.f32.mrf.mxu1 }
 0x171   : > { %v7202_v63 = vadd.f32 %v5129_v34, %v5017_v23  ;;  %v5019_v42 = vpop.f32.mrf.mxu0 }
 0x172   : > { %v5131_v0 = vpop.f32.mrf.mxu1  ;;  %v5020_v19 = vadd.f32 %v5019_v42, %v5018_v16 }
 0x173   : > { %v5132_v51 = vadd.f32 %v5131_v0, %v5130_v35  ;;  %v5021_v22 = vpop.f32.mrf.mxu0  ;;  %1907 = vmatmul.mubr.bf16.gmra.mxu0 %v992_v14 }
 0x174   : > { %v5133_v55 = vpop.f32.mrf.mxu1  ;;  %2068 = vmatmul.mubr.bf16.gmra.mxu1 %v7062_v5  ;;  %5923 = vmatprep.mubr.bf16.mxu0 %v6624_v12 }
 0x175   : > { %v7204_v30 = vadd.f32 %v5132_v51, %v5020_v19  ;;  %v5022_v10 = vpop.f32.mrf.mxu0 }
 0x176   : > { %v5134_v56 = vpop.f32.mrf.mxu1  ;;  %v5023_v17 = vadd.f32 %v5022_v10, %v5021_v22 }
 0x177   : > { %v5135_v26 = vadd.f32 %v5134_v56, %v5133_v55  ;;  %v5024_v25 = vpop.f32.mrf.mxu0 }
 0x178   : > { %v5136_v37 = vpop.f32.mrf.mxu1 }
 0x179   : > { %v7207_v5 = vadd.f32 %v5135_v26, %v5023_v17  ;;  %v5025_v7 = vpop.f32.mrf.mxu0 }
 0x17a   : > { %v5137_v50 = vpop.f32.mrf.mxu1  ;;  %v5026_v20 = vadd.f32 %v5025_v7, %v5024_v25 }
 0x17b   : > { %v5138_v29 = vadd.f32 %v5137_v50, %v5136_v37  ;;  %v5027_v60 = vpop.f32.mrf.mxu0  ;;  %5924 = vmatmul.mubr.bf16.vlgmr.msra.gmra.mxu0 %v6729_v46 }
 0x17c   : > { %v5139_v21 = vpop.f32.mrf.mxu1  ;;  %5927 = vmatprep.mubr.bf16.mxu0 %v6771_v33 }
 0x17d   : > { %v7210_v62 = vadd.f32 %v5138_v29, %v5026_v20  ;;  %v5028_v12 = vpop.f32.mrf.mxu0 }
 0x17e   : > { %v5140_v1 = vpop.f32.mrf.mxu1  ;;  %v5029_v13 = vadd.f32 %v5028_v12, %v5027_v60 }
 0x17f   : > { %v5141_v11 = vadd.f32 %v5140_v1, %v5139_v21  ;;  %v5030_v47 = vpop.f32.mrf.mxu0 }
 0x180   : > { %v5142_v14 = vpop.f32.mrf.mxu1 }
 0x181   : > { %v7213_v9 = vadd.f32 %v5141_v11, %v5029_v13  ;;  %v5031_v2 = vpop.f32.mrf.mxu0 }
 0x182   : > { %v5143_v31 = vpop.f32.mrf.mxu1  ;;  %v5032_v36 = vadd.f32 %v5031_v2, %v5030_v47 }
 0x183   : > { %v5144_v34 = vadd.f32 %v5143_v31, %v5142_v14  ;;  %v5033_v23 = vpop.f32.mrf.mxu0  ;;  %5928 = vmatmul.mubr.bf16.gmra.mxu0 %v6814_v4 }
 0x184   : > { %v5145_v40 = vpop.f32.mrf.mxu1  ;;  %5931 = vmatprep.mubr.bf16.mxu0 %v6890_v49 }
 0x185   : > { %v7216_v16 = vadd.f32 %v5144_v34, %v5032_v36  ;;  %v5034_v33 = vpop.f32.mrf.mxu0 }
 0x186   : > { %v5146_v35 = vpop.f32.mrf.mxu1  ;;  %v5035_v51 = vadd.f32 %v5034_v33, %v5033_v23 }
 0x187   : > { %v5147_v0 = vadd.f32 %v5146_v35, %v5145_v40  ;;  %v5036_v42 = vpop.f32.mrf.mxu0 }
 0x188   : > { %v5148_v46 = vpop.f32.mrf.mxu1 }
 0x189   : > { %v7219_v19 = vadd.f32 %v5147_v0, %v5035_v51  ;;  %v5037_v22 = vpop.f32.mrf.mxu0 }
 0x18a   : > { %v5149_v55 = vpop.f32.mrf.mxu1  ;;  %v5038_v10 = vadd.f32 %v5037_v22, %v5036_v42 }
 0x18b   : > { %v5150_v26 = vadd.f32 %v5149_v55, %v5148_v46  ;;  %v5039_v17 = vpop.f32.mrf.mxu0  ;;  %5932 = vmatmul.mubr.bf16.gmra.mxu0 %v6946_v45 }
 0x18c   : > { %v5151_v56 = vpop.f32.mrf.mxu1  ;;  %5935 = vmatprep.mubr.bf16.mxu0 %v9105_v53 }
 0x18d   : > { %v7222_v25 = vadd.f32 %v5150_v26, %v5038_v10  ;;  %v5040_v49 = vpop.f32.mrf.mxu0 }
 0x18e   : > { %v5152_v37 = vpop.f32.mrf.mxu1  ;;  %v5041_v29 = vadd.f32 %v5040_v49, %v5039_v17 }
 0x18f   : > { %v5153_v50 = vadd.f32 %v5152_v37, %v5151_v56  ;;  %v5042_v7 = vpop.f32.mrf.mxu0 }
 0x190   : > { %v5154_v4 = vpop.f32.mrf.mxu1 }
 0x191   : > { %v7225_v20 = vadd.f32 %v5153_v50, %v5041_v29  ;;  %v5043_v60 = vpop.f32.mrf.mxu0 }
 0x192   : > { %v5155_v21 = vpop.f32.mrf.mxu1  ;;  %v5044_v12 = vadd.f32 %v5043_v60, %v5042_v7 }
 0x193   : > { %v5156_v11 = vadd.f32 %v5155_v21, %v5154_v4  ;;  %v5045_v13 = vpop.f32.mrf.mxu0  ;;  %5936 = vmatmul.mubr.bf16.gmra.mxu0 %v7001_v6 }
 0x194   : > { %v5157_v1 = vpop.f32.mrf.mxu1  ;;  %5939 = vmatprep.mubr.bf16.mxu0 %v7020_v39 }
 0x195   : > { %v7228_v47 = vadd.f32 %v5156_v11, %v5044_v12  ;;  %v5046_v53 = vpop.f32.mrf.mxu0 }
 0x196   : > { %v5158_v14 = vpop.f32.mrf.mxu1  ;;  %v5047_v34 = vadd.f32 %v5046_v53, %v5045_v13 }
 0x197   : > { %v5159_v31 = vadd.f32 %v5158_v14, %v5157_v1  ;;  %v5048_v2 = vpop.f32.mrf.mxu0 }
 0x198   : > { %v5160_v45 = vpop.f32.mrf.mxu1 }
 0x199   : > { %v7231_v36 = vadd.f32 %v5159_v31, %v5047_v34  ;;  %v5049_v23 = vpop.f32.mrf.mxu0 }
 0x19a   : > { %v5161_v40 = vpop.f32.mrf.mxu1  ;;  %v5050_v33 = vadd.f32 %v5049_v23, %v5048_v2 }
 0x19b   : > { %v5162_v0 = vadd.f32 %v5161_v40, %v5160_v45  ;;  %v5051_v51 = vpop.f32.mrf.mxu0  ;;  %5940 = vmatmul.mubr.bf16.gmra.mxu0 %v7037_v59 }
 0x19c   : > { %v5163_v35 = vpop.f32.mrf.mxu1  ;;  %5943 = vmatprep.mubr.bf16.mxu0 %v7051_v57 }
 0x19d   : > { %v7234_v42 = vadd.f32 %v5162_v0, %v5050_v33  ;;  %v5052_v39 = vpop.f32.mrf.mxu0 }
 0x19e   : > { %v5164_v46 = vpop.f32.mrf.mxu1  ;;  %v5053_v26 = vadd.f32 %v5052_v39, %v5051_v51 }
 0x19f   : > { %v5165_v55 = vadd.f32 %v5164_v46, %v5163_v35  ;;  %v5054_v22 = vpop.f32.mrf.mxu0 }
 0x1a0   : > { %v5166_v6 = vpop.f32.mrf.mxu1 }
 0x1a1   : > { %v7237_v10 = vadd.f32 %v5165_v55, %v5053_v26  ;;  %v5055_v17 = vpop.f32.mrf.mxu0 }
 0x1a2   : > { %v5167_v56 = vpop.f32.mrf.mxu1  ;;  %v5056_v49 = vadd.f32 %v5055_v17, %v5054_v22 }
 0x1a3   : > { %v5168_v50 = vadd.f32 %v5167_v56, %v5166_v6  ;;  %v5057_v29 = vpop.f32.mrf.mxu0  ;;  %5944 = vmatmul.mubr.bf16.gmra.mxu0 %v7067_v52 }
 0x1a4   : > { %v5169_v37 = vpop.f32.mrf.mxu1  ;;  %5947 = vmatprep.mubr.bf16.mxu0 %v7083_v61 }
 0x1a5   : > { %v7240_v7 = vadd.f32 %v5168_v50, %v5056_v49  ;;  %v5058_v57 = vpop.f32.mrf.mxu0 }
 0x1a6   : > { %v5170_v4 = vpop.f32.mrf.mxu1  ;;  %v5059_v11 = vadd.f32 %v5058_v57, %v5057_v29 }
 0x1a7   : > { %v5171_v21 = vadd.f32 %v5170_v4, %v5169_v37  ;;  %v5060_v60 = vpop.f32.mrf.mxu0 }
 0x1a8   : > { %v5172_v59 = vpop.f32.mrf.mxu1 }
 0x1a9   : > { %v7243_v12 = vadd.f32 %v5171_v21, %v5059_v11  ;;  %v5061_v13 = vpop.f32.mrf.mxu0 }
 0x1aa   : > { %v5173_v1 = vpop.f32.mrf.mxu1  ;;  %v5062_v53 = vadd.f32 %v5061_v13, %v5060_v60 }
 0x1ab   : > { %v5174_v31 = vadd.f32 %v5173_v1, %v5172_v59  ;;  %v5063_v34 = vpop.f32.mrf.mxu0  ;;  %5948 = vmatmul.mubr.bf16.gmra.mxu0 %v7102_v54 }
 0x1ac   : > { %v5175_v14 = vpop.f32.mrf.mxu1  ;;  %5951 = vmatprep.mubr.bf16.mxu0 %v7195_v44 }
 0x1ad   : > { %v7246_v2 = vadd.f32 %v5174_v31, %v5062_v53  ;;  %v5064_v61 = vpop.f32.mrf.mxu0 }
 0x1ae   : > { %v5176_v45 = vpop.f32.mrf.mxu1  ;;  %v5065_v0 = vadd.f32 %v5064_v61, %v5063_v34 }
 0x1af   : > { %v5177_v40 = vadd.f32 %v5176_v45, %v5175_v14  ;;  %v5066_v23 = vpop.f32.mrf.mxu0 }
 0x1b0   : > { %v5178_v52 = vpop.f32.mrf.mxu1 }
 0x1b1   : > { %v7249_v33 = vadd.f32 %v5177_v40, %v5065_v0  ;;  %v5067_v51 = vpop.f32.mrf.mxu0 }
 0x1b2   : > { %v5179_v35 = vpop.f32.mrf.mxu1  ;;  %v5068_v39 = vadd.f32 %v5067_v51, %v5066_v23 }
 0x1b3   : > { %v5180_v55 = vadd.f32 %v5179_v35, %v5178_v52  ;;  %v5069_v26 = vpop.f32.mrf.mxu0  ;;  %5952 = vmatmul.mubr.bf16.gmra.mxu0 %v7102_v54 }
 0x1b4   : > { %v5181_v46 = vpop.f32.mrf.mxu1 }
 0x1b5   : > { %v7252_v37 = vadd.f32 %v5180_v55, %v5068_v39  ;;  %v5070_v50 = vpop.f32.mrf.mxu0 }
 0x1b6   : > { %v5182_v6 = vpop.f32.mrf.mxu1  ;;  %v5071_v17 = vadd.f32 %v5070_v50, %v5069_v26  ;;  %v6149_v50 = vld [vmem:[#allocation7 + $0x38] sm:$0xff]  }
 0x1b7   : > { %v5183_v56 = vadd.f32 %v5182_v6, %v5181_v46  ;;  %v5072_v4 = vpop.f32.mrf.mxu0 }
 0x1b8   : > { %v5184_v22 = vpop.f32.mrf.mxu1 }
 0x1b9   : > { %v7254_v21 = vadd.f32 %v5183_v56, %v5071_v17  ;;  %v5073_v59 = vpop.f32.mrf.mxu0 }
 0x1ba   : > { %v5185_v44 = vpop.f32.mrf.mxu1  ;;  %v5074_v1 = vadd.f32 %v5073_v59, %v5072_v4 }
 0x1bb   : > { %v5186_v29 = vadd.f32 %v5185_v44, %v5184_v22  ;;  %v5203_v60 = vpop.f32.mrf.mxu0  ;;  %v6148_v22 = vld [vmem:[#allocation7 + $0x78] sm:$0xff]  }
 0x1bc   : > { %v5315_v49 = vpop.f32.mrf.mxu1  ;;  %5435 = vmatprep.subr.bf16.mxu1 %v6148_v22  ;;  %v6150_v22 = vld [vmem:[#allocation7 + $0x70] sm:$0xff]  }
 0x1bd   : > { %v7258_v31 = vadd.f32 %v5186_v29, %v5074_v1  ;;  %v5204_v54 = vpop.f32.mrf.mxu0  ;;  %5436 = vmatpush3.bf16.msra.mxu1 %v6149_v50  ;;  %v6151_v50 = vld [vmem:[#allocation7 + $0x30] sm:$0xff]  }
 0x1be   : > { %v5316_v57 = vpop.f32.mrf.mxu1  ;;  %v5205_v45 = vadd.f32 %v5204_v54, %v5203_v60  ;;  %5437 = vmatprep.subr.bf16.mxu1 %v6150_v22 }
 0x1bf   : > { %v5317_v11 = vadd.f32 %v5316_v57, %v5315_v49  ;;  %v5206_v53 = vpop.f32.mrf.mxu0 }
 0x1c0   : > { %v7256_v14 = vpop.f32.mrf.mxu1  ;;  %v1789_v34 = vadd.f32 %v5205_v45, %v7146_v24 }
 0x1c1   : > { %v5207_v52 = vpop.f32.mrf.mxu0  ;;  %5438 = vmatpush3.bf16.msra.mxu1 %v6151_v50 }
 0x1c2   : > { %v7260_v13 = vpop.f32.mrf.mxu1  ;;  %v5208_v35 = vadd.f32 %v5207_v52, %v5206_v53  ;;  %v7267_v0 = vadd.f32 %v5317_v11, %v1789_v34 }
 0x1c3   : > { %v5209_v23 = vpop.f32.mrf.mxu0 }
 0x1c4   : > { %v7262_v40 = vpop.f32.mrf.mxu1  ;;  %v7272_v55 = vadd.f32 %v5208_v35, %v7150_v15 }
 0x1c5   : > { %v5210_v51 = vpop.f32.mrf.mxu0 }
 0x1c6   : > { %v7265_v61 = vpop.f32.mrf.mxu1  ;;  %v5211_v39 = vadd.f32 %v5210_v51, %v5209_v23 }
 0x1c7   : > { %v5212_v56 = vpop.f32.mrf.mxu0 }
 0x1c8   : > { %v7269_v46 = vpop.f32.mrf.mxu1  ;;  %v7279_v24 = vadd.f32 %v5211_v39, %v7154_v8 }
 0x1c9   : > { %v5213_v44 = vpop.f32.mrf.mxu0 }
 0x1ca   : > { %v7274_v6 = vpop.f32.mrf.mxu1  ;;  %v5214_v4 = vadd.f32 %v5213_v44, %v5212_v56 }
 0x1cb   : > { %v5215_v49 = vpop.f32.mrf.mxu0 }
 0x1cc   : > { %v7276_v26 = vpop.f32.mrf.mxu1  ;;  %v7286_v29 = vadd.f32 %v5214_v4, %v7158_v41 }
 0x1cd   : > { %v5216_v59 = vpop.f32.mrf.mxu0 }
 0x1ce   : > { %v7281_v17 = vpop.f32.mrf.mxu1  ;;  %v5217_v1 = vadd.f32 %v5216_v59, %v5215_v49 }
 0x1cf   : > { %v5218_v8 = vpop.f32.mrf.mxu0 }
 0x1d0   : > { %v7283_v15 = vpop.f32.mrf.mxu1  ;;  %v7293_v60 = vadd.f32 %v5217_v1, %v7162_v18 }
 0x1d1   : > { %v5219_v54 = vpop.f32.mrf.mxu0 }
 0x1d2   : > { %v7288_v57 = vpop.f32.mrf.mxu1  ;;  %v5220_v53 = vadd.f32 %v5219_v54, %v5218_v8 }
 0x1d3   : > { %v5221_v34 = vpop.f32.mrf.mxu0 }
 0x1d4   : > { %v7290_v11 = vpop.f32.mrf.mxu1  ;;  %v7300_v41 = vadd.f32 %v5220_v53, %v7167_v27 }
 0x1d5   : > { %v5222_v35 = vpop.f32.mrf.mxu0 }
 0x1d6   : > { %v7295_v45 = vpop.f32.mrf.mxu1  ;;  %v5223_v51 = vadd.f32 %v5222_v35, %v5221_v34 }
 0x1d7   : > { %v5224_v39 = vpop.f32.mrf.mxu0 }
 0x1d8   : > { %v7297_v52 = vpop.f32.mrf.mxu1  ;;  %v7307_v18 = vadd.f32 %v5223_v51, %v7173_v43 }
 0x1d9   : > { %v5225_v44 = vpop.f32.mrf.mxu0 }
 0x1da   : > { %v7302_v23 = vpop.f32.mrf.mxu1  ;;  %v5226_v49 = vadd.f32 %v5225_v44, %v5224_v39 }
 0x1db   : > { %v5227_v59 = vpop.f32.mrf.mxu0 }
 0x1dc   : > { %v7304_v56 = vpop.f32.mrf.mxu1  ;;  %v7314_v1 = vadd.f32 %v5226_v49, %v7177_v38 }
 0x1dd   : > { %v5228_v8 = vpop.f32.mrf.mxu0 }
 0x1de   : > { %v7309_v4 = vpop.f32.mrf.mxu1  ;;  %v5229_v53 = vadd.f32 %v5228_v8, %v5227_v59 }
 0x1df   : > { %v5230_v43 = vpop.f32.mrf.mxu0 }
 0x1e0   : > { %v7311_v27 = vpop.f32.mrf.mxu1  ;;  %v7321_v35 = vadd.f32 %v5229_v53, %v7182_v58  ;;  %v6152_v53 = vld [vmem:[#allocation7 + $0x68] sm:$0xff]  }
 0x1e1   : > { %v5231_v51 = vpop.f32.mrf.mxu0  ;;  %5439 = vmatprep.subr.bf16.mxu1 %v6152_v53 }
 0x1e2   : > { %v7316_v54 = vpop.f32.mrf.mxu1  ;;  %9107 = vst [vmem:[#allocation14_spill] sm:$0xff] %v7321_v35  ;;  %v5232_v22 = vadd.f32 %v5231_v51, %v5230_v43  ;;  %v6153_v35 = vld [vmem:[#allocation7 + $0x28] sm:$0xff]  }
 0x1e3   : > { %9106 = vst [vmem:[#allocation13_spill] sm:$0xff] %v7316_v54  ;;  %v5233_v44 = vpop.f32.mrf.mxu0  ;;  %5440 = vmatpush3.bf16.msra.mxu1 %v6153_v35 }
 0x1e4   : > { %v7318_v34 = vpop.f32.mrf.mxu1  ;;  %v7328_v38 = vadd.f32 %v5232_v22, %v7185_v28 }
 0x1e5   : > { %v5234_v50 = vpop.f32.mrf.mxu0 }
 0x1e6   : > { %v7323_v39 = vpop.f32.mrf.mxu1  ;;  %9110 = vst [vmem:[#allocation17_spill] sm:$0xff] %v7328_v38  ;;  %v5235_v59 = vadd.f32 %v5234_v50, %v5233_v44 }
 0x1e7   : > { %9108 = vst [vmem:[#allocation15_spill] sm:$0xff] %v7323_v39  ;;  %v5236_v8 = vpop.f32.mrf.mxu0 }
 0x1e8   : > { %v7325_v48 = vpop.f32.mrf.mxu1  ;;  %v7335_v58 = vadd.f32 %v5235_v59, %v7191_v3 }
 0x1e9   : > { %9109 = vst [vmem:[#allocation16_spill] sm:$0xff] %v7325_v48  ;;  %v5237_v39 = vpop.f32.mrf.mxu0 }
 0x1ea   : > { %v7330_v49 = vpop.f32.mrf.mxu1  ;;  %9111 = vst [vmem:[#allocation18_spill] sm:$0xff] %v7335_v58  ;;  %v5238_v51 = vadd.f32 %v5237_v39, %v5236_v8 }
 0x1eb   : > { %v5239_v48 = vpop.f32.mrf.mxu0 }
 0x1ec   : > { %v7332_v54 = vpop.f32.mrf.mxu1  ;;  %v7342_v22 = vadd.f32 %v5238_v51, %v7198_v32 }
 0x1ed   : > { %v5240_v44 = vpop.f32.mrf.mxu0 }
 0x1ee   : > { %v7337_v43 = vpop.f32.mrf.mxu1  ;;  %v5241_v38 = vadd.f32 %v5240_v44, %v5239_v48 }
 0x1ef   : > { %9112 = vst [vmem:[#allocation19_spill] sm:$0xff] %v7337_v43  ;;  %v5242_v3 = vpop.f32.mrf.mxu0 }
 0x1f0   : > { %v7339_v28 = vpop.f32.mrf.mxu1  ;;  %v7349_v58 = vadd.f32 %v5241_v38, %v7202_v63  ;;  %v6154_v38 = vld [vmem:[#allocation7 + $0x60] sm:$0xff]  }
 0x1f1   : > { %9113 = vst [vmem:[#allocation20_spill] sm:$0xff] %v7339_v28  ;;  %v5243_v43 = vpop.f32.mrf.mxu0  ;;  %5441 = vmatprep.subr.bf16.mxu1 %v6154_v38 }
 0x1f2   : > { %v7344_v50 = vpop.f32.mrf.mxu1  ;;  %9115 = vst [vmem:[#allocation22_spill] sm:$0xff] %v7349_v58  ;;  %v5244_v8 = vadd.f32 %v5243_v43, %v5242_v3  ;;  %v6155_v58 = vld [vmem:[#allocation7 + $0x20] sm:$0xff]  }
 0x1f3   : > { %9114 = vst [vmem:[#allocation21_spill] sm:$0xff] %v7344_v50  ;;  %v5245_v53 = vpop.f32.mrf.mxu0  ;;  %5442 = vmatpush3.bf16.msra.mxu1 %v6155_v58 }
 0x1f4   : > { %v7346_v59 = vpop.f32.mrf.mxu1  ;;  %v7356_v32 = vadd.f32 %v5244_v8, %v7204_v30 }
 0x1f5   : > { %v5246_v35 = vpop.f32.mrf.mxu0 }
 0x1f6   : > { %v7351_v39 = vpop.f32.mrf.mxu1  ;;  %9118 = vst [vmem:[#allocation25_spill] sm:$0xff] %v7356_v32  ;;  %v5247_v48 = vadd.f32 %v5246_v35, %v5245_v53 }
 0x1f7   : > { %9116 = vst [vmem:[#allocation23_spill] sm:$0xff] %v7351_v39  ;;  %v5248_v44 = vpop.f32.mrf.mxu0 }
 0x1f8   : > { %v7353_v28 = vpop.f32.mrf.mxu1  ;;  %v7363_v63 = vadd.f32 %v5247_v48, %v7207_v5 }
 0x1f9   : > { %9117 = vst [vmem:[#allocation24_spill] sm:$0xff] %v7353_v28  ;;  %v5249_v39 = vpop.f32.mrf.mxu0 }
 0x1fa   : > { %v7358_v51 = vpop.f32.mrf.mxu1  ;;  %9120 = vst [vmem:[#allocation27_spill] sm:$0xff] %v7363_v63  ;;  %v5250_v43 = vadd.f32 %v5249_v39, %v5248_v44 }
 0x1fb   : > { %v5251_v28 = vpop.f32.mrf.mxu0 }
 0x1fc   : > { %v7360_v50 = vpop.f32.mrf.mxu1  ;;  %v7368_v30 = vadd.f32 %v5250_v43, %v7210_v62 }
 0x1fd   : > { %9119 = vst [vmem:[#allocation26_spill] sm:$0xff] %v7360_v50  ;;  %v5252_v8 = vpop.f32.mrf.mxu0 }
 0x1fe   : > { %v7365_v3 = vpop.f32.mrf.mxu1  ;;  %v5253_v53 = vadd.f32 %v5252_v8, %v5251_v28 }
 0x1ff   : > { %v5254_v32 = vpop.f32.mrf.mxu0 }
 0x200   : > { %v7370_v35 = vpop.f32.mrf.mxu1  ;;  %v7373_v5 = vadd.f32 %v5253_v53, %v7213_v9 }
 0x201   : > { %9121 = vst [vmem:[#allocation28_spill] sm:$0xff] %v7370_v35  ;;  %v5255_v48 = vpop.f32.mrf.mxu0 }
 0x202   : > { %9122 = vst [vmem:[#allocation29_spill] sm:$0xff] %v7373_v5  ;;  %v5256_v63 = vadd.f32 %v5255_v48, %v5254_v32  ;;  %v7375_v50 = vpop.f32.mrf.mxu1 }
 0x203   : > { %v5257_v39 = vpop.f32.mrf.mxu0 }
 0x204   : > { %v7378_v44 = vadd.f32 %v5256_v63, %v7216_v16  ;;  %v7380_v62 = vpop.f32.mrf.mxu1 }
 0x205   : > { %v5258_v58 = vpop.f32.mrf.mxu0 }
 0x206   : > { %9123 = vst [vmem:[#allocation30_spill] sm:$0xff] %v7378_v44  ;;  %v5259_v38 = vadd.f32 %v5258_v58, %v5257_v39  ;;  %v7385_v35 = vpop.f32.mrf.mxu1 }
 0x207   : > { %v5260_v43 = vpop.f32.mrf.mxu0 }
 0x208   : > { %v7383_v28 = vadd.f32 %v5259_v38, %v7219_v19  ;;  %v7390_v5 = vpop.f32.mrf.mxu1 }
 0x209   : > { %v5261_v8 = vpop.f32.mrf.mxu0 }
 0x20a   : > { %9124 = vst [vmem:[#allocation31_spill] sm:$0xff] %v7383_v28  ;;  %v5262_v9 = vadd.f32 %v5261_v8, %v5260_v43  ;;  %v7395_v44 = vpop.f32.mrf.mxu1 }
 0x20b   : > { %v5263_v53 = vpop.f32.mrf.mxu0 }
 0x20c   : > { %v7388_v32 = vadd.f32 %v5262_v9, %v7222_v25  ;;  %v7400_v8 = vpop.f32.mrf.mxu1 }
 0x20d   : > { %v5264_v48 = vpop.f32.mrf.mxu0 }
 0x20e   : > { %9125 = vst [vmem:[#allocation32_spill] sm:$0xff] %v7388_v32  ;;  %v5265_v16 = vadd.f32 %v5264_v48, %v5263_v53  ;;  %v7405_v48 = vpop.f32.mrf.mxu1 }
 0x20f   : > { %v5266_v63 = vpop.f32.mrf.mxu0 }
 0x210   : > { %v7393_v39 = vadd.f32 %v5265_v16, %v7225_v20 }
 0x211   : > { %v5267_v58 = vpop.f32.mrf.mxu0 }
 0x212   : > { %9126 = vst [vmem:[#allocation33_spill] sm:$0xff] %v7393_v39  ;;  %v5268_v19 = vadd.f32 %v5267_v58, %v5266_v63  ;;  %v7410_v58 = vpop.f32.mrf.mxu1 }
 0x213   : > { %v5269_v38 = vpop.f32.mrf.mxu0 }
 0x214   : > { %v7398_v28 = vadd.f32 %v5268_v19, %v7228_v47 }
 0x215   : > { %v5270_v43 = vpop.f32.mrf.mxu0 }
 0x216   : > { %9127 = vst [vmem:[#allocation34_spill] sm:$0xff] %v7398_v28  ;;  %v5271_v25 = vadd.f32 %v5270_v43, %v5269_v38  ;;  %v7415_v43 = vpop.f32.mrf.mxu1 }
 0x217   : > { %v5272_v9 = vpop.f32.mrf.mxu0 }
 0x218   : > { %v7403_v32 = vadd.f32 %v5271_v25, %v7231_v36 }
 0x219   : > { %v5273_v53 = vpop.f32.mrf.mxu0 }
 0x21a   : > { %9128 = vst [vmem:[#allocation35_spill] sm:$0xff] %v7403_v32  ;;  %v5274_v20 = vadd.f32 %v5273_v53, %v5272_v9  ;;  %v7420_v53 = vpop.f32.mrf.mxu1 }
 0x21b   : > { %v5275_v16 = vpop.f32.mrf.mxu0 }
 0x21c   : > { %v7408_v39 = vadd.f32 %v5274_v20, %v7234_v42 }
 0x21d   : > { %v5276_v63 = vpop.f32.mrf.mxu0 }
 0x21e   : > { %9129 = vst [vmem:[#allocation36_spill] sm:$0xff] %v7408_v39  ;;  %v5277_v47 = vadd.f32 %v5276_v63, %v5275_v16  ;;  %v7425_v63 = vpop.f32.mrf.mxu1 }
 0x21f   : > { %v5278_v19 = vpop.f32.mrf.mxu0  ;;  %9133 = vst [vmem:[#allocation40_spill] sm:$0xff] %v7425_v63  ;;  %v6161_v63 = vld [vmem:[#allocation7 + $0xb8] sm:$0xff]  }
 0x220   : > { %v7413_v28 = vadd.f32 %v5277_v47, %v7237_v10 }
 0x221   : > { %v5279_v38 = vpop.f32.mrf.mxu0 }
 0x222   : > { %9130 = vst [vmem:[#allocation37_spill] sm:$0xff] %v7413_v28  ;;  %v5280_v36 = vadd.f32 %v5279_v38, %v5278_v19  ;;  %v7430_v38 = vpop.f32.mrf.mxu1 }
 0x223   : > { %v5281_v25 = vpop.f32.mrf.mxu0 }
 0x224   : > { %v7418_v32 = vadd.f32 %v5280_v36, %v7240_v7 }
 0x225   : > { %v5282_v9 = vpop.f32.mrf.mxu0 }
 0x226   : > { %9131 = vst [vmem:[#allocation38_spill] sm:$0xff] %v7418_v32  ;;  %v5283_v42 = vadd.f32 %v5282_v9, %v5281_v25  ;;  %v7435_v9 = vpop.f32.mrf.mxu1 }
 0x227   : > { %v5284_v20 = vpop.f32.mrf.mxu0 }
 0x228   : > { %v7423_v39 = vadd.f32 %v5283_v42, %v7243_v12  ;;  %v6160_v42 = vld [vmem:[#allocation7 + $0xf8] sm:$0xff]  }
 0x229   : > { %v5285_v16 = vpop.f32.mrf.mxu0  ;;  %5547 = vmatprep.subr.bf16.mxu0 %v6160_v42  ;;  %v6167_v42 = vld [vmem:[#allocation7 + $0xa8] sm:$0xff]  }
 0x22a   : > { %9132 = vst [vmem:[#allocation39_spill] sm:$0xff] %v7423_v39  ;;  %v5286_v10 = vadd.f32 %v5285_v16, %v5284_v20  ;;  %5548 = vmatpush3.bf16.msra.mxu0 %v6161_v63  ;;  %v7440_v16 = vpop.f32.mrf.mxu1  ;;  %v5320_v63 = vadd.f32 %v7260_v13, %v7256_v14  ;;  %v6169_v14 = vld [vmem:[#allocation7 + $0xa0] sm:$0xff]  }
 0x22b   : > { %v5287_v47 = vpop.f32.mrf.mxu0 }
 0x22c   : > { %v7428_v28 = vadd.f32 %v5286_v10, %v7246_v2 }
 0x22d   : > { %v5288_v19 = vpop.f32.mrf.mxu0 }
 0x22e   : > { %v5289_v7 = vadd.f32 %v5288_v19, %v5287_v47  ;;  %v6162_v47 = vld [vmem:[#allocation7 + $0xf0] sm:$0xff]  }
 0x22f   : > { %v5290_v36 = vpop.f32.mrf.mxu0  ;;  %5549 = vmatprep.subr.bf16.mxu0 %v6162_v47 }
 0x230   : > { %v7433_v32 = vadd.f32 %v5289_v7, %v7249_v33  ;;  %v6164_v33 = vld [vmem:[#allocation7 + $0xb0] sm:$0xff]  }
 0x231   : > { %v5291_v25 = vpop.f32.mrf.mxu0  ;;  %5550 = vmatpush3.bf16.msra.mxu0 %v6164_v33  ;;  %v5329_v33 = vadd.f32 %v7281_v17, %v7276_v26  ;;  %v6170_v26 = vld [vmem:[#allocation7 + $0xd8] sm:$0xff]  }
 0x232   : > { %9134 = vst [vmem:[#allocation41_spill] sm:$0xff] %v7433_v32  ;;  %v5292_v12 = vadd.f32 %v5291_v25, %v5290_v36  ;;  %v7445_v25 = vpop.f32.mrf.mxu1 }
 0x233   : > { %v5293_v39 = vpop.f32.mrf.mxu0 }
 0x234   : > { %v7438_v20 = vadd.f32 %v5292_v12, %v7252_v37  ;;  %v6166_v37 = vld [vmem:[#allocation7 + $0xe8] sm:$0xff]   ;;  %v7456_v47 = vpop.f32.mrf.mxu1 }
 0x235   : > { %v5294_v2 = vpop.f32.mrf.mxu0  ;;  %5551 = vmatprep.subr.bf16.mxu0 %v6166_v37 }
 0x236   : > { %v5295_v10 = vadd.f32 %v5294_v2, %v5293_v39  ;;  %v5323_v39 = vadd.f32 %v7265_v61, %v7262_v40  ;;  %5552 = vmatpush3.bf16.msra.mxu0 %v6167_v42  ;;  %v6171_v42 = vld [vmem:[#allocation7 + $0x98] sm:$0xff]  }
 0x237   : > { %v5296_v19 = vpop.f32.mrf.mxu0 }
 0x238   : > { %v7443_v7 = vadd.f32 %v5295_v10, %v7254_v21  ;;  %v5326_v10 = vadd.f32 %v7274_v6, %v7269_v46  ;;  %v1958_v13 = vadd.f32 %v5323_v39, %v7279_v24  ;;  %v5332_v24 = vadd.f32 %v7288_v57, %v7283_v15 }
 0x239   : > { %v5297_v36 = vpop.f32.mrf.mxu0  ;;  %v5338_v15 = vadd.f32 %v7302_v23, %v7297_v52  ;;  %v6156_v52 = vld [vmem:[#allocation7 + $0x58] sm:$0xff]   ;;  %v6174_v23 = vld [vmem:[#allocation7 + $0x90] sm:$0xff]  }
 0x23a   : > { %v5298_v32 = vadd.f32 %v5297_v36, %v5296_v19  ;;  %v6168_v19 = vld [vmem:[#allocation7 + $0xe0] sm:$0xff]   ;;  %v1961_v6 = vadd.f32 %v5326_v10, %v7286_v29  ;;  %5443 = vmatprep.subr.bf16.mxu1 %v6156_v52 }
 0x23b   : > { %v5925_v12 = vpop.f32.mrf.mxu0  ;;  %5553 = vmatprep.subr.bf16.mxu0 %v6168_v19  ;;  %v6172_v19 = vld [vmem:[#allocation7 + $0xd0] sm:$0xff]  }
 0x23c   : > { %v7452_v2 = vadd.f32 %v5298_v32, %v7258_v31  ;;  %v1953_v31 = vadd.f32 %v5320_v63, %v7272_v55  ;;  %5554 = vmatpush3.bf16.msra.mxu0 %v6169_v14  ;;  %v7465_v32 = vpop.f32.mrf.mxu1  ;;  %v7467_v46 = vadd.f32 %v5925_v12, %v1958_v13  ;;  %v1966_v55 = vadd.f32 %v5329_v33, %v7293_v60 }
 0x23d   : > { %v2110_v21 = vpop.f32.mrf.mxu0  ;;  %5555 = vmatprep.subr.bf16.mxu0 %v6170_v26  ;;  %v5341_v33 = vadd.f32 %v7309_v4, %v7304_v56  ;;  %v6157_v26 = vld [vmem:[#allocation7 + $0x18] sm:$0xff]  }
 0x23e   : > { %v7462_v40 = vadd.f32 %v2110_v21, %v7267_v0  ;;  %v5335_v0 = vadd.f32 %v7295_v45, %v7290_v11  ;;  %v7487_v11 = vpop.f32.mrf.mxu1  ;;  %v2277_v60 = vmul.f32 %v7467_v46, %v7467_v46  ;;  %5444 = vmatpush3.bf16.msra.mxu1 %v6157_v26 }
 0x23f   : > { %v5926_v36 = vpop.f32.mrf.mxu0 }
 0x240   : > { %v2275_v63 = vmul.f32 %v7462_v40, %v7462_v40  ;;  %v7479_v12 = vadd.f32 %v5926_v36, %v1961_v6  ;;  %5556 = vmatpush3.bf16.msra.mxu0 %v6171_v42  ;;  %v1974_v36 = vadd.f32 %v5335_v0, %v7307_v18  ;;  %v1969_v6 = vadd.f32 %v5332_v24, %v7300_v41  ;;  %v7504_v18 = vpop.f32.mrf.mxu1  ;;  %v6176_v41 = vld [vmem:[#allocation7 + $0xc8] sm:$0xff]  }
 0x241   : > { %v2113_v61 = vpop.f32.mrf.mxu0  ;;  %5557 = vmatprep.subr.bf16.mxu0 %v6172_v19  ;;  %v1977_v42 = vadd.f32 %v5338_v15, %v7314_v1  ;;  %v9135_v24 = vld [vmem:[#allocation13_spill] sm:$0xff]  ;;  %v9136_v1 = vld [vmem:[#allocation15_spill] sm:$0xff] }
 0x242   : > { %v7470_v37 = vadd.f32 %v2113_v61, %v1953_v31  ;;  %v2278_v13 = vmul.f32 %v7479_v12, %v7479_v12 }
 0x243   : > { %v5929_v17 = vpop.f32.mrf.mxu0 }
 0x244   : > { %v2237_v29 = vadd.f32 %v7470_v37, %v7462_v40  ;;  %v2276_v39 = vmul.f32 %v7470_v37, %v7470_v37  ;;  %5558 = vmatpush3.bf16.msra.mxu0 %v6174_v23 }
 0x245   : > { %v2126_v57 = vpop.f32.mrf.mxu0  ;;  %5559 = vmatprep.subr.bf16.mxu0 %v6176_v41  ;;  %v9140_v41 = vld [vmem:[#allocation18_spill] sm:$0xff] }
 0x246   : > { %v2238_v45 = vadd.f32 %v2237_v29, %v7467_v46  ;;  %v2307_v21 = vadd.f32 %v2276_v39, %v2275_v63  ;;  %v7492_v10 = vadd.f32 %v2126_v57, %v1966_v55  ;;  %v7501_v55 = vadd.f32 %v5929_v17, %v1974_v36  ;;  %v9137_v57 = vld [vmem:[#allocation14_spill] sm:$0xff] }
 0x247   : > { %v5930_v14 = vpop.f32.mrf.mxu0  ;;  %v5344_v17 = vadd.f32 %v9135_v24, %v7311_v27  ;;  %v5347_v39 = vadd.f32 %v9136_v1, %v7318_v34  ;;  %v9138_v27 = vld [vmem:[#allocation16_spill] sm:$0xff] }
 0x248   : > { %v2308_v31 = vadd.f32 %v2307_v21, %v2277_v60  ;;  %v2239_v61 = vadd.f32 %v2238_v45, %v7479_v12  ;;  %v2279_v0 = vmul.f32 %v7492_v10, %v7492_v10  ;;  %v1982_v60 = vadd.f32 %v5341_v33, %v9137_v57  ;;  %v6158_v45 = vld [vmem:[#allocation7 + $0x50] sm:$0xff]   ;;  %v6177_v21 = vld [vmem:[#allocation7 + $0x88] sm:$0xff]   ;;  %v6178_v33 = vld [vmem:[#allocation7 + $0xc0] sm:$0xff]  }
 0x249   : > { %v2129_v56 = vpop.f32.mrf.mxu0  ;;  %v7516_v36 = vadd.f32 %v5930_v14, %v1977_v42  ;;  %5445 = vmatprep.subr.bf16.mxu1 %v6158_v45  ;;  %5560 = vmatpush3.bf16.msra.mxu0 %v6177_v21  ;;  %v2281_v14 = vmul.f32 %v7501_v55, %v7501_v55  ;;  %v1990_v24 = vadd.f32 %v5347_v39, %v9140_v41  ;;  %v6173_v57 = vld [vmem:[#allocation7 + $0x40] sm:$0xff]  }
 0x24a   : > { %v2240_v4 = vadd.f32 %v2239_v61, %v7492_v10  ;;  %v2309_v63 = vadd.f32 %v2308_v31, %v2278_v13  ;;  %v7509_v29 = vadd.f32 %v2129_v56, %v1969_v6  ;;  %v6159_v13 = vld [vmem:[#allocation7 + $0x10] sm:$0xff]   ;;  %v6163_v31 = vld [vmem:[#allocation7 + $0x48] sm:$0xff]   ;;  %v5350_v61 = vadd.f32 %v7330_v49, %v9138_v27  ;;  %v7523_v6 = vpop.f32.mrf.mxu1  ;;  %5561 = vmatprep.subr.bf16.mxu0 %v6178_v33 }
 0x24b   : > { %v5933_v15 = vpop.f32.mrf.mxu0  ;;  %5446 = vmatpush3.bf16.msra.mxu1 %v6159_v13  ;;  %v2282_v45 = vmul.f32 %v7516_v36, %v7516_v36 }
 0x24c   : > { %v2310_v19 = vadd.f32 %v2309_v63, %v2279_v0  ;;  %v2241_v52 = vadd.f32 %v2240_v4, %v7509_v29  ;;  %v2280_v23 = vmul.f32 %v7509_v29, %v7509_v29  ;;  %v6165_v4 = vld [vmem:[#allocation7 + $0x8] sm:$0xff]   ;;  %v6179_v0 = vld [vmem:[#allocation7 + $0x80] sm:$0xff]   ;;  %v9139_v63 = vld [vmem:[#allocation19_spill] sm:$0xff]  ;;  %5447 = vmatprep.subr.bf16.mxu1 %v6163_v31  ;;  %v1993_v13 = vadd.f32 %v5350_v61, %v7342_v22 }
 0x24d   : > { %v2142_v34 = vpop.f32.mrf.mxu0  ;;  %v5353_v49 = vadd.f32 %v9139_v63, %v7332_v54  ;;  %5562 = vmatpush3.bf16.msra.mxu0 %v6179_v0  ;;  %v7540_v54 = vpop.f32.mrf.mxu1  ;;  %v9145_v0 = vld [vmem:[#allocation22_spill] sm:$0xff] }
 0x24e   : > { %v2242_v26 = vadd.f32 %v2241_v52, %v7501_v55  ;;  %v2311_v42 = vadd.f32 %v2310_v19, %v2280_v23  ;;  %v7528_v56 = vadd.f32 %v2142_v34, %v1982_v60  ;;  %v9141_v60 = vld [vmem:[#allocation17_spill] sm:$0xff]  ;;  %v7537_v23 = vadd.f32 %v5933_v15, %v1990_v24 }
 0x24f   : > { %v5934_v1 = vpop.f32.mrf.mxu0  ;;  %v1985_v52 = vadd.f32 %v5344_v17, %v9141_v60  ;;  %5448 = vmatpush3.bf16.msra.mxu1 %v6165_v4  ;;  %v9143_v17 = vld [vmem:[#allocation21_spill] sm:$0xff]  ;;  %v1998_v63 = vadd.f32 %v5353_v49, %v9145_v0  ;;  %v9146_v4 = vld [vmem:[#allocation24_spill] sm:$0xff] }
 0x250   : > { %v2312_v21 = vadd.f32 %v2311_v42, %v2281_v14  ;;  %v2243_v19 = vadd.f32 %v2242_v26, %v7516_v36  ;;  %v2283_v31 = vmul.f32 %v7528_v56, %v7528_v56  ;;  %v6175_v14 = vld [vmem:[#allocation7] sm:$0xff]   ;;  %v9144_v42 = vld [vmem:[#allocation23_spill] sm:$0xff]  ;;  %5449 = vmatprep.subr.bf16.mxu1 %v6173_v57  ;;  %v7552_v24 = vadd.f32 %v5934_v1, %v1993_v13  ;;  %v9147_v13 = vld [vmem:[#allocation26_spill] sm:$0xff] }
 0x251   : > { %v2145_v27 = vpop.f32.mrf.mxu0  ;;  %v9142_v26 = vld [vmem:[#allocation20_spill] sm:$0xff]  ;;  %v5359_v22 = vadd.f32 %v9144_v42, %v7346_v59  ;;  %v2285_v59 = vmul.f32 %v7537_v23, %v7537_v23  ;;  %v9149_v0 = vld [vmem:[#allocation25_spill] sm:$0xff] }
 0x252   : > { %v2244_v39 = vadd.f32 %v2243_v19, %v7528_v56  ;;  %v2313_v34 = vadd.f32 %v2312_v21, %v2282_v45  ;;  %v7545_v33 = vadd.f32 %v2145_v27, %v1985_v52  ;;  %v5356_v15 = vadd.f32 %v9143_v17, %v9142_v26  ;;  %v6180_v52 = vld [vmem:[#allocation7 + $0x178] sm:$0xff]   ;;  %v7559_v27 = vpop.f32.mrf.mxu1 }
 0x253   : > { %v5937_v61 = vpop.f32.mrf.mxu0  ;;  %v5362_v21 = vadd.f32 %v7358_v51, %v9146_v4  ;;  %5450 = vmatpush3.bf16.msra.mxu1 %v6175_v14  ;;  %v2286_v51 = vmul.f32 %v7552_v24, %v7552_v24 }
 0x254   : > { %v2314_v41 = vadd.f32 %v2313_v34, %v2283_v31  ;;  %v2245_v19 = vadd.f32 %v2244_v39, %v7545_v33  ;;  %v2284_v45 = vmul.f32 %v7545_v33, %v7545_v33  ;;  %v5365_v39 = vadd.f32 %v7365_v3, %v9147_v13  ;;  %v9148_v31 = vld [vmem:[#allocation27_spill] sm:$0xff]  ;;  %5659 = vmatprep.subr.bf16.mxu1 %v6180_v52  ;;  %v9150_v52 = vld [vmem:[#allocation28_spill] sm:$0xff] }
 0x255   : > { %v2158_v60 = vpop.f32.mrf.mxu0  ;;  %v2006_v34 = vadd.f32 %v5359_v22, %v9148_v31  ;;  %v2001_v4 = vadd.f32 %v5356_v15, %v9149_v0  ;;  %v5371_v15 = vadd.f32 %v7385_v35, %v7380_v62 }
 0x256   : > { %v2246_v49 = vadd.f32 %v2245_v19, %v7537_v23  ;;  %v2315_v57 = vadd.f32 %v2314_v41, %v2284_v45  ;;  %v7564_v1 = vadd.f32 %v2158_v60, %v1998_v63  ;;  %v2009_v63 = vadd.f32 %v5362_v21, %v7368_v30  ;;  %v7576_v41 = vpop.f32.mrf.mxu1 }
 0x257   : > { %v5938_v26 = vpop.f32.mrf.mxu0  ;;  %v7573_v19 = vadd.f32 %v5937_v61, %v2006_v34  ;;  %v5374_v34 = vadd.f32 %v7395_v44, %v7390_v5 }
 0x258   : > { %v2316_v17 = vadd.f32 %v2315_v57, %v2285_v59  ;;  %v2247_v42 = vadd.f32 %v2246_v49, %v7552_v24  ;;  %v2287_v22 = vmul.f32 %v7564_v1, %v7564_v1  ;;  %v5368_v59 = vadd.f32 %v7375_v50, %v9150_v52  ;;  %v9151_v49 = vld [vmem:[#allocation29_spill] sm:$0xff] }
 0x259   : > { %v2161_v14 = vpop.f32.mrf.mxu0  ;;  %v2014_v30 = vadd.f32 %v5365_v39, %v9151_v49  ;;  %v7588_v57 = vadd.f32 %v5938_v26, %v2009_v63  ;;  %v2289_v50 = vmul.f32 %v7573_v19, %v7573_v19  ;;  %v5377_v26 = vadd.f32 %v7405_v48, %v7400_v8 }
 0x25a   : > { %v2248_v3 = vadd.f32 %v2247_v42, %v7564_v1  ;;  %v2317_v45 = vadd.f32 %v2316_v17, %v2286_v51  ;;  %v7581_v60 = vadd.f32 %v2161_v14, %v2001_v4  ;;  %v7595_v17 = vpop.f32.mrf.mxu1  ;;  %v9152_v42 = vld [vmem:[#allocation31_spill] sm:$0xff]  ;;  %v9153_v14 = vld [vmem:[#allocation30_spill] sm:$0xff] }
 0x25b   : > { %v5941_v61 = vpop.f32.mrf.mxu0  ;;  %v2022_v0 = vadd.f32 %v5371_v15, %v9152_v42  ;;  %v2290_v5 = vmul.f32 %v7588_v57, %v7588_v57 }
 0x25c   : > { %v2318_v21 = vadd.f32 %v2317_v45, %v2287_v22  ;;  %v2249_v13 = vadd.f32 %v2248_v3, %v7581_v60  ;;  %v2288_v31 = vmul.f32 %v7581_v60, %v7581_v60  ;;  %v2017_v3 = vadd.f32 %v5368_v59, %v9153_v14  ;;  %v9154_v45 = vld [vmem:[#allocation32_spill] sm:$0xff] }
 0x25d   : > { %v2174_v51 = vpop.f32.mrf.mxu0  ;;  %v7609_v22 = vadd.f32 %v5941_v61, %v2022_v0  ;;  %v2025_v52 = vadd.f32 %v5374_v34, %v9154_v45  ;;  %v9155_v59 = vld [vmem:[#allocation40_spill] sm:$0xff]  ;;  %v5386_v0 = vadd.f32 %v7435_v9, %v7430_v38 }
 0x25e   : > { %v2250_v35 = vadd.f32 %v2249_v13, %v7573_v19  ;;  %v2319_v62 = vadd.f32 %v2318_v21, %v2288_v31  ;;  %v7600_v39 = vadd.f32 %v2174_v51, %v2014_v30  ;;  %v7612_v30 = vpop.f32.mrf.mxu1  ;;  %v5380_v13 = vadd.f32 %v7415_v43, %v7410_v58  ;;  %v9156_v51 = vld [vmem:[#allocation33_spill] sm:$0xff] }
 0x25f   : > { %v5942_v4 = vpop.f32.mrf.mxu0  ;;  %v5383_v61 = vadd.f32 %v9155_v59, %v7420_v53  ;;  %v2030_v34 = vadd.f32 %v5377_v26, %v9156_v51  ;;  %v2293_v58 = vmul.f32 %v7609_v22, %v7609_v22 }
 0x260   : > { %v2320_v44 = vadd.f32 %v2319_v62, %v2289_v50  ;;  %v2251_v63 = vadd.f32 %v2250_v35, %v7588_v57  ;;  %v2291_v48 = vmul.f32 %v7600_v39, %v7600_v39  ;;  %v7624_v35 = vadd.f32 %v5942_v4, %v2025_v52  ;;  %v9158_v52 = vld [vmem:[#allocation34_spill] sm:$0xff] }
 0x261   : > { %v2177_v49 = vpop.f32.mrf.mxu0  ;;  %v5389_v4 = vadd.f32 %v7445_v25, %v7440_v16 }
 0x262   : > { %v2252_v8 = vadd.f32 %v2251_v63, %v7600_v39  ;;  %v2321_v15 = vadd.f32 %v2320_v44, %v2290_v5  ;;  %v7617_v21 = vadd.f32 %v2177_v49, %v2017_v3  ;;  %v5405_v44 = vpop.f32.mrf.mxu1  ;;  %v9157_v63 = vld [vmem:[#allocation35_spill] sm:$0xff]  ;;  %v2294_v45 = vmul.f32 %v7624_v35, %v7624_v35 }
 0x263   : > { %v5945_v31 = vpop.f32.mrf.mxu0  ;;  %v2038_v14 = vadd.f32 %v5383_v61, %v9157_v63  ;;  %v2033_v49 = vadd.f32 %v5380_v13, %v9158_v52  ;;  %v5395_v13 = vadd.f32 %v7504_v18, %v7487_v11  ;;  %v9162_v52 = vld [vmem:[#allocation38_spill] sm:$0xff] }
 0x264   : > { %v2322_v50 = vadd.f32 %v2321_v15, %v2291_v48  ;;  %v2253_v62 = vadd.f32 %v2252_v8, %v7617_v21  ;;  %v2292_v42 = vmul.f32 %v7617_v21, %v7617_v21  ;;  %v9159_v48 = vld [vmem:[#allocation36_spill] sm:$0xff]  ;;  %v5406_v51 = vpop.f32.mrf.mxu1 }
 0x265   : > { %v2190_v5 = vpop.f32.mrf.mxu0  ;;  %v7643_v8 = vadd.f32 %v5945_v31, %v2038_v14  ;;  %v2041_v15 = vadd.f32 %v5386_v0, %v9159_v48 }
 0x266   : > { %v2254_v43 = vadd.f32 %v2253_v62, %v7609_v22  ;;  %v2323_v53 = vadd.f32 %v2322_v50, %v2292_v42  ;;  %v7634_v26 = vadd.f32 %v2190_v5, %v2030_v34  ;;  %v5392_v50 = vadd.f32 %v7465_v32, %v7456_v47  ;;  %v9160_v62 = vld [vmem:[#allocation37_spill] sm:$0xff]  ;;  %v5408_v14 = vpop.f32.mrf.mxu1 }
 0x267   : > { %v5946_v3 = vpop.f32.mrf.mxu0  ;;  %v2046_v42 = vadd.f32 %v5389_v4, %v9160_v62  ;;  %v2297_v47 = vmul.f32 %v7643_v8, %v7643_v8  ;;  %v5401_v4 = vadd.f32 %v7576_v41, %v7559_v27  ;;  %v5407_v62 = vadd.f32 %v5406_v51, %v5405_v44 }
 0x268   : > { %v2324_v38 = vadd.f32 %v2323_v53, %v2293_v58  ;;  %v2255_v9 = vadd.f32 %v2254_v43, %v7624_v35  ;;  %v2295_v16 = vmul.f32 %v7634_v26, %v7634_v26  ;;  %v7656_v5 = vadd.f32 %v5946_v3, %v2041_v15  ;;  %v9161_v3 = vld [vmem:[#allocation39_spill] sm:$0xff] }
 0x269   : > { %v2193_v59 = vpop.f32.mrf.mxu0  ;;  %v5398_v53 = vadd.f32 %v7540_v54, %v7523_v6  ;;  %v2070_v44 = vadd.f32 %v5407_v62, %v7443_v7 }
 0x26a   : > { %v2256_v34 = vadd.f32 %v2255_v9, %v7634_v26  ;;  %v2325_v25 = vadd.f32 %v2324_v38, %v2294_v45  ;;  %v7649_v61 = vadd.f32 %v2193_v59, %v2033_v49  ;;  %v2054_v45 = vadd.f32 %v5395_v13, %v9161_v3 }
 0x26b   : > { %v5949_v31 = vpop.f32.mrf.mxu0  ;;  %v2298_v9 = vmul.f32 %v7656_v5, %v7656_v5  ;;  %v2049_v49 = vadd.f32 %v5392_v50, %v9162_v52  ;;  %v2057_v15 = vadd.f32 %v5398_v53, %v7428_v28  ;;  %v5404_v13 = vadd.f32 %v7612_v30, %v7595_v17  ;;  %v9163_v50 = vld [vmem:[#allocation41_spill] sm:$0xff] }
 0x26c   : > { %v2326_v0 = vadd.f32 %v2325_v25, %v2295_v16  ;;  %v2257_v58 = vadd.f32 %v2256_v34, %v7649_v61  ;;  %v2296_v43 = vmul.f32 %v7649_v61, %v7649_v61  ;;  %v7675_v48 = vadd.f32 %v5949_v31, %v2054_v45  ;;  %v5409_v34 = vpop.f32.mrf.mxu1 }
 0x26d   : > { %v2206_v63 = vpop.f32.mrf.mxu0  ;;  %v2062_v31 = vadd.f32 %v5401_v4, %v9163_v50  ;;  %v5410_v53 = vadd.f32 %v5409_v34, %v5408_v14  ;;  %v2065_v14 = vadd.f32 %v5404_v13, %v7438_v20 }
 0x26e   : > { %v2258_v32 = vadd.f32 %v2257_v58, %v7643_v8  ;;  %v2327_v11 = vadd.f32 %v2326_v0, %v2296_v43  ;;  %v7666_v18 = vadd.f32 %v2206_v63, %v2046_v42 }
 0x26f   : > { %v5950_v38 = vpop.f32.mrf.mxu0 }
 0x270   : > { %v2328_v6 = vadd.f32 %v2327_v11, %v2297_v47  ;;  %v2259_v54 = vadd.f32 %v2258_v32, %v7656_v5  ;;  %v2299_v27 = vmul.f32 %v7666_v18, %v7666_v18  ;;  %v7686_v58 = vadd.f32 %v5950_v38, %v2057_v15 }
 0x271   : > { %v2209_v59 = vpop.f32.mrf.mxu0  ;;  %v2301_v47 = vmul.f32 %v7675_v48, %v7675_v48  ;;  %v2073_v38 = vadd.f32 %v5410_v53, %v7452_v2 }
 0x272   : > { %v2260_v16 = vadd.f32 %v2259_v54, %v7666_v18  ;;  %v2329_v41 = vadd.f32 %v2328_v6, %v2298_v9  ;;  %v7681_v25 = vadd.f32 %v2209_v59, %v2049_v49  ;;  %v2302_v11 = vmul.f32 %v7686_v58, %v7686_v58 }
 0x273   : > { %v5953_v42 = vpop.f32.mrf.mxu0 }
 0x274   : > { %v2330_v0 = vadd.f32 %v2329_v41, %v2299_v27  ;;  %v2261_v28 = vadd.f32 %v2260_v16, %v7681_v25  ;;  %v2300_v43 = vmul.f32 %v7681_v25, %v7681_v25  ;;  %v7701_v45 = vadd.f32 %v5953_v42, %v2070_v44 }
 0x275   : > { %v2222_v63 = vpop.f32.mrf.mxu0 }
 0x276   : > { %v2262_v32 = vadd.f32 %v2261_v28, %v7675_v48  ;;  %v2331_v17 = vadd.f32 %v2330_v0, %v2300_v43  ;;  %v7694_v30 = vadd.f32 %v2222_v63, %v2062_v31  ;;  %v2305_v2 = vmul.f32 %v7701_v45, %v7701_v45 }
 0x277   : > { %v5954_v51 = vpop.f32.mrf.mxu0 }
 0x278   : > { %v2332_v4 = vadd.f32 %v2331_v17, %v2301_v47  ;;  %v2263_v3 = vadd.f32 %v2262_v32, %v7686_v58  ;;  %v2303_v54 = vmul.f32 %v7694_v30, %v7694_v30  ;;  %v7709_v15 = vadd.f32 %v5954_v51, %v2073_v38 }
 0x279   : > { %v2225_v9 = vpop.f32.mrf.mxu0 }
 0x27a   : > { %v2264_v6 = vadd.f32 %v2263_v3, %v7694_v30  ;;  %v2333_v7 = vadd.f32 %v2332_v4, %v2302_v11  ;;  %v7707_v52 = vadd.f32 %v2225_v9, %v2065_v14  ;;  %v2306_v27 = vmul.f32 %v7709_v15, %v7709_v15 }
 0x27c   : > { %v2334_v49 = vadd.f32 %v2333_v7, %v2303_v54  ;;  %v2265_v59 = vadd.f32 %v2264_v6, %v7707_v52  ;;  %v2304_v20 = vmul.f32 %v7707_v52, %v7707_v52 }
 0x27e   : > { %v2266_v34 = vadd.f32 %v2265_v59, %v7701_v45  ;;  %v2335_v16 = vadd.f32 %v2334_v49, %v2304_v20 }
 0x280   : > { %v2267_v41 = vadd.f32 %v2266_v34, %v7709_v15  ;;  %v2336_v13 = vadd.f32 %v2335_v16, %v2305_v2 }
 0x282   : > { %v2268_v62 = vrot.slane %v2267_v41, 4  ;;  %v2337_v42 = vadd.f32 %v2336_v13, %v2306_v27 }
 0x284   : > { %v2269_v50 = vadd.f32 %v2268_v62, %v2267_v41  ;;  %v2338_v31 = vrot.slane %v2337_v42, 4 }
 0x286   : > { %v2270_v0 = vrot.slane %v2269_v50, 2  ;;  %v2339_v28 = vadd.f32 %v2338_v31, %v2337_v42 }
 0x288   : > { %v2271_v43 = vadd.f32 %v2270_v0, %v2269_v50  ;;  %v2340_v53 = vrot.slane %v2339_v28, 2 }
 0x28a   : > { %v2272_v63 = vrot.slane %v2271_v43, 1  ;;  %v2341_v47 = vadd.f32 %v2340_v53, %v2339_v28 }
 0x28c   : > { %v2273_v32 = vadd.f32 %v2272_v63, %v2271_v43  ;;  %v2342_v17 = vrot.slane %v2341_v47, 1 }
 0x28e   : > { %v7720_v44 = vmul.f32 0.00390625, %v2273_v32  ;;  %v2343_v51 = vadd.f32 %v2342_v17, %v2341_v47 }
 0x290   : > { %v2344_v11 = vmul.f32 0.00390625, %v2343_v51  ;;  %v2345_v4 = vmul.f32 %v7720_v44, %v7720_v44  ;;  %v2379_v3 = vsub.f32 %v7694_v30, %v7720_v44  ;;  %v2380_v14 = vsub.f32 %v7707_v52, %v7720_v44 }
 0x291   : > { %v2360_v9 = vsub.f32 %v7545_v33, %v7720_v44  ;;  %v2363_v54 = vsub.f32 %v7564_v1, %v7720_v44  ;;  %v2364_v7 = vsub.f32 %v7581_v60, %v7720_v44  ;;  %v2365_v49 = vsub.f32 %v7573_v19, %v7720_v44  ;;  %v6189_v33 = vld [vmem:[#allocation7 + $0x1f8] sm:$0xff]  }
 0x292   : > { %v2346_v38 = vsub.f32 %v2344_v11, %v2345_v4  ;;  %v2366_v30 = vsub.f32 %v7588_v57, %v7720_v44  ;;  %v2367_v52 = vsub.f32 %v7600_v39, %v7720_v44  ;;  %v2368_v59 = vsub.f32 %v7617_v21, %v7720_v44  ;;  %5771 = vmatprep.subr.bf16.mxu0 %v6189_v33 }
 0x293   : > { %v2369_v1 = vsub.f32 %v7609_v22, %v7720_v44  ;;  %v2370_v60 = vsub.f32 %v7624_v35, %v7720_v44  ;;  %v2371_v19 = vsub.f32 %v7634_v26, %v7720_v44  ;;  %v2372_v57 = vsub.f32 %v7649_v61, %v7720_v44 }
 0x294   : > { %v2347_v6 = vmax.f32 %v2346_v38, 0.0  ;;  %v2373_v39 = vsub.f32 %v7643_v8, %v7720_v44  ;;  %v2374_v21 = vsub.f32 %v7656_v5, %v7720_v44  ;;  %v2375_v2 = vsub.f32 %v7666_v18, %v7720_v44  ;;  %v305_v18 = vld [vmem:[%s9063_s3] sm:$0x1] }
 0x295   : > { %v2376_v22 = vsub.f32 %v7681_v25, %v7720_v44  ;;  %v2377_v35 = vsub.f32 %v7675_v48, %v7720_v44  ;;  %v2378_v26 = vsub.f32 %v7686_v58, %v7720_v44  ;;  %v2381_v8 = vsub.f32 %v7701_v45, %v7720_v44 }
 0x296   : > { %v2348_v20 = vadd.f32 1e-05, %v2347_v6  ;;  %v2382_v61 = vsub.f32 %v7709_v15, %v7720_v44  ;;  %v2383_v5 = vlaneseq  ;;  %v2351_v58 = vsub.f32 %v7462_v40, %v7720_v44 }
 0x297   : > { %v2352_v45 = vsub.f32 %v7470_v37, %v7720_v44  ;;  %v2353_v15 = vsub.f32 %v7467_v46, %v7720_v44  ;;  %v2354_v27 = vsub.f32 %v7479_v12, %v7720_v44  ;;  %v2355_v13 = vsub.f32 %v7492_v10, %v7720_v44  ;;  %v7791_v37 = vld [vmem:[%s9064_s4] ss:$0 sm:$0xff] }
 0x298   : > { %6220 = vrsqrt.f32 %v2348_v20  ;;  %v7766_v34 = vshrl.u32 %v2383_v5, 7  ;;  %v2356_v62 = vsub.f32 %v7509_v29, %v7720_v44  ;;  %v2357_v40 = vsub.f32 %v7501_v55, %v7720_v44 }
 0x299   : > { %v2358_v46 = vsub.f32 %v7516_v36, %v7720_v44  ;;  %v2359_v12 = vsub.f32 %v7528_v56, %v7720_v44  ;;  %v2361_v10 = vsub.f32 %v7537_v23, %v7720_v44  ;;  %v2362_v29 = vsub.f32 %v7552_v24, %v7720_v44 }
 0x29a   : > { %9164 = vst [vmem:[#allocation13_spill] sm:$0xff] %v7766_v34  ;;  %v9075_v25 = vsub.s32 0, %v7766_v34 }
 0x2a5   : > { %v6221_v16 = vpop.eup %6220 }
 0x2a6   : > { %v2350_v48 = vmul.f32 %v6221_v16, %v305_v18 }
 0x2a8   : > { %v2386_v41 = vrot.slane %v2350_v48, %v9075_v25 }
 0x2aa   : > { %v2415_v42 = vmul.f32 %v2386_v41, %v2379_v3  ;;  %v2416_v50 = vmul.f32 %v2386_v41, %v2380_v14  ;;  %v2387_v55 = vmul.f32 %v2386_v41, %v2351_v58  ;;  %v2388_v31 = vmul.f32 %v2386_v41, %v2352_v45 }
 0x2ab   : > { %v2389_v0 = vmul.f32 %v2386_v41, %v2353_v15  ;;  %v2390_v28 = vmul.f32 %v2386_v41, %v2354_v27  ;;  %v2391_v43 = vmul.f32 %v2386_v41, %v2355_v13  ;;  %v2392_v53 = vmul.f32 %v2386_v41, %v2356_v62 }
 0x2ac   : > { %v2453_v63 = vadd.f32 %v7791_v37, %v2415_v42  ;;  %v2454_v36 = vadd.f32 %v7791_v37, %v2416_v50  ;;  %v2393_v47 = vmul.f32 %v2386_v41, %v2357_v40  ;;  %v2394_v56 = vmul.f32 %v2386_v41, %v2358_v46 }
 0x2ad   : > { %v2395_v32 = vmul.f32 %v2386_v41, %v2359_v12  ;;  %v2396_v17 = vmul.f32 %v2386_v41, %v2360_v9  ;;  %v2397_v23 = vmul.f32 %v2386_v41, %v2361_v10  ;;  %v2398_v51 = vmul.f32 %v2386_v41, %v2362_v29 }
 0x2ae   : > { %v2485_v11 = vmax.f32 %v2453_v63, 0.0  ;;  %v2486_v24 = vmax.f32 %v2454_v36, 0.0  ;;  %v2399_v44 = vmul.f32 %v2386_v41, %v2363_v54  ;;  %v2400_v4 = vmul.f32 %v2386_v41, %v2364_v7 }
 0x2af   : > { %v2401_v3 = vmul.f32 %v2386_v41, %v2365_v49  ;;  %v2402_v14 = vmul.f32 %v2386_v41, %v2366_v30  ;;  %v2403_v38 = vmul.f32 %v2386_v41, %v2367_v52  ;;  %v2404_v6 = vmul.f32 %v2386_v41, %v2368_v59 }
 0x2b0   : > { %v7803_v33 = vpack.c.bf16 %v2486_v24, %v2485_v11  ;;  %v2405_v20 = vmul.f32 %v2386_v41, %v2369_v1  ;;  %v2406_v5 = vmul.f32 %v2386_v41, %v2370_v60  ;;  %v2407_v18 = vmul.f32 %v2386_v41, %v2371_v19 }
 0x2b1   : > { %v2408_v16 = vmul.f32 %v2386_v41, %v2372_v57  ;;  %v2409_v48 = vmul.f32 %v2386_v41, %v2373_v39  ;;  %v2410_v58 = vmul.f32 %v2386_v41, %v2374_v21  ;;  %v2411_v45 = vmul.f32 %v2386_v41, %v2375_v2 }
 0x2b2   : > { %v2412_v9 = vmul.f32 %v2386_v41, %v2376_v22  ;;  %v2413_v15 = vmul.f32 %v2386_v41, %v2377_v35  ;;  %v2414_v27 = vmul.f32 %v2386_v41, %v2378_v26  ;;  %v2417_v13 = vmul.f32 %v2386_v41, %v2381_v8 }
 0x2b3   : > { %v2418_v62 = vmul.f32 %v2386_v41, %v2382_v61  ;;  %v7806_v54 = vadd.f32 %v7791_v37, %v2387_v55  ;;  %v7809_v7 = vadd.f32 %v7791_v37, %v2388_v31  ;;  %v2427_v49 = vadd.f32 %v7791_v37, %v2389_v0 }
 0x2b4   : > { %v2428_v30 = vadd.f32 %v7791_v37, %v2390_v28  ;;  %v2429_v52 = vadd.f32 %v7791_v37, %v2391_v43  ;;  %v2430_v59 = vadd.f32 %v7791_v37, %v2392_v53  ;;  %v2431_v1 = vadd.f32 %v7791_v37, %v2393_v47 }
 0x2b5   : > { %v2432_v60 = vadd.f32 %v7791_v37, %v2394_v56  ;;  %v2433_v19 = vadd.f32 %v7791_v37, %v2395_v32  ;;  %v2434_v57 = vadd.f32 %v7791_v37, %v2396_v17  ;;  %v2435_v39 = vadd.f32 %v7791_v37, %v2397_v23 }
 0x2b6   : > { %v2436_v21 = vadd.f32 %v7791_v37, %v2398_v51  ;;  %v2437_v2 = vadd.f32 %v7791_v37, %v2399_v44  ;;  %v2438_v22 = vadd.f32 %v7791_v37, %v2400_v4  ;;  %v2439_v35 = vadd.f32 %v7791_v37, %v2401_v3 }
 0x2b7   : > { %v2440_v26 = vadd.f32 %v7791_v37, %v2402_v14  ;;  %v2441_v8 = vadd.f32 %v7791_v37, %v2403_v38  ;;  %v2442_v61 = vadd.f32 %v7791_v37, %v2404_v6  ;;  %v2443_v41 = vadd.f32 %v7791_v37, %v2405_v20 }
 0x2b8   : > { %v2444_v40 = vadd.f32 %v7791_v37, %v2406_v5  ;;  %v2445_v46 = vadd.f32 %v7791_v37, %v2407_v18  ;;  %v2446_v12 = vadd.f32 %v7791_v37, %v2408_v16  ;;  %v2447_v10 = vadd.f32 %v7791_v37, %v2409_v48 }
 0x2b9   : > { %v2448_v29 = vadd.f32 %v7791_v37, %v2410_v58  ;;  %v2449_v42 = vadd.f32 %v7791_v37, %v2411_v45  ;;  %v2450_v50 = vadd.f32 %v7791_v37, %v2412_v9  ;;  %v2451_v55 = vadd.f32 %v7791_v37, %v2413_v15 }
 0x2ba   : > { %v2452_v31 = vadd.f32 %v7791_v37, %v2414_v27  ;;  %v2455_v0 = vadd.f32 %v7791_v37, %v2417_v13  ;;  %v2456_v28 = vadd.f32 %v7791_v37, %v2418_v62  ;;  %v2457_v43 = vmax.f32 %v7806_v54, 0.0 }
 0x2bb   : > { %v2458_v53 = vmax.f32 %v7809_v7, 0.0  ;;  %v2459_v63 = vmax.f32 %v2427_v49, 0.0  ;;  %v2460_v36 = vmax.f32 %v2428_v30, 0.0  ;;  %v2461_v47 = vmax.f32 %v2429_v52, 0.0 }
 0x2bc   : > { %v2462_v56 = vmax.f32 %v2430_v59, 0.0  ;;  %v2463_v32 = vmax.f32 %v2431_v1, 0.0  ;;  %v2464_v17 = vmax.f32 %v2432_v60, 0.0  ;;  %v2465_v23 = vmax.f32 %v2433_v19, 0.0 }
 0x2bd   : > { %v2466_v51 = vmax.f32 %v2434_v57, 0.0  ;;  %v2467_v11 = vmax.f32 %v2435_v39, 0.0  ;;  %v2468_v24 = vmax.f32 %v2436_v21, 0.0  ;;  %v2469_v44 = vmax.f32 %v2437_v2, 0.0 }
 0x2be   : > { %v2470_v4 = vmax.f32 %v2438_v22, 0.0  ;;  %v2471_v3 = vmax.f32 %v2439_v35, 0.0  ;;  %v2472_v14 = vmax.f32 %v2440_v26, 0.0  ;;  %v2473_v38 = vmax.f32 %v2441_v8, 0.0 }
 0x2bf   : > { %v2474_v37 = vmax.f32 %v2442_v61, 0.0  ;;  %v2475_v6 = vmax.f32 %v2443_v41, 0.0  ;;  %v2476_v20 = vmax.f32 %v2444_v40, 0.0  ;;  %v2477_v5 = vmax.f32 %v2445_v46, 0.0  ;;  %v6214_v46 = vld [vmem:[#allocation7 + $0x228] sm:$0xff]  }
 0x2c0   : > { %v2478_v18 = vmax.f32 %v2446_v12, 0.0  ;;  %v2479_v16 = vmax.f32 %v2447_v10, 0.0  ;;  %v2480_v48 = vmax.f32 %v2448_v29, 0.0  ;;  %v2481_v58 = vmax.f32 %v2449_v42, 0.0 }
 0x2c1   : > { %v2482_v45 = vmax.f32 %v2450_v50, 0.0  ;;  %v2483_v9 = vmax.f32 %v2451_v55, 0.0  ;;  %v2484_v15 = vmax.f32 %v2452_v31, 0.0  ;;  %v2487_v27 = vmax.f32 %v2455_v0, 0.0 }
 0x2c2   : > { %v2488_v13 = vmax.f32 %v2456_v28, 0.0  ;;  %v2490_v62 = vpack.c.bf16 %v2460_v36, %v2459_v63  ;;  %v7841_v54 = vpack.c.bf16 %v2462_v56, %v2461_v47  ;;  %v7843_v7 = vpack.c.bf16 %v2464_v17, %v2463_v32 }
 0x2c3   : > { %v7845_v49 = vpack.c.bf16 %v2466_v51, %v2465_v23  ;;  %v7847_v30 = vpack.c.bf16 %v2468_v24, %v2467_v11  ;;  %v7849_v52 = vpack.c.bf16 %v2470_v4, %v2469_v44  ;;  %v7851_v59 = vpack.c.bf16 %v2472_v14, %v2471_v3  ;;  %v6181_v24 = vld [vmem:[#allocation7 + $0x138] sm:$0xff]  }
 0x2c4   : > { %v7853_v1 = vpack.c.bf16 %v2474_v37, %v2473_v38  ;;  %v7855_v60 = vpack.c.bf16 %v2476_v20, %v2475_v6  ;;  %v7857_v19 = vpack.c.bf16 %v2478_v18, %v2477_v5  ;;  %v7859_v57 = vpack.c.bf16 %v2480_v48, %v2479_v16  ;;  %v6191_v3 = vld [vmem:[#allocation7 + $0x1b8] sm:$0xff]   ;;  %v6182_v6 = vld [vmem:[#allocation7 + $0x170] sm:$0xff]  }
 0x2c5   : > { %v7861_v39 = vpack.c.bf16 %v2482_v45, %v2481_v58  ;;  %v7863_v21 = vpack.c.bf16 %v2484_v15, %v2483_v9  ;;  %v7865_v2 = vpack.c.bf16 %v2488_v13, %v2487_v27  ;;  %v2506_v22 = vshrl.u32 %v2490_v62, 16  ;;  %v6193_v20 = vld [vmem:[#allocation7 + $0x1f0] sm:$0xff]   ;;  %v6184_v27 = vld [vmem:[#allocation7 + $0x168] sm:$0xff]  }
 0x2c6   : > { %v2570_v35 = vshll.u32 %v2490_v62, 16  ;;  %v2489_v41 = vpack.c.bf16 %v2458_v53, %v2457_v43  ;;  %v2512_v40 = vshrl.u32 %v7841_v54, 16  ;;  %v2578_v47 = vshll.u32 %v7841_v54, 16  ;;  %v6183_v58 = vld [vmem:[#allocation7 + $0x130] sm:$0xff]  }
 0x2c7   : > { %v2569_v26 = vrot.slane %v2506_v22, 7  ;;  %v2515_v4 = vshrl.u32 %v7843_v7, 16  ;;  %v6195_v13 = vld [vmem:[#allocation7 + $0x1b0] sm:$0xff]   ;;  %v2582_v62 = vshll.u32 %v7843_v7, 16  ;;  %v6186_v7 = vld [vmem:[#allocation7 + $0x160] sm:$0xff]  }
 0x2c8   : > { %v2665_v61 = vrot.slane %v2570_v35, 7  ;;  %v2509_v10 = vshrl.u32 %v2489_v41, 16  ;;  %v2574_v29 = vshll.u32 %v2489_v41, 16  ;;  %v2577_v63 = vrot.slane %v2512_v40, 7 }
 0x2c9   : > { %v2572_v8 = vor.u32 %v2570_v35, %v2569_v26  ;;  %v2581_v48 = vrot.slane %v2515_v4, 7  ;;  %v2667_v54 = vrot.slane %v2578_v47, 7  ;;  %v2518_v41 = vshrl.u32 %v7845_v49, 16 }
 0x2ca   : > { %v2713_v42 = vsel %vm6597_vm2, %v2569_v26, %v2665_v61  ;;  %v2573_v31 = vrot.slane %v2509_v10, 7  ;;  %v2666_v28 = vrot.slane %v2574_v29, 7  ;;  %v2580_v44 = vor.u32 %v2578_v47, %v2577_v63 }
 0x2cb   : > { %v7870_v12 = vsel %vm6597_vm2, %v2506_v22, %v2572_v8  ;;  %v2881_v0 = vshll.u32 %v2713_v42, 16  ;;  %v3099_v43 = vrot.slane %v2713_v42, 1  ;;  %v6197_v22 = vld [vmem:[#allocation7 + $0x1e8] sm:$0xff]   ;;  %v2584_v61 = vor.u32 %v2582_v62, %v2581_v48 }
 0x2cc   : > { %v3098_v50 = vrot.slane %v7870_v12, 1  ;;  %v2876_v55 = vshll.u32 %v7870_v12, 16  ;;  %v2874_v53 = vshrl.u32 %v7870_v12, 16  ;;  %v2576_v56 = vor.u32 %v2574_v29, %v2573_v31  ;;  %v6199_v29 = vld [vmem:[#allocation7 + $0x1a8] sm:$0xff]  }
 0x2cd   : > { %v2714_v32 = vsel %vm6597_vm2, %v2573_v31, %v2666_v28  ;;  %v2883_v51 = vrot.slane %v2881_v0, 1  ;;  %v7895_v16 = vsel %vm6597_vm2, %v2512_v40, %v2580_v44  ;;  %v6185_v40 = vld [vmem:[#allocation7 + $0x128] sm:$0xff]   ;;  %v7910_v42 = vsel %vm6597_vm2, %v2577_v63, %v2667_v54  ;;  %v6187_v28 = vld [vmem:[#allocation7 + $0x120] sm:$0xff]   ;;  %v6190_v44 = vld [vmem:[#allocation7 + $0x118] sm:$0xff]  }
 0x2ce   : > { %v2878_v36 = vrot.slane %v2876_v55, 1  ;;  %v7881_v17 = vsel %vm920_vm4, %v3098_v50, %v3099_v43  ;;  %v2698_v11 = vsel %vm6597_vm2, %v2509_v10, %v2576_v56  ;;  %v2893_v37 = vshll.u32 %v2714_v32, 16  ;;  %v6200_v50 = vld [vmem:[#allocation7 + $0x1e0] sm:$0xff]   ;;  %v6208_v54 = vld [vmem:[#allocation7 + $0x1c8] sm:$0xff]  }
 0x2cf   : > { %3802 = vmatprep.mubr.bf16.mxu0 %v2698_v11  ;;  %v2888_v38 = vshll.u32 %v2698_v11, 16  ;;  %v2886_v5 = vshrl.u32 %v2698_v11, 16  ;;  %v3101_v15 = vrot.slane %v2698_v11, 1  ;;  %v3102_v26 = vrot.slane %v2714_v32, 1  ;;  %v6202_v32 = vld [vmem:[#allocation7 + $0x1d8] sm:$0xff]  }
 0x2d0   : > { %v2879_v23 = vor.u32 %v2878_v36, %v2874_v53  ;;  %3803 = vmatmul.mubr.bf16.vlgmr.msra.gmra.mxu0 %v7881_v17  ;;  %v2895_v9 = vrot.slane %v2893_v37, 1  ;;  %v2900_v8 = vshll.u32 %v7895_v16, 16  ;;  %v7916_v31 = vsel %vm6597_vm2, %v2515_v4, %v2584_v61  ;;  %v6188_v53 = vld [vmem:[#allocation7 + $0x158] sm:$0xff]   ;;  %v6201_v36 = vld [vmem:[#allocation7 + $0x1a0] sm:$0xff]   ;;  %v6204_v37 = vld [vmem:[#allocation7 + $0x1d0] sm:$0xff]  }
 0x2d1   : > { %3810 = vmatprep.mubr.bf16.mxu0 %v7870_v12  ;;  %v2890_v18 = vrot.slane %v2888_v38, 1  ;;  %5772 = vmatpush3.bf16.msra.mxu0 %v6191_v3  ;;  %v7905_v10 = vsel %vm920_vm4, %v3101_v15, %v3102_v26  ;;  %v7918_v0 = vrot.slane %v2518_v41, 7  ;;  %v2898_v43 = vshrl.u32 %v7895_v16, 16  ;;  %v6192_v3 = vld [vmem:[#allocation7 + $0x150] sm:$0xff]   ;;  %v6203_v38 = vld [vmem:[#allocation7 + $0x198] sm:$0xff]   ;;  %v6196_v15 = vld [vmem:[#allocation7 + $0x148] sm:$0xff]  }
 0x2d2   : > { %v7887_v14 = vsel %vm694_vm3, %v2879_v23, %v2883_v51  ;;  %5773 = vmatprep.subr.bf16.mxu0 %v6193_v20  ;;  %v2902_v55 = vrot.slane %v2900_v8, 1  ;;  %v2905_v63 = vshll.u32 %v7910_v42, 16  ;;  %v2586_v47 = vshll.u32 %v7845_v49, 16 }
 0x2d3   : > { %3641 = vmatprep.mubr.bf16.mxu1 %v7887_v14  ;;  %v2891_v45 = vor.u32 %v2890_v18, %v2886_v5  ;;  %v2668_v56 = vrot.slane %v2582_v62, 7  ;;  %v2912_v51 = vshll.u32 %v7916_v31, 16 }
 0x2d4   : > { %3642 = vmatmul.mubr.bf16.vlgmr.msra.gmra.mxu1 %v7870_v12  ;;  %v2903_v23 = vor.u32 %v2902_v55, %v2898_v43  ;;  %v2907_v4 = vrot.slane %v2905_v63, 1  ;;  %v2669_v62 = vrot.slane %v2586_v47, 7  ;;  %v6210_v55 = vld [vmem:[#allocation7 + $0x1c0] sm:$0xff]  }
 0x2d5   : > { %5660 = vmatpush3.bf16.msra.mxu1 %v6181_v24  ;;  %v7899_v35 = vsel %vm694_vm3, %v2891_v45, %v2895_v9  ;;  %5774 = vmatpush3.bf16.msra.mxu0 %v6195_v13  ;;  %v2521_v24 = vshrl.u32 %v7847_v30, 16  ;;  %v7929_v49 = vsel %vm6597_vm2, %v2581_v48, %v2668_v56  ;;  %v2914_v20 = vrot.slane %v2912_v51, 1  ;;  %v6194_v48 = vld [vmem:[#allocation7 + $0x110] sm:$0xff]  }
 0x2d6   : > { %5661 = vmatprep.subr.bf16.mxu1 %v6182_v6  ;;  %3649 = vmatprep.mubr.bf16.mxu1 %v7899_v35  ;;  %v7934_v6 = vsel %vm694_vm3, %v2903_v23, %v2907_v4  ;;  %v2910_v45 = vshrl.u32 %v7916_v31, 16  ;;  %v2917_v9 = vshll.u32 %v7929_v49, 16  ;;  %v2590_v13 = vshll.u32 %v7847_v30, 16  ;;  %v6209_v30 = vld [vmem:[#allocation7 + $0x188] sm:$0xff]   ;;  %v7967_v23 = vld [vmem:[#allocation7 + $0x238] sm:$0xff]  }
 0x2d7   : > { %5775 = vmatprep.subr.bf16.mxu0 %v6197_v22  ;;  %v2589_v18 = vrot.slane %v2521_v24, 7  ;;  %v3105_v22 = vrot.slane %v7910_v42, 1  ;;  %v2717_v42 = vsel %vm6597_vm2, %v7918_v0, %v2669_v62  ;;  %v2594_v51 = vshll.u32 %v7849_v52, 16 }
 0x2d8   : > { %3811 = vmatmul.mubr.bf16.gmra.mxu0 %v7905_v10  ;;  %v2915_v26 = vor.u32 %v2914_v20, %v2910_v45  ;;  %v2929_v56 = vshll.u32 %v2717_v42, 16  ;;  %v3111_v62 = vrot.slane %v2717_v42, 1  ;;  %v9076_v42 = vshrl.u32 %v7865_v2, 16 }
 0x2d9   : > { %5662 = vmatpush3.bf16.msra.mxu1 %v6183_v58  ;;  %3818 = vmatprep.mubr.bf16.mxu0 %v7895_v16  ;;  %v3104_v58 = vrot.slane %v7895_v16, 1  ;;  %v2592_v61 = vor.u32 %v2590_v13, %v2589_v18 }
 0x2da   : > { %5663 = vmatprep.subr.bf16.mxu1 %v6184_v27  ;;  %5776 = vmatpush3.bf16.msra.mxu0 %v6199_v29  ;;  %v6206_v27 = vld [vmem:[#allocation7 + $0x190] sm:$0xff]   ;;  %v2919_v29 = vrot.slane %v2917_v9, 1  ;;  %v2931_v20 = vrot.slane %v2929_v56, 1 }
 0x2db   : > { %5777 = vmatprep.subr.bf16.mxu0 %v6200_v50  ;;  %v6205_v50 = vld [vmem:[#allocation7 + $0x140] sm:$0xff]   ;;  %v7963_v63 = vsel %vm6597_vm2, %v2521_v24, %v2592_v61  ;;  %v3108_v24 = vrot.slane %v7929_v49, 1 }
 0x2dc   : > { %3650 = vmatmul.mubr.bf16.gmra.mxu1 %v2698_v11  ;;  %v2588_v11 = vor.u32 %v2586_v47, %v7918_v0  ;;  %v3107_v0 = vrot.slane %v7916_v31, 1  ;;  %v2936_v4 = vshll.u32 %v7963_v63, 16 }
 0x2dd   : > { %3657 = vmatprep.mubr.bf16.mxu1 %v7887_v14  ;;  %5664 = vmatpush3.bf16.msra.mxu1 %v6185_v40  ;;  %v6198_v40 = vld [vmem:[#allocation7 + $0x108] sm:$0xff]  }
 0x2de   : > { %5665 = vmatprep.subr.bf16.mxu1 %v6186_v7  ;;  %5778 = vmatpush3.bf16.msra.mxu0 %v6201_v36  ;;  %v7939_v5 = vsel %vm6597_vm2, %v2518_v41, %v2588_v11  ;;  %v2524_v41 = vshrl.u32 %v7849_v52, 16  ;;  %v7949_v7 = vsel %vm920_vm4, %v3104_v58, %v3105_v22  ;;  %v6207_v36 = vld [vmem:[#allocation7 + $0x100] sm:$0xff]   ;;  %v2670_v11 = vrot.slane %v2590_v13, 7 }
 0x2df   : > { %5779 = vmatprep.subr.bf16.mxu0 %v6202_v32  ;;  %v2924_v8 = vshll.u32 %v7939_v5, 16  ;;  %v2922_v47 = vshrl.u32 %v7939_v5, 16  ;;  %v6211_v32 = vld [vmem:[#allocation7 + $0x180] sm:$0xff]   ;;  %v3110_v9 = vrot.slane %v7939_v5, 1  ;;  %v2671_v13 = vrot.slane %v2594_v51, 7 }
 0x2e0   : > { %3819 = vmatmul.mubr.bf16.gmra.mxu0 %v7881_v17  ;;  %v2718_v52 = vsel %vm6597_vm2, %v2589_v18, %v2670_v11  ;;  %v2533_v11 = vshrl.u32 %v7855_v60, 16 }
 0x2e1   : > { %5666 = vmatpush3.bf16.msra.mxu1 %v6187_v28  ;;  %3826 = vmatprep.mubr.bf16.mxu0 %v7916_v31  ;;  %v7958_v28 = vsel %vm694_vm3, %v2915_v26, %v2919_v29  ;;  %v2926_v43 = vrot.slane %v2924_v8, 1  ;;  %v2941_v18 = vshll.u32 %v2718_v52, 16  ;;  %v2530_v8 = vshrl.u32 %v7853_v1, 16 }
 0x2e2   : > { %5667 = vmatprep.subr.bf16.mxu1 %v6188_v53  ;;  %5780 = vmatpush3.bf16.msra.mxu0 %v6203_v38  ;;  %v2593_v53 = vrot.slane %v2524_v41, 7  ;;  %v2527_v38 = vshrl.u32 %v7851_v59, 16  ;;  %v7996_v61 = vsel %vm920_vm4, %v3110_v9, %v3111_v62  ;;  %v2605_v9 = vrot.slane %v2533_v11, 7 }
 0x2e3   : > { %5781 = vmatprep.subr.bf16.mxu0 %v6204_v37  ;;  %v7974_v37 = vsel %vm920_vm4, %v3107_v0, %v3108_v24  ;;  %v8019_v24 = vrot.slane %v9076_v42, 7 }
 0x2e4   : > { %3658 = vmatmul.mubr.bf16.gmra.mxu1 %v7870_v12  ;;  %v2597_v45 = vrot.slane %v2527_v38, 7 }
 0x2e5   : > { %3665 = vmatprep.mubr.bf16.mxu1 %v7934_v6  ;;  %5668 = vmatpush3.bf16.msra.mxu1 %v6190_v44  ;;  %v2927_v44 = vor.u32 %v2926_v43, %v2922_v47  ;;  %v3114_v47 = vrot.slane %v2718_v52, 1 }
 0x2e6   : > { %5669 = vmatprep.subr.bf16.mxu1 %v6192_v3  ;;  %5782 = vmatpush3.bf16.msra.mxu0 %v6206_v27  ;;  %v2596_v3 = vor.u32 %v2594_v51, %v2593_v53  ;;  %v2598_v27 = vshll.u32 %v7851_v59, 16 }
 0x2e7   : > { %5783 = vmatprep.subr.bf16.mxu0 %v6208_v54  ;;  %v7983_v49 = vsel %vm694_vm3, %v2927_v44, %v2931_v20  ;;  %v2630_v44 = vshll.u32 %v7865_v2, 16 }
 0x2e8   : > { %3827 = vmatmul.mubr.bf16.gmra.mxu0 %v7949_v7  ;;  %v7988_v58 = vsel %vm6597_vm2, %v2524_v41, %v2596_v3  ;;  %v2600_v26 = vor.u32 %v2598_v27, %v2597_v45  ;;  %v2943_v41 = vrot.slane %v2941_v18, 1  ;;  %v2672_v0 = vrot.slane %v2598_v27, 7 }
 0x2e9   : > { %5670 = vmatpush3.bf16.msra.mxu1 %v6194_v48  ;;  %3834 = vmatprep.mubr.bf16.mxu0 %v7939_v5  ;;  %v2938_v48 = vrot.slane %v2936_v4, 1  ;;  %v2948_v22 = vshll.u32 %v7988_v58, 16  ;;  %v2946_v43 = vshrl.u32 %v7988_v58, 16 }
 0x2ea   : > { %5671 = vmatprep.subr.bf16.mxu1 %v6196_v15  ;;  %5784 = vmatpush3.bf16.msra.mxu0 %v6209_v30  ;;  %v2934_v15 = vshrl.u32 %v7963_v63, 16  ;;  %v2601_v30 = vrot.slane %v2530_v8, 7 }
 0x2eb   : > { %5785 = vmatprep.subr.bf16.mxu0 %v6210_v55  ;;  %v2950_v29 = vrot.slane %v2948_v22, 1  ;;  %v3113_v55 = vrot.slane %v7963_v63, 1 }
 0x2ec   : > { %3666 = vmatmul.mubr.bf16.gmra.mxu1 %v7895_v16  ;;  %v2939_v54 = vor.u32 %v2938_v48, %v2934_v15  ;;  %v3116_v15 = vrot.slane %v7988_v58, 1 }
 0x2ed   : > { %3673 = vmatprep.mubr.bf16.mxu1 %v7958_v28  ;;  %5672 = vmatpush3.bf16.msra.mxu1 %v6198_v40  ;;  %v2719_v40 = vsel %vm6597_vm2, %v2593_v53, %v2671_v13  ;;  %v2951_v56 = vor.u32 %v2950_v29, %v2946_v43  ;;  %v8023_v4 = vsel %vm920_vm4, %v3113_v55, %v3114_v47  ;;  %v2606_v13 = vshll.u32 %v7855_v60, 16 }
 0x2ee   : > { %5673 = vmatprep.subr.bf16.mxu1 %v6205_v50  ;;  %5786 = vmatpush3.bf16.msra.mxu0 %v6211_v32  ;;  %v8004_v59 = vsel %vm694_vm3, %v2939_v54, %v2943_v41  ;;  %v8009_v50 = vsel %vm6597_vm2, %v2527_v38, %v2600_v26  ;;  %v2953_v53 = vshll.u32 %v2719_v40, 16  ;;  %v2680_v38 = vrot.slane %v2630_v44, 7 }
 0x2ef   : > { %v2960_v32 = vshll.u32 %v8009_v50, 16  ;;  %v2958_v18 = vshrl.u32 %v8009_v50, 16  ;;  %v3117_v54 = vrot.slane %v2719_v40, 1  ;;  %v2536_v41 = vshrl.u32 %v7857_v19, 16 }
 0x2f0   : > { %3835 = vmatmul.mubr.bf16.gmra.mxu0 %v7974_v37  ;;  %v2955_v3 = vrot.slane %v2953_v53, 1 }
 0x2f1   : > { %5674 = vmatpush3.bf16.msra.mxu1 %v6207_v36  ;;  %3842 = vmatprep.mubr.bf16.mxu0 %v7963_v63  ;;  %v2602_v36 = vshll.u32 %v7853_v1, 16  ;;  %v2720_v1 = vsel %vm6597_vm2, %v2597_v45, %v2672_v0  ;;  %v2962_v52 = vrot.slane %v2960_v32, 1  ;;  %v8043_v45 = vsel %vm6597_vm2, %v8019_v24, %v2680_v38 }
 0x2f2   : > { %5955 = vmatprep.subr.bf16.mxu1 %v7967_v23  ;;  %v8033_v20 = vsel %vm694_vm3, %v2951_v56, %v2955_v3  ;;  %v2965_v27 = vshll.u32 %v2720_v1, 16  ;;  %v8051_v29 = vsel %vm920_vm4, %v3116_v15, %v3117_v54  ;;  %v3119_v0 = vrot.slane %v8009_v50, 1 }
 0x2f3   : > { %v2604_v51 = vor.u32 %v2602_v36, %v2601_v30  ;;  %v2673_v62 = vrot.slane %v2602_v36, 7  ;;  %v2963_v22 = vor.u32 %v2962_v52, %v2958_v18  ;;  %v2609_v36 = vrot.slane %v2536_v41, 7 }
 0x2f4   : > { %3674 = vmatmul.mubr.bf16.gmra.mxu1 %v7916_v31  ;;  %v2967_v55 = vrot.slane %v2965_v27, 1  ;;  %v2610_v56 = vshll.u32 %v7857_v19, 16  ;;  %v2674_v32 = vrot.slane %v2606_v13, 7  ;;  %v2539_v15 = vshrl.u32 %v7859_v57, 16 }
 0x2f5   : > { %3681 = vmatprep.mubr.bf16.mxu1 %v7983_v49  ;;  %v8038_v48 = vsel %vm6597_vm2, %v2530_v8, %v2604_v51  ;;  %v2608_v8 = vor.u32 %v2606_v13, %v2605_v9  ;;  %v2721_v43 = vsel %vm6597_vm2, %v2601_v30, %v2673_v62  ;;  %v3120_v51 = vrot.slane %v2720_v1, 1 }
 0x2f6   : > { %v2972_v26 = vshll.u32 %v8038_v48, 16  ;;  %v8059_v60 = vsel %vm694_vm3, %v2963_v22, %v2967_v55  ;;  %v2970_v47 = vshrl.u32 %v8038_v48, 16  ;;  %v2977_v30 = vshll.u32 %v2721_v43, 16 }
 0x2f7   : > { %v8064_v53 = vsel %vm6597_vm2, %v2533_v11, %v2608_v8  ;;  %v2612_v52 = vor.u32 %v2610_v56, %v2609_v36  ;;  %v8072_v18 = vsel %vm920_vm4, %v3119_v0, %v3120_v51  ;;  %v2722_v27 = vsel %vm6597_vm2, %v2605_v9, %v2674_v32 }
 0x2f8   : > { %3843 = vmatmul.mubr.bf16.gmra.mxu0 %v7996_v61  ;;  %v2974_v40 = vrot.slane %v2972_v26, 1  ;;  %v2984_v38 = vshll.u32 %v8064_v53, 16  ;;  %v2979_v11 = vrot.slane %v2977_v30, 1  ;;  %v2613_v62 = vrot.slane %v2539_v15, 7 }
 0x2f9   : > { %3850 = vmatprep.mubr.bf16.mxu0 %v7988_v58  ;;  %v8085_v13 = vsel %vm6597_vm2, %v2536_v41, %v2612_v52  ;;  %v3122_v54 = vrot.slane %v8038_v48, 1  ;;  %v2982_v22 = vshrl.u32 %v8064_v53, 16  ;;  %v2989_v9 = vshll.u32 %v2722_v27, 16 }
 0x2fa   : > { %v2975_v3 = vor.u32 %v2974_v40, %v2970_v47  ;;  %v2986_v1 = vrot.slane %v2984_v38, 1  ;;  %v2614_v26 = vshll.u32 %v7859_v57, 16  ;;  %v2675_v8 = vrot.slane %v2610_v56, 7 }
 0x2fb   : > { %v3123_v55 = vrot.slane %v2721_v43, 1  ;;  %v2996_v0 = vshll.u32 %v8085_v13, 16  ;;  %v2542_v30 = vshrl.u32 %v7861_v39, 16  ;;  %v2991_v41 = vrot.slane %v2989_v9, 1 }
 0x2fc   : > { %3682 = vmatmul.mubr.bf16.gmra.mxu1 %v7939_v5  ;;  %v8080_v19 = vsel %vm694_vm3, %v2975_v3, %v2979_v11  ;;  %v2987_v40 = vor.u32 %v2986_v1, %v2982_v22  ;;  %v2616_v47 = vor.u32 %v2614_v26, %v2613_v62  ;;  %v2723_v51 = vsel %vm6597_vm2, %v2609_v36, %v2675_v8 }
 0x2fd   : > { %3689 = vmatprep.mubr.bf16.mxu1 %v8004_v59  ;;  %v8093_v32 = vsel %vm920_vm4, %v3122_v54, %v3123_v55  ;;  %v2998_v43 = vrot.slane %v2996_v0, 1  ;;  %v2617_v3 = vrot.slane %v2542_v30, 7  ;;  %v3125_v38 = vrot.slane %v8064_v53, 1 }
 0x2fe   : > { %v8101_v57 = vsel %vm694_vm3, %v2987_v40, %v2991_v41  ;;  %v8106_v56 = vsel %vm6597_vm2, %v2539_v15, %v2616_v47  ;;  %v2994_v52 = vshrl.u32 %v8085_v13, 16  ;;  %v3001_v36 = vshll.u32 %v2723_v51, 16 }
 0x2ff   : > { %v2618_v11 = vshll.u32 %v7861_v39, 16  ;;  %v2676_v1 = vrot.slane %v2614_v26, 7  ;;  %v3126_v54 = vrot.slane %v2722_v27, 1  ;;  %v3008_v9 = vshll.u32 %v8106_v56, 16 }
 0x300   : > { %3851 = vmatmul.mubr.bf16.gmra.mxu0 %v8023_v4  ;;  %v2999_v22 = vor.u32 %v2998_v43, %v2994_v52  ;;  %v2545_v55 = vshrl.u32 %v7863_v21, 16  ;;  %v3003_v15 = vrot.slane %v3001_v36, 1  ;;  %v3128_v41 = vrot.slane %v8085_v13, 1 }
 0x301   : > { %3858 = vmatprep.mubr.bf16.mxu0 %v8009_v50  ;;  %v2620_v8 = vor.u32 %v2618_v11, %v2617_v3  ;;  %v8114_v40 = vsel %vm920_vm4, %v3125_v38, %v3126_v54  ;;  %v2724_v0 = vsel %vm6597_vm2, %v2613_v62, %v2676_v1  ;;  %v3010_v27 = vrot.slane %v3008_v9, 1 }
 0x302   : > { %v8122_v39 = vsel %vm694_vm3, %v2999_v22, %v3003_v15  ;;  %v2621_v47 = vrot.slane %v2545_v55, 7  ;;  %v3006_v43 = vshrl.u32 %v8106_v56, 16  ;;  %v3013_v62 = vshll.u32 %v2724_v0, 16 }
 0x303   : > { %v8127_v26 = vsel %vm6597_vm2, %v2542_v30, %v2620_v8  ;;  %v2622_v38 = vshll.u32 %v7863_v21, 16  ;;  %v2677_v52 = vrot.slane %v2618_v11, 7  ;;  %v3129_v36 = vrot.slane %v2723_v51, 1 }
 0x304   : > { %3690 = vmatmul.mubr.bf16.gmra.mxu1 %v7963_v63  ;;  %v3011_v1 = vor.u32 %v3010_v27, %v3006_v43  ;;  %v3020_v54 = vshll.u32 %v8127_v26, 16  ;;  %v2548_v22 = vshrl.u32 %v7803_v33, 16  ;;  %v3015_v30 = vrot.slane %v3013_v62, 1 }
 0x305   : > { %3697 = vmatprep.mubr.bf16.mxu1 %v8033_v20  ;;  %v2624_v9 = vor.u32 %v2622_v38, %v2621_v47  ;;  %v8135_v15 = vsel %vm920_vm4, %v3128_v41, %v3129_v36  ;;  %v2725_v8 = vsel %vm6597_vm2, %v2617_v3, %v2677_v52  ;;  %v3131_v41 = vrot.slane %v8106_v56, 1 }
 0x306   : > { %v8143_v21 = vsel %vm694_vm3, %v3011_v1, %v3015_v30  ;;  %v3022_v51 = vrot.slane %v3020_v54, 1  ;;  %v2625_v11 = vrot.slane %v2548_v22, 7  ;;  %v3018_v43 = vshrl.u32 %v8127_v26, 16 }
 0x307   : > { %v8148_v27 = vsel %vm6597_vm2, %v2545_v55, %v2624_v9  ;;  %v3025_v3 = vshll.u32 %v2725_v8, 16  ;;  %v2626_v62 = vshll.u32 %v7803_v33, 16  ;;  %v2678_v52 = vrot.slane %v2622_v38, 7 }
 0x308   : > { %3859 = vmatmul.mubr.bf16.gmra.mxu0 %v8051_v29  ;;  %v3132_v36 = vrot.slane %v2724_v0, 1  ;;  %v3023_v25 = vor.u32 %v3022_v51, %v3018_v43  ;;  %v3032_v1 = vshll.u32 %v8148_v27, 16  ;;  %v3134_v9 = vrot.slane %v8127_v26, 1 }
 0x309   : > { %3866 = vmatprep.mubr.bf16.mxu0 %v8038_v48  ;;  %v2628_v54 = vor.u32 %v2626_v62, %v2625_v11  ;;  %v3027_v42 = vrot.slane %v3025_v3, 1  ;;  %v2726_v55 = vsel %vm6597_vm2, %v2621_v47, %v2678_v52  ;;  %v3030_v51 = vshrl.u32 %v8148_v27, 16 }
 0x30a   : > { %v8155_v30 = vsel %vm920_vm4, %v3131_v41, %v3132_v36  ;;  %v3034_v0 = vrot.slane %v3032_v1, 1  ;;  %v3037_v41 = vshll.u32 %v2726_v55, 16  ;;  %v2679_v47 = vrot.slane %v2626_v62, 7 }
 0x30b   : > { %v8163_v33 = vsel %vm694_vm3, %v3023_v25, %v3027_v42  ;;  %v8168_v38 = vsel %vm6597_vm2, %v2548_v22, %v2628_v54  ;;  %v3135_v43 = vrot.slane %v2725_v8, 1  ;;  %v3137_v62 = vrot.slane %v8148_v27, 1 }
 0x30c   : > { %3698 = vmatmul.mubr.bf16.gmra.mxu1 %v7988_v58  ;;  %v3035_v3 = vor.u32 %v3034_v0, %v3030_v51  ;;  %v3044_v52 = vshll.u32 %v8168_v38, 16  ;;  %v3039_v42 = vrot.slane %v3037_v41, 1  ;;  %v2727_v22 = vsel %vm6597_vm2, %v2625_v11, %v2679_v47 }
 0x30d   : > { %3705 = vmatprep.mubr.bf16.mxu1 %v8059_v60  ;;  %v8174_v25 = vsel %vm920_vm4, %v3134_v9, %v3135_v43  ;;  %v3042_v1 = vshrl.u32 %v8168_v38, 16  ;;  %v3049_v54 = vshll.u32 %v2727_v22, 16  ;;  %v2632_v0 = vor.u32 %v2630_v44, %v8019_v24 }
 0x30e   : > { %v8182_v36 = vsel %vm694_vm3, %v3035_v3, %v3039_v42  ;;  %v3046_v8 = vrot.slane %v3044_v52, 1  ;;  %v3138_v11 = vrot.slane %v2726_v55, 1  ;;  %v9166_v47 = vshrl.u32 %v7865_v2, 16  ;;  %v6213_v2 = vld [vmem:[#allocation7 + $0x230] sm:$0xff]   ;;  %v6215_v52 = vld [vmem:[#allocation7 + $0x220] sm:$0xff]  }
 0x30f   : > { %v3051_v41 = vrot.slane %v3049_v54, 1  ;;  %v3140_v44 = vrot.slane %v8168_v38, 1  ;;  %v3141_v55 = vrot.slane %v2727_v22, 1 }
 0x310   : > { %3867 = vmatmul.mubr.bf16.gmra.mxu0 %v8072_v18  ;;  %v3047_v9 = vor.u32 %v3046_v8, %v3042_v1  ;;  %v8191_v51 = vsel %vm920_vm4, %v3137_v62, %v3138_v11  ;;  %v8198_v43 = vsel %vm6597_vm2, %v9166_v47, %v2632_v0 }
 0x311   : > { %3874 = vmatprep.mubr.bf16.mxu0 %v8064_v53  ;;  %v8208_v3 = vsel %vm920_vm4, %v3140_v44, %v3141_v55 }
 0x312   : > { %v8203_v24 = vsel %vm694_vm3, %v3047_v9, %v3051_v41 }
 0x314   : > { %3706 = vmatmul.mubr.bf16.gmra.mxu1 %v8009_v50 }
 0x315   : > { %3713 = vmatprep.mubr.bf16.mxu1 %v8080_v19 }
 0x318   : > { %3875 = vmatmul.mubr.bf16.gmra.mxu0 %v8093_v32 }
 0x319   : > { %3882 = vmatprep.mubr.bf16.mxu0 %v8085_v13 }
 0x31c   : > { %3714 = vmatmul.mubr.bf16.gmra.mxu1 %v8038_v48 }
 0x31d   : > { %3721 = vmatprep.mubr.bf16.mxu1 %v8101_v57 }
 0x320   : > { %3883 = vmatmul.mubr.bf16.gmra.mxu0 %v8114_v40 }
 0x321   : > { %3890 = vmatprep.mubr.bf16.mxu0 %v8106_v56 }
 0x324   : > { %3722 = vmatmul.mubr.bf16.gmra.mxu1 %v8064_v53 }
 0x325   : > { %3729 = vmatprep.mubr.bf16.mxu1 %v8122_v39 }
 0x328   : > { %3891 = vmatmul.mubr.bf16.gmra.mxu0 %v8135_v15 }
 0x329   : > { %3898 = vmatprep.mubr.bf16.mxu0 %v8127_v26 }
 0x32c   : > { %3730 = vmatmul.mubr.bf16.gmra.mxu1 %v8085_v13 }
 0x32d   : > { %3737 = vmatprep.mubr.bf16.mxu1 %v8143_v21 }
 0x330   : > { %3899 = vmatmul.mubr.bf16.gmra.mxu0 %v8155_v30 }
 0x331   : > { %3906 = vmatprep.mubr.bf16.mxu0 %v8148_v27 }
 0x334   : > { %3738 = vmatmul.mubr.bf16.gmra.mxu1 %v8106_v56 }
 0x335   : > { %3745 = vmatprep.mubr.bf16.mxu1 %v8163_v33 }
 0x338   : > { %3907 = vmatmul.mubr.bf16.gmra.mxu0 %v8174_v25 }
 0x339   : > { %3914 = vmatprep.mubr.bf16.mxu0 %v8168_v38 }
 0x33c   : > { %3746 = vmatmul.mubr.bf16.gmra.mxu1 %v8127_v26 }
 0x33d   : > { %3753 = vmatprep.mubr.bf16.mxu1 %v8182_v36 }
 0x340   : > { %3915 = vmatmul.mubr.bf16.gmra.mxu0 %v8191_v51 }
 0x341   : > { %3922 = vmatprep.mubr.bf16.mxu0 %v8198_v43 }
 0x344   : > { %3754 = vmatmul.mubr.bf16.gmra.mxu1 %v8148_v27 }
 0x345   : > { %3761 = vmatprep.mubr.bf16.mxu1 %v8203_v24 }
 0x348   : > { %3923 = vmatmul.mubr.bf16.gmra.mxu0 %v8208_v3 }
 0x349   : > { %4124 = vmatprep.mubr.bf16.mxu0 %v7887_v14 }
 0x34c   : > { %3762 = vmatmul.mubr.bf16.gmra.mxu1 %v8168_v38 }
 0x34d   : > { %3963 = vmatprep.mubr.bf16.mxu1 %v7905_v10 }
 0x350   : > { %4125 = vmatmul.mubr.bf16.vlgmr.msra.gmra.mxu0 %v7870_v12  ;;  %v6216_v12 = vld [vmem:[#allocation7 + $0x218] sm:$0xff]  }
 0x351   : > { %4132 = vmatprep.mubr.bf16.mxu0 %v7934_v6 }
 0x354   : > { %3964 = vmatmul.mubr.bf16.vlgmr.msra.gmra.mxu1 %v7899_v35  ;;  %v6217_v35 = vld [vmem:[#allocation7 + $0x210] sm:$0xff]  }
 0x355   : > { %3971 = vmatprep.mubr.bf16.mxu1 %v7881_v17  ;;  %5956 = vmatpush3.bf16.msra.mxu1 %v7967_v23 }
 0x356   : > { %5957 = vmatprep.subr.bf16.mxu1 %v6213_v2 }
 0x358   : > { %4133 = vmatmul.mubr.bf16.gmra.mxu0 %v7895_v16  ;;  %v6218_v16 = vld [vmem:[#allocation7 + $0x208] sm:$0xff]  }
 0x359   : > { %5958 = vmatpush3.bf16.msra.mxu1 %v6213_v2  ;;  %4140 = vmatprep.mubr.bf16.mxu0 %v7958_v28 }
 0x35a   : > { %5959 = vmatprep.subr.bf16.mxu1 %v6214_v46 }
 0x35c   : > { %3972 = vmatmul.mubr.bf16.gmra.mxu1 %v7887_v14  ;;  %v6219_v14 = vld [vmem:[#allocation7 + $0x200] sm:$0xff]  }
 0x35d   : > { %3979 = vmatprep.mubr.bf16.mxu1 %v7949_v7  ;;  %5960 = vmatpush3.bf16.msra.mxu1 %v6214_v46 }
 0x35e   : > { %5961 = vmatprep.subr.bf16.mxu1 %v6215_v52 }
 0x360   : > { %4141 = vmatmul.mubr.bf16.gmra.mxu0 %v7916_v31 }
 0x361   : > { %5962 = vmatpush3.bf16.msra.mxu1 %v6215_v52  ;;  %4148 = vmatprep.mubr.bf16.mxu0 %v7983_v49 }
 0x362   : > { %5963 = vmatprep.subr.bf16.mxu1 %v6216_v12 }
 0x364   : > { %3980 = vmatmul.mubr.bf16.gmra.mxu1 %v7934_v6 }
 0x365   : > { %3987 = vmatprep.mubr.bf16.mxu1 %v7974_v37  ;;  %5964 = vmatpush3.bf16.msra.mxu1 %v6216_v12 }
 0x366   : > { %5965 = vmatprep.subr.bf16.mxu1 %v6217_v35 }
 0x368   : > { %4149 = vmatmul.mubr.bf16.gmra.mxu0 %v7939_v5 }
 0x369   : > { %5966 = vmatpush3.bf16.msra.mxu1 %v6217_v35  ;;  %4156 = vmatprep.mubr.bf16.mxu0 %v8004_v59 }
 0x36a   : > { %5967 = vmatprep.subr.bf16.mxu1 %v6218_v16 }
 0x36c   : > { %3988 = vmatmul.mubr.bf16.gmra.mxu1 %v7958_v28 }
 0x36d   : > { %3995 = vmatprep.mubr.bf16.mxu1 %v7996_v61  ;;  %5968 = vmatpush3.bf16.msra.mxu1 %v6218_v16 }
 0x36e   : > { %5969 = vmatprep.subr.bf16.mxu1 %v6219_v14 }
 0x370   : > { %4157 = vmatmul.mubr.bf16.gmra.mxu0 %v7963_v63 }
 0x371   : > { %5970 = vmatpush3.bf16.msra.mxu1 %v6219_v14  ;;  %4164 = vmatprep.mubr.bf16.mxu0 %v8033_v20 }
 0x374   : > { %3996 = vmatmul.mubr.bf16.gmra.mxu1 %v7983_v49 }
 0x375   : > { %4003 = vmatprep.mubr.bf16.mxu1 %v8023_v4 }
 0x378   : > { %4165 = vmatmul.mubr.bf16.gmra.mxu0 %v7988_v58 }
 0x379   : > { %4172 = vmatprep.mubr.bf16.mxu0 %v8059_v60 }
 0x37c   : > { %4004 = vmatmul.mubr.bf16.gmra.mxu1 %v8004_v59 }
 0x37d   : > { %4011 = vmatprep.mubr.bf16.mxu1 %v8051_v29 }
 0x380   : > { %4173 = vmatmul.mubr.bf16.gmra.mxu0 %v8009_v50 }
 0x381   : > { %4180 = vmatprep.mubr.bf16.mxu0 %v8080_v19 }
 0x384   : > { %4012 = vmatmul.mubr.bf16.gmra.mxu1 %v8033_v20 }
 0x385   : > { %4019 = vmatprep.mubr.bf16.mxu1 %v8072_v18 }
 0x388   : > { %4181 = vmatmul.mubr.bf16.gmra.mxu0 %v8038_v48 }
 0x389   : > { %4188 = vmatprep.mubr.bf16.mxu0 %v8101_v57 }
 0x38c   : > { %4020 = vmatmul.mubr.bf16.gmra.mxu1 %v8059_v60 }
 0x38d   : > { %4027 = vmatprep.mubr.bf16.mxu1 %v8093_v32 }
 0x390   : > { %v5563_v10 = vpop.f32.mrf.mxu0  ;;  %4189 = vmatmul.mubr.bf16.gmra.mxu0 %v8064_v53 }
 0x391   : > { %4196 = vmatprep.mubr.bf16.mxu0 %v8122_v39 }
 0x392   : > { %v5564_v6 = vpop.f32.mrf.mxu0 }
 0x393   : > { %v5565_v5 = vadd.f32 %v5564_v6, %v5563_v10 }
 0x394   : > { %v5451_v31 = vpop.f32.mrf.mxu1  ;;  %4028 = vmatmul.mubr.bf16.gmra.mxu1 %v8080_v19  ;;  %v5566_v63 = vpop.f32.mrf.mxu0 }
 0x395   : > { %4035 = vmatprep.mubr.bf16.mxu1 %v8114_v40 }
 0x396   : > { %v5452_v28 = vpop.f32.mrf.mxu1  ;;  %v5567_v58 = vpop.f32.mrf.mxu0 }
 0x397   : > { %v5453_v23 = vadd.f32 %v5452_v28, %v5451_v31  ;;  %v5568_v50 = vadd.f32 %v5567_v58, %v5566_v63 }
 0x398   : > { %v5454_v49 = vpop.f32.mrf.mxu1  ;;  %v5569_v48 = vpop.f32.mrf.mxu0  ;;  %4197 = vmatmul.mubr.bf16.gmra.mxu0 %v8085_v13 }
 0x399   : > { %v8251_v59 = vadd.f32 %v5565_v5, %v5453_v23  ;;  %4204 = vmatprep.mubr.bf16.mxu0 %v8143_v21 }
 0x39a   : > { %v5455_v20 = vpop.f32.mrf.mxu1  ;;  %v5570_v19 = vpop.f32.mrf.mxu0 }
 0x39b   : > { %v5456_v60 = vadd.f32 %v5455_v20, %v5454_v49  ;;  %v5571_v22 = vadd.f32 %v5570_v19, %v5569_v48 }
 0x39c   : > { %v5457_v53 = vpop.f32.mrf.mxu1  ;;  %4036 = vmatmul.mubr.bf16.gmra.mxu1 %v8101_v57  ;;  %v5572_v62 = vpop.f32.mrf.mxu0 }
 0x39d   : > { %v8256_v42 = vadd.f32 %v5568_v50, %v5456_v60  ;;  %4043 = vmatprep.mubr.bf16.mxu1 %v8135_v15  ;;  %v3161_v50 = vshll.u32 %v8198_v43, 16 }
 0x39e   : > { %v5458_v8 = vpop.f32.mrf.mxu1  ;;  %v5573_v0 = vpop.f32.mrf.mxu0 }
 0x39f   : > { %v5459_v1 = vadd.f32 %v5458_v8, %v5457_v53  ;;  %v5574_v13 = vadd.f32 %v5573_v0, %v5572_v62  ;;  %v3166_v0 = vshll.u32 %v8043_v45, 16 }
 0x3a0   : > { %v5460_v54 = vpop.f32.mrf.mxu1  ;;  %v5575_v41 = vpop.f32.mrf.mxu0  ;;  %4205 = vmatmul.mubr.bf16.gmra.mxu0 %v8106_v56 }
 0x3a1   : > { %v8259_v11 = vadd.f32 %v5571_v22, %v5459_v1  ;;  %4212 = vmatprep.mubr.bf16.mxu0 %v8163_v33  ;;  %v3163_v22 = vrot.slane %v3161_v50, 1 }
 0x3a2   : > { %v5461_v9 = vpop.f32.mrf.mxu1  ;;  %v5576_v44 = vpop.f32.mrf.mxu0 }
 0x3a3   : > { %v5462_v47 = vadd.f32 %v5461_v9, %v5460_v54  ;;  %v5577_v2 = vadd.f32 %v5576_v44, %v5575_v41  ;;  %v3159_v54 = vshrl.u32 %v8198_v43, 16 }
 0x3a4   : > { %v5463_v57 = vpop.f32.mrf.mxu1  ;;  %4044 = vmatmul.mubr.bf16.gmra.mxu1 %v8122_v39  ;;  %v5578_v52 = vpop.f32.mrf.mxu0 }
 0x3a5   : > { %v8264_v55 = vadd.f32 %v5574_v13, %v5462_v47  ;;  %4051 = vmatprep.mubr.bf16.mxu1 %v8155_v30  ;;  %v3164_v47 = vor.u32 %v3163_v22, %v3159_v54 }
 0x3a6   : > { %v5464_v46 = vpop.f32.mrf.mxu1  ;;  %v5579_v16 = vpop.f32.mrf.mxu0 }
 0x3a7   : > { %v5465_v12 = vadd.f32 %v5464_v46, %v5463_v57  ;;  %v5580_v56 = vadd.f32 %v5579_v16, %v5578_v52  ;;  %v3168_v46 = vrot.slane %v3166_v0, 1 }
 0x3a8   : > { %v5466_v35 = vpop.f32.mrf.mxu1  ;;  %v5581_v31 = vpop.f32.mrf.mxu0  ;;  %4213 = vmatmul.mubr.bf16.gmra.mxu0 %v8127_v26 }
 0x3a9   : > { %v8267_v14 = vadd.f32 %v5577_v2, %v5465_v12  ;;  %4220 = vmatprep.mubr.bf16.mxu0 %v8182_v36 }
 0x3aa   : > { %v5467_v10 = vpop.f32.mrf.mxu1  ;;  %v5582_v5 = vpop.f32.mrf.mxu0 }
 0x3ab   : > { %v5468_v6 = vadd.f32 %v5467_v10, %v5466_v35  ;;  %v5583_v63 = vadd.f32 %v5582_v5, %v5581_v31  ;;  %v3169_v35 = vsel %vm694_vm3, %v3164_v47, %v3168_v46 }
 0x3ac   : > { %v5469_v39 = vpop.f32.mrf.mxu1  ;;  %4052 = vmatmul.mubr.bf16.gmra.mxu1 %v8143_v21  ;;  %v5584_v49 = vpop.f32.mrf.mxu0 }
 0x3ad   : > { %v8272_v28 = vadd.f32 %v5580_v56, %v5468_v6  ;;  %4059 = vmatprep.mubr.bf16.mxu1 %v8174_v25 }
 0x3ae   : > { %v5470_v23 = vpop.f32.mrf.mxu1  ;;  %v5585_v48 = vpop.f32.mrf.mxu0 }
 0x3af   : > { %v5471_v58 = vadd.f32 %v5470_v23, %v5469_v39  ;;  %v5586_v60 = vadd.f32 %v5585_v48, %v5584_v49  ;;  %v3173_v49 = vrot.slane %v8198_v43, 1 }
 0x3b0   : > { %v5472_v20 = vpop.f32.mrf.mxu1  ;;  %v5587_v19 = vpop.f32.mrf.mxu0  ;;  %4221 = vmatmul.mubr.bf16.gmra.mxu0 %v8148_v27 }
 0x3b1   : > { %v8276_v26 = vadd.f32 %v5583_v63, %v5471_v58  ;;  %4228 = vmatprep.mubr.bf16.mxu0 %v8203_v24 }
 0x3b2   : > { %v5473_v53 = vpop.f32.mrf.mxu1  ;;  %v5588_v62 = vpop.f32.mrf.mxu0 }
 0x3b3   : > { %v5474_v21 = vadd.f32 %v5473_v53, %v5472_v20  ;;  %v5589_v13 = vadd.f32 %v5588_v62, %v5587_v19 }
 0x3b4   : > { %v5475_v8 = vpop.f32.mrf.mxu1  ;;  %4060 = vmatmul.mubr.bf16.gmra.mxu1 %v8163_v33  ;;  %v5590_v41 = vpop.f32.mrf.mxu0 }
 0x3b5   : > { %v8281_v1 = vadd.f32 %v5586_v60, %v5474_v21  ;;  %4067 = vmatprep.mubr.bf16.mxu1 %v8191_v51  ;;  %v3174_v60 = vrot.slane %v8043_v45, 1 }
 0x3b6   : > { %v5476_v9 = vpop.f32.mrf.mxu1  ;;  %v5591_v44 = vpop.f32.mrf.mxu0 }
 0x3b7   : > { %v5477_v27 = vadd.f32 %v5476_v9, %v5475_v8  ;;  %v5592_v33 = vadd.f32 %v5591_v44, %v5590_v41  ;;  %v8302_v21 = vsel %vm920_vm4, %v3173_v49, %v3174_v60 }
 0x3b8   : > { %v5478_v57 = vpop.f32.mrf.mxu1  ;;  %v5593_v12 = vpop.f32.mrf.mxu0  ;;  %4229 = vmatmul.mubr.bf16.gmra.mxu0 %v8168_v38 }
 0x3b9   : > { %v8286_v2 = vadd.f32 %v5589_v13, %v5477_v27  ;;  %4236 = vmatprep.mubr.bf16.mxu0 %v3169_v35 }
 0x3ba   : > { %v5479_v52 = vpop.f32.mrf.mxu1  ;;  %v5594_v10 = vpop.f32.mrf.mxu0 }
 0x3bb   : > { %v5480_v16 = vadd.f32 %v5479_v52, %v5478_v57  ;;  %v5595_v6 = vadd.f32 %v5594_v10, %v5593_v12 }
 0x3bc   : > { %v5481_v56 = vpop.f32.mrf.mxu1  ;;  %4068 = vmatmul.mubr.bf16.gmra.mxu1 %v8182_v36  ;;  %v5596_v5 = vpop.f32.mrf.mxu0 }
 0x3bd   : > { %v8291_v31 = vadd.f32 %v5592_v33, %v5480_v16  ;;  %4075 = vmatprep.mubr.bf16.mxu1 %v8208_v3 }
 0x3be   : > { %v5482_v39 = vpop.f32.mrf.mxu1  ;;  %v5597_v58 = vpop.f32.mrf.mxu0 }
 0x3bf   : > { %v5483_v63 = vadd.f32 %v5482_v39, %v5481_v56  ;;  %v5598_v20 = vadd.f32 %v5597_v58, %v5596_v5 }
 0x3c0   : > { %v5484_v23 = vpop.f32.mrf.mxu1  ;;  %v5599_v36 = vpop.f32.mrf.mxu0  ;;  %4237 = vmatmul.mubr.bf16.gmra.mxu0 %v8198_v43 }
 0x3c1   : > { %v8295_v50 = vadd.f32 %v5595_v6, %v5483_v63  ;;  %4244 = vmatprep.mubr.bf16.mxu0 %v8203_v24 }
 0x3c2   : > { %v5485_v48 = vpop.f32.mrf.mxu1  ;;  %v5600_v22 = vpop.f32.mrf.mxu0 }
 0x3c3   : > { %v5486_v53 = vadd.f32 %v5485_v48, %v5484_v23  ;;  %v5601_v62 = vadd.f32 %v5600_v22, %v5599_v36 }
 0x3c4   : > { %v5487_v19 = vpop.f32.mrf.mxu1  ;;  %4076 = vmatmul.mubr.bf16.gmra.mxu1 %v8203_v24  ;;  %v5602_v45 = vpop.f32.mrf.mxu0 }
 0x3c5   : > { %v8304_v8 = vadd.f32 %v5598_v20, %v5486_v53  ;;  %4083 = vmatprep.mubr.bf16.mxu1 %v8302_v21 }
 0x3c6   : > { %v5488_v54 = vpop.f32.mrf.mxu1  ;;  %v5603_v43 = vpop.f32.mrf.mxu0 }
 0x3c7   : > { %v5489_v0 = vadd.f32 %v5488_v54, %v5487_v19  ;;  %v5604_v41 = vadd.f32 %v5603_v43, %v5602_v45 }
 0x3c8   : > { %v5490_v13 = vpop.f32.mrf.mxu1  ;;  %v5605_v47 = vpop.f32.mrf.mxu0  ;;  %4245 = vmatmul.mubr.bf16.gmra.mxu0 %v8168_v38 }
 0x3c9   : > { %v8307_v9 = vadd.f32 %v5601_v62, %v5489_v0 }
 0x3ca   : > { %v5491_v27 = vpop.f32.mrf.mxu1  ;;  %v5606_v44 = vpop.f32.mrf.mxu0 }
 0x3cb   : > { %v5492_v24 = vadd.f32 %v5491_v27, %v5490_v13  ;;  %v5607_v33 = vadd.f32 %v5606_v44, %v5605_v47 }
 0x3cc   : > { %v5493_v57 = vpop.f32.mrf.mxu1  ;;  %4084 = vmatmul.mubr.bf16.gmra.mxu1 %v3169_v35  ;;  %v5608_v12 = vpop.f32.mrf.mxu0 }
 0x3cd   : > { %v8310_v46 = vadd.f32 %v5604_v41, %v5492_v24  ;;  %5971 = vmatprep.mubr.bf16.mxu1 %v7881_v17 }
 0x3ce   : > { %v5494_v52 = vpop.f32.mrf.mxu1  ;;  %v5609_v10 = vpop.f32.mrf.mxu0 }
 0x3cf   : > { %v5495_v16 = vadd.f32 %v5494_v52, %v5493_v57  ;;  %v5610_v39 = vadd.f32 %v5609_v10, %v5608_v12 }
 0x3d0   : > { %v5496_v56 = vpop.f32.mrf.mxu1  ;;  %v5611_v63 = vpop.f32.mrf.mxu0 }
 0x3d1   : > { %v8313_v6 = vadd.f32 %v5607_v33, %v5495_v16 }
 0x3d2   : > { %v5497_v5 = vpop.f32.mrf.mxu1  ;;  %v5612_v35 = vpop.f32.mrf.mxu0 }
 0x3d3   : > { %v5498_v38 = vadd.f32 %v5497_v5, %v5496_v56  ;;  %v5613_v17 = vadd.f32 %v5612_v35, %v5611_v63 }
 0x3d4   : > { %v5499_v23 = vpop.f32.mrf.mxu1  ;;  %5972 = vmatmul.mubr.bf16.vlgmr.msra.gmra.mxu1 %v7949_v7  ;;  %v5614_v20 = vpop.f32.mrf.mxu0 }
 0x3d5   : > { %v8316_v49 = vadd.f32 %v5610_v39, %v5498_v38  ;;  %5975 = vmatprep.mubr.bf16.mxu1 %v7974_v37 }
 0x3d6   : > { %v5500_v58 = vpop.f32.mrf.mxu1  ;;  %v5615_v36 = vpop.f32.mrf.mxu0 }
 0x3d7   : > { %v5501_v48 = vadd.f32 %v5500_v58, %v5499_v23  ;;  %v5616_v19 = vadd.f32 %v5615_v36, %v5614_v20 }
 0x3d8   : > { %v5502_v60 = vpop.f32.mrf.mxu1  ;;  %v5617_v62 = vpop.f32.mrf.mxu0 }
 0x3d9   : > { %v8319_v53 = vadd.f32 %v5613_v17, %v5501_v48 }
 0x3da   : > { %v5503_v22 = vpop.f32.mrf.mxu1  ;;  %v5618_v7 = vpop.f32.mrf.mxu0 }
 0x3db   : > { %v5504_v54 = vadd.f32 %v5503_v22, %v5502_v60  ;;  %v5619_v37 = vadd.f32 %v5618_v7, %v5617_v62 }
 0x3dc   : > { %v5505_v45 = vpop.f32.mrf.mxu1  ;;  %5976 = vmatmul.mubr.bf16.gmra.mxu1 %v7996_v61  ;;  %v5620_v43 = vpop.f32.mrf.mxu0 }
 0x3dd   : > { %v8322_v0 = vadd.f32 %v5616_v19, %v5504_v54  ;;  %5979 = vmatprep.mubr.bf16.mxu1 %v8023_v4 }
 0x3de   : > { %v5506_v13 = vpop.f32.mrf.mxu1  ;;  %v5621_v47 = vpop.f32.mrf.mxu0 }
 0x3df   : > { %v5507_v41 = vadd.f32 %v5506_v13, %v5505_v45  ;;  %v5622_v57 = vadd.f32 %v5621_v47, %v5620_v43 }
 0x3e0   : > { %v5508_v27 = vpop.f32.mrf.mxu1  ;;  %v5623_v33 = vpop.f32.mrf.mxu0 }
 0x3e1   : > { %v8325_v24 = vadd.f32 %v5619_v37, %v5507_v41 }
 0x3e2   : > { %v5509_v44 = vpop.f32.mrf.mxu1  ;;  %v5624_v61 = vpop.f32.mrf.mxu0 }
 0x3e3   : > { %v5510_v52 = vadd.f32 %v5509_v44, %v5508_v27  ;;  %v5625_v4 = vadd.f32 %v5624_v61, %v5623_v33 }
 0x3e4   : > { %v5511_v12 = vpop.f32.mrf.mxu1  ;;  %5980 = vmatmul.mubr.bf16.gmra.mxu1 %v8051_v29  ;;  %v5626_v10 = vpop.f32.mrf.mxu0 }
 0x3e5   : > { %v8328_v16 = vadd.f32 %v5622_v57, %v5510_v52  ;;  %5983 = vmatprep.mubr.bf16.mxu1 %v8072_v18 }
 0x3e6   : > { %v5512_v56 = vpop.f32.mrf.mxu1  ;;  %v5627_v63 = vpop.f32.mrf.mxu0 }
 0x3e7   : > { %v5513_v39 = vadd.f32 %v5512_v56, %v5511_v12  ;;  %v5628_v23 = vadd.f32 %v5627_v63, %v5626_v10 }
 0x3e8   : > { %v5514_v5 = vpop.f32.mrf.mxu1  ;;  %v5629_v17 = vpop.f32.mrf.mxu0 }
 0x3e9   : > { %v8331_v38 = vadd.f32 %v5625_v4, %v5513_v39 }
 0x3ea   : > { %v5515_v35 = vpop.f32.mrf.mxu1  ;;  %v5630_v29 = vpop.f32.mrf.mxu0 }
 0x3eb   : > { %v5516_v58 = vadd.f32 %v5515_v35, %v5514_v5  ;;  %v5631_v18 = vadd.f32 %v5630_v29, %v5629_v17 }
 0x3ec   : > { %v5517_v20 = vpop.f32.mrf.mxu1  ;;  %5984 = vmatmul.mubr.bf16.gmra.mxu1 %v8093_v32  ;;  %v5632_v36 = vpop.f32.mrf.mxu0 }
 0x3ed   : > { %v8334_v48 = vadd.f32 %v5628_v23, %v5516_v58  ;;  %5987 = vmatprep.mubr.bf16.mxu1 %v8114_v40 }
 0x3ee   : > { %v5518_v60 = vpop.f32.mrf.mxu1  ;;  %v5633_v62 = vpop.f32.mrf.mxu0 }
 0x3ef   : > { %v5519_v19 = vadd.f32 %v5518_v60, %v5517_v20  ;;  %v5634_v45 = vadd.f32 %v5633_v62, %v5632_v36 }
 0x3f0   : > { %v5520_v22 = vpop.f32.mrf.mxu1  ;;  %v5635_v37 = vpop.f32.mrf.mxu0 }
 0x3f1   : > { %v8337_v54 = vadd.f32 %v5631_v18, %v5519_v19 }
 0x3f2   : > { %v5521_v7 = vpop.f32.mrf.mxu1  ;;  %v5636_v32 = vpop.f32.mrf.mxu0 }
 0x3f3   : > { %v5522_v13 = vadd.f32 %v5521_v7, %v5520_v22  ;;  %v5637_v40 = vadd.f32 %v5636_v32, %v5635_v37 }
 0x3f4   : > { %v5523_v43 = vpop.f32.mrf.mxu1  ;;  %5988 = vmatmul.mubr.bf16.gmra.mxu1 %v8135_v15  ;;  %v5638_v47 = vpop.f32.mrf.mxu0 }
 0x3f5   : > { %v8340_v41 = vadd.f32 %v5634_v45, %v5522_v13  ;;  %5991 = vmatprep.mubr.bf16.mxu1 %v8155_v30 }
 0x3f6   : > { %v5524_v27 = vpop.f32.mrf.mxu1  ;;  %v5639_v33 = vpop.f32.mrf.mxu0 }
 0x3f7   : > { %v5525_v57 = vadd.f32 %v5524_v27, %v5523_v43  ;;  %v5640_v12 = vadd.f32 %v5639_v33, %v5638_v47 }
 0x3f8   : > { %v5526_v44 = vpop.f32.mrf.mxu1  ;;  %v5641_v4 = vpop.f32.mrf.mxu0 }
 0x3f9   : > { %v8343_v52 = vadd.f32 %v5637_v40, %v5525_v57 }
 0x3fa   : > { %v5527_v61 = vpop.f32.mrf.mxu1  ;;  %v5642_v15 = vpop.f32.mrf.mxu0 }
 0x3fb   : > { %v5528_v56 = vadd.f32 %v5527_v61, %v5526_v44  ;;  %v5643_v30 = vadd.f32 %v5642_v15, %v5641_v4 }
 0x3fc   : > { %v5529_v10 = vpop.f32.mrf.mxu1  ;;  %5992 = vmatmul.mubr.bf16.gmra.mxu1 %v8174_v25  ;;  %v5644_v63 = vpop.f32.mrf.mxu0 }
 0x3fd   : > { %v8346_v39 = vadd.f32 %v5640_v12, %v5528_v56  ;;  %5995 = vmatprep.mubr.bf16.mxu1 %v8191_v51 }
 0x3fe   : > { %v5530_v5 = vpop.f32.mrf.mxu1  ;;  %v5645_v17 = vpop.f32.mrf.mxu0 }
 0x3ff   : > { %v5531_v23 = vadd.f32 %v5530_v5, %v5529_v10  ;;  %v5646_v20 = vadd.f32 %v5645_v17, %v5644_v63 }
 0x400   : > { %v5532_v35 = vpop.f32.mrf.mxu1  ;;  %v5647_v18 = vpop.f32.mrf.mxu0 }
 0x401   : > { %v8349_v58 = vadd.f32 %v5643_v30, %v5531_v23 }
 0x402   : > { %v5533_v29 = vpop.f32.mrf.mxu1  ;;  %v5648_v25 = vpop.f32.mrf.mxu0 }
 0x403   : > { %v5534_v60 = vadd.f32 %v5533_v29, %v5532_v35  ;;  %v5649_v51 = vadd.f32 %v5648_v25, %v5647_v18 }
 0x404   : > { %v5535_v36 = vpop.f32.mrf.mxu1  ;;  %5996 = vmatmul.mubr.bf16.gmra.mxu1 %v8208_v3  ;;  %v5650_v62 = vpop.f32.mrf.mxu0 }
 0x405   : > { %v8352_v19 = vadd.f32 %v5646_v20, %v5534_v60  ;;  %5999 = vmatprep.mubr.bf16.mxu1 %v8302_v21 }
 0x406   : > { %v5536_v22 = vpop.f32.mrf.mxu1  ;;  %v5651_v37 = vpop.f32.mrf.mxu0 }
 0x407   : > { %v5537_v45 = vadd.f32 %v5536_v22, %v5535_v36  ;;  %v5652_v43 = vadd.f32 %v5651_v37, %v5650_v62 }
 0x408   : > { %v5538_v7 = vpop.f32.mrf.mxu1  ;;  %v5653_v40 = vpop.f32.mrf.mxu0 }
 0x409   : > { %v8355_v13 = vadd.f32 %v5649_v51, %v5537_v45 }
 0x40a   : > { %v5539_v32 = vpop.f32.mrf.mxu1  ;;  %v5654_v57 = vpop.f32.mrf.mxu0 }
 0x40b   : > { %v5540_v27 = vadd.f32 %v5539_v32, %v5538_v7  ;;  %v5655_v33 = vadd.f32 %v5654_v57, %v5653_v40 }
 0x40c   : > { %v5541_v47 = vpop.f32.mrf.mxu1  ;;  %6000 = vmatmul.mubr.bf16.gmra.mxu1 %v8208_v3  ;;  %v5656_v12 = vpop.f32.mrf.mxu0 }
 0x40d   : > { %v8358_v44 = vadd.f32 %v5652_v43, %v5540_v27 }
 0x40e   : > { %v5542_v21 = vpop.f32.mrf.mxu1  ;;  %v5657_v56 = vpop.f32.mrf.mxu0 }
 0x40f   : > { %v5543_v61 = vadd.f32 %v5542_v21, %v5541_v47  ;;  %v5658_v15 = vadd.f32 %v5657_v56, %v5656_v12 }
 0x410   : > { %v5544_v4 = vpop.f32.mrf.mxu1  ;;  %v5787_v5 = vpop.f32.mrf.mxu0 }
 0x411   : > { %v8360_v10 = vadd.f32 %v5655_v33, %v5543_v61 }
 0x412   : > { %v5545_v30 = vpop.f32.mrf.mxu1  ;;  %v5788_v35 = vpop.f32.mrf.mxu0 }
 0x413   : > { %v5546_v63 = vadd.f32 %v5545_v30, %v5544_v4  ;;  %v5789_v3 = vadd.f32 %v5788_v35, %v5787_v5 }
 0x414   : > { %v5675_v23 = vpop.f32.mrf.mxu1  ;;  %v8364_v29 = vpop.f32.mrf.mxu0 }
 0x415   : > { %v8362_v17 = vadd.f32 %v5658_v15, %v5546_v63 }
 0x416   : > { %v5676_v20 = vpop.f32.mrf.mxu1  ;;  %v8366_v36 = vpop.f32.mrf.mxu0 }
 0x417   : > { %v5677_v18 = vadd.f32 %v5676_v20, %v5675_v23 }
 0x418   : > { %v5678_v60 = vpop.f32.mrf.mxu1  ;;  %v8369_v22 = vpop.f32.mrf.mxu0 }
 0x419   : > { %v3966_v25 = vadd.f32 %v5677_v18, %v8251_v59 }
 0x41a   : > { %v5679_v51 = vpop.f32.mrf.mxu1  ;;  %v8373_v37 = vpop.f32.mrf.mxu0 }
 0x41b   : > { %v5680_v62 = vadd.f32 %v5679_v51, %v5678_v60  ;;  %v8371_v45 = vadd.f32 %v5789_v3, %v3966_v25 }
 0x41c   : > { %v5681_v7 = vpop.f32.mrf.mxu1  ;;  %v8378_v40 = vpop.f32.mrf.mxu0 }
 0x41d   : > { %v8376_v43 = vadd.f32 %v5680_v62, %v8256_v42 }
 0x41e   : > { %v5682_v32 = vpop.f32.mrf.mxu1  ;;  %v8380_v57 = vpop.f32.mrf.mxu0 }
 0x41f   : > { %v5683_v27 = vadd.f32 %v5682_v32, %v5681_v7 }
 0x420   : > { %v5684_v47 = vpop.f32.mrf.mxu1  ;;  %v8385_v21 = vpop.f32.mrf.mxu0 }
 0x421   : > { %v8383_v59 = vadd.f32 %v5683_v27, %v8259_v11 }
 0x422   : > { %v5685_v33 = vpop.f32.mrf.mxu1  ;;  %v8387_v4 = vpop.f32.mrf.mxu0 }
 0x423   : > { %v5686_v12 = vadd.f32 %v5685_v33, %v5684_v47 }
 0x424   : > { %v5687_v61 = vpop.f32.mrf.mxu1  ;;  %v8392_v15 = vpop.f32.mrf.mxu0 }
 0x425   : > { %v8390_v42 = vadd.f32 %v5686_v12, %v8264_v55 }
 0x426   : > { %v5688_v56 = vpop.f32.mrf.mxu1  ;;  %v8394_v63 = vpop.f32.mrf.mxu0 }
 0x427   : > { %v5689_v30 = vadd.f32 %v5688_v56, %v5687_v61 }
 0x428   : > { %v5690_v5 = vpop.f32.mrf.mxu1  ;;  %v8399_v35 = vpop.f32.mrf.mxu0 }
 0x429   : > { %v8397_v11 = vadd.f32 %v5689_v30, %v8267_v14 }
 0x42a   : > { %v5691_v23 = vpop.f32.mrf.mxu1  ;;  %v8401_v18 = vpop.f32.mrf.mxu0 }
 0x42b   : > { %v5692_v3 = vadd.f32 %v5691_v23, %v5690_v5 }
 0x42c   : > { %v5693_v20 = vpop.f32.mrf.mxu1  ;;  %v8406_v25 = vpop.f32.mrf.mxu0 }
 0x42d   : > { %v8404_v55 = vadd.f32 %v5692_v3, %v8272_v28 }
 0x42e   : > { %v5694_v60 = vpop.f32.mrf.mxu1  ;;  %v8408_v7 = vpop.f32.mrf.mxu0 }
 0x42f   : > { %v5695_v51 = vadd.f32 %v5694_v60, %v5693_v20 }
 0x430   : > { %v5696_v62 = vpop.f32.mrf.mxu1  ;;  %v8413_v27 = vpop.f32.mrf.mxu0 }
 0x431   : > { %v8411_v14 = vadd.f32 %v5695_v51, %v8276_v26 }
 0x432   : > { %v5697_v32 = vpop.f32.mrf.mxu1  ;;  %v8415_v12 = vpop.f32.mrf.mxu0 }
 0x433   : > { %v5698_v47 = vadd.f32 %v5697_v32, %v5696_v62 }
 0x434   : > { %v5699_v33 = vpop.f32.mrf.mxu1  ;;  %v8420_v56 = vpop.f32.mrf.mxu0 }
 0x435   : > { %v8418_v28 = vadd.f32 %v5698_v47, %v8281_v1 }
 0x436   : > { %v5700_v61 = vpop.f32.mrf.mxu1  ;;  %v8422_v23 = vpop.f32.mrf.mxu0 }
 0x437   : > { %v5701_v30 = vadd.f32 %v5700_v61, %v5699_v33  ;;  %9167 = vst [vmem:[#allocation15_spill] sm:$0xff] %v8422_v23 }
 0x438   : > { %v5702_v5 = vpop.f32.mrf.mxu1  ;;  %v8427_v20 = vpop.f32.mrf.mxu0 }
 0x439   : > { %v8425_v26 = vadd.f32 %v5701_v30, %v8286_v2  ;;  %9168 = vst [vmem:[#allocation14_spill] sm:$0xff] %v8427_v20 }
 0x43a   : > { %v5703_v3 = vpop.f32.mrf.mxu1  ;;  %v8429_v62 = vpop.f32.mrf.mxu0 }
 0x43b   : > { %v5704_v60 = vadd.f32 %v5703_v3, %v5702_v5 }
 0x43c   : > { %v5705_v51 = vpop.f32.mrf.mxu1  ;;  %v8434_v47 = vpop.f32.mrf.mxu0 }
 0x43d   : > { %v8432_v1 = vadd.f32 %v5704_v60, %v8291_v31  ;;  %9170 = vst [vmem:[#allocation19_spill] sm:$0xff] %v8434_v47 }
 0x43e   : > { %v5706_v32 = vpop.f32.mrf.mxu1  ;;  %v8436_v34 = vpop.f32.mrf.mxu0 }
 0x43f   : > { %9169 = vst [vmem:[#allocation16_spill] sm:$0xff] %v8432_v1  ;;  %v5707_v33 = vadd.f32 %v5706_v32, %v5705_v51 }
 0x440   : > { %v5708_v61 = vpop.f32.mrf.mxu1  ;;  %v8441_v23 = vpop.f32.mrf.mxu0 }
 0x441   : > { %v8439_v2 = vadd.f32 %v5707_v33, %v8295_v50  ;;  %9172 = vst [vmem:[#allocation17_spill] sm:$0xff] %v8441_v23 }
 0x442   : > { %v5709_v30 = vpop.f32.mrf.mxu1  ;;  %v8443_v20 = vpop.f32.mrf.mxu0 }
 0x443   : > { %9171 = vst [vmem:[#allocation18_spill] sm:$0xff] %v8439_v2  ;;  %v5710_v5 = vadd.f32 %v5709_v30, %v5708_v61 }
 0x444   : > { %v5711_v3 = vpop.f32.mrf.mxu1  ;;  %v8448_v1 = vpop.f32.mrf.mxu0 }
 0x445   : > { %v8446_v31 = vadd.f32 %v5710_v5, %v8304_v8  ;;  %9174 = vst [vmem:[#allocation21_spill] sm:$0xff] %v8448_v1 }
 0x446   : > { %v5712_v60 = vpop.f32.mrf.mxu1  ;;  %v8450_v47 = vpop.f32.mrf.mxu0 }
 0x447   : > { %9173 = vst [vmem:[#allocation20_spill] sm:$0xff] %v8446_v31  ;;  %v5713_v51 = vadd.f32 %v5712_v60, %v5711_v3  ;;  %9175 = vst [vmem:[#allocation23_spill] sm:$0xff] %v8450_v47 }
 0x448   : > { %v5714_v32 = vpop.f32.mrf.mxu1  ;;  %v8455_v2 = vpop.f32.mrf.mxu0 }
 0x449   : > { %v8453_v50 = vadd.f32 %v5713_v51, %v8307_v9  ;;  %9176 = vst [vmem:[#allocation22_spill] sm:$0xff] %v8455_v2 }
 0x44a   : > { %v5715_v33 = vpop.f32.mrf.mxu1  ;;  %v8457_v23 = vpop.f32.mrf.mxu0 }
 0x44b   : > { %v5716_v61 = vadd.f32 %v5715_v33, %v5714_v32 }
 0x44c   : > { %v5717_v30 = vpop.f32.mrf.mxu1  ;;  %v8462_v31 = vpop.f32.mrf.mxu0 }
 0x44d   : > { %v8460_v8 = vadd.f32 %v5716_v61, %v8310_v46  ;;  %9178 = vst [vmem:[#allocation26_spill] sm:$0xff] %v8462_v31 }
 0x44e   : > { %v5718_v5 = vpop.f32.mrf.mxu1  ;;  %v8464_v1 = vpop.f32.mrf.mxu0 }
 0x44f   : > { %9177 = vst [vmem:[#allocation24_spill] sm:$0xff] %v8460_v8  ;;  %v5719_v3 = vadd.f32 %v5718_v5, %v5717_v30  ;;  %9179 = vst [vmem:[#allocation27_spill] sm:$0xff] %v8464_v1 }
 0x450   : > { %v5720_v60 = vpop.f32.mrf.mxu1  ;;  %v8469_v47 = vpop.f32.mrf.mxu0 }
 0x451   : > { %v8467_v9 = vadd.f32 %v5719_v3, %v8313_v6 }
 0x452   : > { %v5721_v51 = vpop.f32.mrf.mxu1  ;;  %v8471_v2 = vpop.f32.mrf.mxu0 }
 0x453   : > { %9180 = vst [vmem:[#allocation25_spill] sm:$0xff] %v8467_v9  ;;  %v5722_v32 = vadd.f32 %v5721_v51, %v5720_v60  ;;  %9181 = vst [vmem:[#allocation28_spill] sm:$0xff] %v8471_v2 }
 0x454   : > { %v5723_v33 = vpop.f32.mrf.mxu1  ;;  %v8476_v30 = vpop.f32.mrf.mxu0 }
 0x455   : > { %v8474_v46 = vadd.f32 %v5722_v32, %v8316_v49  ;;  %9182 = vst [vmem:[#allocation29_spill] sm:$0xff] %v8476_v30 }
 0x456   : > { %v5724_v61 = vpop.f32.mrf.mxu1  ;;  %v8481_v1 = vpop.f32.mrf.mxu0 }
 0x457   : > { %v5725_v8 = vadd.f32 %v5724_v61, %v5723_v33  ;;  %9183 = vst [vmem:[#allocation31_spill] sm:$0xff] %v8481_v1 }
 0x458   : > { %v5726_v31 = vpop.f32.mrf.mxu1  ;;  %v8486_v32 = vpop.f32.mrf.mxu0 }
 0x459   : > { %v8479_v5 = vadd.f32 %v5725_v8, %v8319_v53 }
 0x45a   : > { %v5727_v6 = vpop.f32.mrf.mxu1  ;;  %v8491_v8 = vpop.f32.mrf.mxu0 }
 0x45b   : > { %v5728_v3 = vadd.f32 %v5727_v6, %v5726_v31 }
 0x45c   : > { %v5729_v9 = vpop.f32.mrf.mxu1 }
 0x45d   : > { %v8484_v60 = vadd.f32 %v5728_v3, %v8322_v0  ;;  %v8496_v3 = vpop.f32.mrf.mxu0 }
 0x45e   : > { %v5730_v51 = vpop.f32.mrf.mxu1 }
 0x45f   : > { %9184 = vst [vmem:[#allocation30_spill] sm:$0xff] %v8484_v60  ;;  %v5731_v2 = vadd.f32 %v5730_v51, %v5729_v9 }
 0x460   : > { %v5732_v49 = vpop.f32.mrf.mxu1 }
 0x461   : > { %v8489_v33 = vadd.f32 %v5731_v2, %v8325_v24  ;;  %v8501_v2 = vpop.f32.mrf.mxu0 }
 0x462   : > { %v5733_v61 = vpop.f32.mrf.mxu1 }
 0x463   : > { %9185 = vst [vmem:[#allocation32_spill] sm:$0xff] %v8489_v33  ;;  %v5734_v30 = vadd.f32 %v5733_v61, %v5732_v49 }
 0x464   : > { %v5735_v53 = vpop.f32.mrf.mxu1 }
 0x465   : > { %v8494_v31 = vadd.f32 %v5734_v30, %v8328_v16  ;;  %v8506_v30 = vpop.f32.mrf.mxu0 }
 0x466   : > { %v5736_v6 = vpop.f32.mrf.mxu1 }
 0x467   : > { %9186 = vst [vmem:[#allocation40_spill] sm:$0xff] %v8494_v31  ;;  %v5737_v1 = vadd.f32 %v5736_v6, %v5735_v53 }
 0x468   : > { %v5738_v0 = vpop.f32.mrf.mxu1 }
 0x469   : > { %v8499_v9 = vadd.f32 %v5737_v1, %v8331_v38  ;;  %v8511_v1 = vpop.f32.mrf.mxu0 }
 0x46a   : > { %v5739_v51 = vpop.f32.mrf.mxu1 }
 0x46b   : > { %9187 = vst [vmem:[#allocation33_spill] sm:$0xff] %v8499_v9  ;;  %v5740_v60 = vadd.f32 %v5739_v51, %v5738_v0 }
 0x46c   : > { %v5741_v24 = vpop.f32.mrf.mxu1 }
 0x46d   : > { %v8504_v49 = vadd.f32 %v5740_v60, %v8334_v48  ;;  %v8516_v60 = vpop.f32.mrf.mxu0 }
 0x46e   : > { %v5742_v61 = vpop.f32.mrf.mxu1 }
 0x46f   : > { %9188 = vst [vmem:[#allocation35_spill] sm:$0xff] %v8504_v49  ;;  %v5743_v33 = vadd.f32 %v5742_v61, %v5741_v24 }
 0x470   : > { %v5744_v16 = vpop.f32.mrf.mxu1 }
 0x471   : > { %v8509_v53 = vadd.f32 %v5743_v33, %v8337_v54  ;;  %v8521_v33 = vpop.f32.mrf.mxu0 }
 0x472   : > { %v5745_v6 = vpop.f32.mrf.mxu1 }
 0x473   : > { %9189 = vst [vmem:[#allocation34_spill] sm:$0xff] %v8509_v53  ;;  %v5746_v31 = vadd.f32 %v5745_v6, %v5744_v16 }
 0x474   : > { %v5747_v38 = vpop.f32.mrf.mxu1 }
 0x475   : > { %v8514_v0 = vadd.f32 %v5746_v31, %v8340_v41  ;;  %v8526_v31 = vpop.f32.mrf.mxu0 }
 0x476   : > { %v5748_v51 = vpop.f32.mrf.mxu1 }
 0x477   : > { %9190 = vst [vmem:[#allocation36_spill] sm:$0xff] %v8514_v0  ;;  %v5749_v9 = vadd.f32 %v5748_v51, %v5747_v38 }
 0x478   : > { %v5750_v48 = vpop.f32.mrf.mxu1 }
 0x479   : > { %v8519_v24 = vadd.f32 %v5749_v9, %v8343_v52  ;;  %v8531_v9 = vpop.f32.mrf.mxu0 }
 0x47a   : > { %v5751_v61 = vpop.f32.mrf.mxu1 }
 0x47b   : > { %9191 = vst [vmem:[#allocation37_spill] sm:$0xff] %v8519_v24  ;;  %v5752_v49 = vadd.f32 %v5751_v61, %v5750_v48 }
 0x47c   : > { %v5753_v54 = vpop.f32.mrf.mxu1 }
 0x47d   : > { %v8524_v16 = vadd.f32 %v5752_v49, %v8346_v39  ;;  %v8536_v49 = vpop.f32.mrf.mxu0 }
 0x47e   : > { %v5754_v6 = vpop.f32.mrf.mxu1 }
 0x47f   : > { %9192 = vst [vmem:[#allocation39_spill] sm:$0xff] %v8524_v16  ;;  %v5755_v53 = vadd.f32 %v5754_v6, %v5753_v54 }
 0x480   : > { %v5756_v41 = vpop.f32.mrf.mxu1 }
 0x481   : > { %v8529_v38 = vadd.f32 %v5755_v53, %v8349_v58  ;;  %v8541_v53 = vpop.f32.mrf.mxu0 }
 0x482   : > { %v5757_v51 = vpop.f32.mrf.mxu1 }
 0x483   : > { %9193 = vst [vmem:[#allocation38_spill] sm:$0xff] %v8529_v38  ;;  %v5758_v0 = vadd.f32 %v5757_v51, %v5756_v41 }
 0x484   : > { %v5759_v52 = vpop.f32.mrf.mxu1 }
 0x485   : > { %v8534_v48 = vadd.f32 %v5758_v0, %v8352_v19  ;;  %v8546_v0 = vpop.f32.mrf.mxu0 }
 0x486   : > { %v5760_v61 = vpop.f32.mrf.mxu1 }
 0x487   : > { %9194 = vst [vmem:[#allocation41_spill] sm:$0xff] %v8534_v48  ;;  %v5761_v24 = vadd.f32 %v5760_v61, %v5759_v52 }
 0x488   : > { %v5762_v39 = vpop.f32.mrf.mxu1 }
 0x489   : > { %v8539_v54 = vadd.f32 %v5761_v24, %v8355_v13  ;;  %v8551_v24 = vpop.f32.mrf.mxu0 }
 0x48a   : > { %v5763_v6 = vpop.f32.mrf.mxu1 }
 0x48b   : > { %v5764_v16 = vadd.f32 %v5763_v6, %v5762_v39 }
 0x48c   : > { %v5765_v58 = vpop.f32.mrf.mxu1 }
 0x48d   : > { %v8544_v41 = vadd.f32 %v5764_v16, %v8358_v44  ;;  %v5792_v44 = vadd.f32 %v8366_v36, %v8364_v29  ;;  %v5795_v16 = vadd.f32 %v8373_v37, %v8369_v22 }
 0x48e   : > { %v5766_v51 = vpop.f32.mrf.mxu1 }
 0x48f   : > { %v5767_v38 = vadd.f32 %v5766_v51, %v5765_v58  ;;  %v4135_v51 = vadd.f32 %v5795_v16, %v8383_v59 }
 0x490   : > { %v5768_v19 = vpop.f32.mrf.mxu1 }
 0x491   : > { %v8549_v52 = vadd.f32 %v5767_v38, %v8360_v10  ;;  %v5798_v10 = vadd.f32 %v8380_v57, %v8378_v40  ;;  %v8562_v38 = vpop.f32.mrf.mxu0 }
 0x492   : > { %v5769_v61 = vpop.f32.mrf.mxu1 }
 0x493   : > { %v5770_v48 = vadd.f32 %v5769_v61, %v5768_v19  ;;  %v4138_v22 = vadd.f32 %v5798_v10, %v8390_v42  ;;  %v8577_v61 = vpop.f32.mrf.mxu0  ;;  %v5807_v42 = vadd.f32 %v8401_v18, %v8399_v35 }
 0x494   : > { %v5973_v13 = vpop.f32.mrf.mxu1 }
 0x495   : > { %v8554_v39 = vadd.f32 %v5770_v48, %v8362_v17  ;;  %v4130_v17 = vadd.f32 %v5792_v44, %v8376_v43  ;;  %v5801_v48 = vadd.f32 %v8387_v4, %v8385_v21  ;;  %v8571_v36 = vadd.f32 %v5973_v13, %v4135_v51 }
 0x496   : > { %v4287_v6 = vpop.f32.mrf.mxu1  ;;  %v5804_v4 = vadd.f32 %v8394_v63, %v8392_v15  ;;  %v4151_v10 = vadd.f32 %v5807_v42, %v8411_v14 }
 0x497   : > { %v8566_v19 = vadd.f32 %v4287_v6, %v8371_v45  ;;  %v4143_v57 = vadd.f32 %v5801_v48, %v8397_v11  ;;  %v4454_v13 = vmul.f32 %v8571_v36, %v8571_v36  ;;  %v5813_v48 = vadd.f32 %v8415_v12, %v8413_v27 }
 0x498   : > { %v5974_v58 = vpop.f32.mrf.mxu1  ;;  %v4146_v18 = vadd.f32 %v5804_v4, %v8404_v55 }
 0x499   : > { %v4452_v45 = vmul.f32 %v8566_v19, %v8566_v19  ;;  %v8581_v59 = vadd.f32 %v5974_v58, %v4138_v22  ;;  %v5810_v58 = vadd.f32 %v8408_v7, %v8406_v25 }
 0x49a   : > { %v4290_v29 = vpop.f32.mrf.mxu1 }
 0x49b   : > { %v8574_v37 = vadd.f32 %v4290_v29, %v4130_v17  ;;  %v8599_v17 = vpop.f32.mrf.mxu0  ;;  %v4455_v15 = vmul.f32 %v8581_v59, %v8581_v59  ;;  %v4154_v25 = vadd.f32 %v5810_v58, %v8418_v28 }
 0x49c   : > { %v5977_v40 = vpop.f32.mrf.mxu1 }
 0x49d   : > { %v4414_v43 = vadd.f32 %v8574_v37, %v8566_v19  ;;  %v4453_v21 = vmul.f32 %v8574_v37, %v8574_v37  ;;  %v8607_v29 = vadd.f32 %v5977_v40, %v4151_v10  ;;  %v8616_v55 = vpop.f32.mrf.mxu0  ;;  %v9195_v40 = vld [vmem:[#allocation15_spill] sm:$0xff] }
 0x49e   : > { %v4303_v11 = vpop.f32.mrf.mxu1  ;;  %v5816_v42 = vadd.f32 %v9195_v40, %v8420_v56 }
 0x49f   : > { %v4415_v6 = vadd.f32 %v4414_v43, %v8571_v36  ;;  %v4484_v44 = vadd.f32 %v4453_v21, %v4452_v45  ;;  %v8594_v16 = vadd.f32 %v4303_v11, %v4143_v57  ;;  %v4159_v21 = vadd.f32 %v5813_v48, %v8425_v26  ;;  %v9196_v11 = vld [vmem:[#allocation14_spill] sm:$0xff]  ;;  %v8635_v48 = vpop.f32.mrf.mxu0 }
 0x4a0   : > { %v5978_v51 = vpop.f32.mrf.mxu1  ;;  %v4458_v26 = vmul.f32 %v8607_v29, %v8607_v29 }
 0x4a1   : > { %v4485_v63 = vadd.f32 %v4484_v44, %v4454_v13  ;;  %v4416_v35 = vadd.f32 %v4415_v6, %v8581_v59  ;;  %v4456_v22 = vmul.f32 %v8594_v16, %v8594_v16  ;;  %v8618_v27 = vadd.f32 %v5978_v51, %v4154_v25  ;;  %v9197_v51 = vld [vmem:[#allocation19_spill] sm:$0xff] }
 0x4a2   : > { %v4306_v7 = vpop.f32.mrf.mxu1  ;;  %v5819_v13 = vadd.f32 %v8429_v62, %v9196_v11 }
 0x4a3   : > { %v4417_v14 = vadd.f32 %v4416_v35, %v8594_v16  ;;  %v4486_v57 = vadd.f32 %v4485_v63, %v4455_v15  ;;  %v8613_v45 = vadd.f32 %v4306_v7, %v4146_v18  ;;  %v5822_v15 = vadd.f32 %v8436_v34, %v9197_v51  ;;  %v9198_v63 = vld [vmem:[#allocation18_spill] sm:$0xff]  ;;  %v9199_v7 = vld [vmem:[#allocation16_spill] sm:$0xff]  ;;  %v9202_v51 = vld [vmem:[#allocation21_spill] sm:$0xff] }
 0x4a4   : > { %v5981_v43 = vpop.f32.mrf.mxu1  ;;  %v4167_v35 = vadd.f32 %v5819_v13, %v9198_v63  ;;  %v4459_v56 = vmul.f32 %v8618_v27, %v8618_v27 }
 0x4a5   : > { %v4487_v4 = vadd.f32 %v4486_v57, %v4456_v22  ;;  %v4418_v12 = vadd.f32 %v4417_v14, %v8613_v45  ;;  %v4457_v28 = vmul.f32 %v8613_v45, %v8613_v45  ;;  %v4162_v14 = vadd.f32 %v5816_v42, %v9199_v7  ;;  %v9200_v22 = vld [vmem:[#allocation17_spill] sm:$0xff]  ;;  %v8652_v42 = vpop.f32.mrf.mxu0 }
 0x4a6   : > { %v4319_v6 = vpop.f32.mrf.mxu1  ;;  %v5825_v57 = vadd.f32 %v8443_v20, %v9200_v22  ;;  %v9206_v22 = vld [vmem:[#allocation27_spill] sm:$0xff] }
 0x4a7   : > { %v4419_v44 = vadd.f32 %v4418_v12, %v8607_v29  ;;  %v4488_v58 = vadd.f32 %v4487_v4, %v4457_v28  ;;  %v8630_v10 = vadd.f32 %v4319_v6, %v4159_v21  ;;  %v8643_v21 = vadd.f32 %v5981_v43, %v4167_v35  ;;  %v9201_v4 = vld [vmem:[#allocation20_spill] sm:$0xff]  ;;  %v9204_v35 = vld [vmem:[#allocation22_spill] sm:$0xff] }
 0x4a8   : > { %v5982_v18 = vpop.f32.mrf.mxu1  ;;  %v4170_v34 = vadd.f32 %v5822_v15, %v9201_v4  ;;  %v9203_v15 = vld [vmem:[#allocation23_spill] sm:$0xff]  ;;  %v9207_v4 = vld [vmem:[#allocation25_spill] sm:$0xff] }
 0x4a9   : > { %v4489_v62 = vadd.f32 %v4488_v58, %v4458_v26  ;;  %v4420_v25 = vadd.f32 %v4419_v44, %v8618_v27  ;;  %v4460_v40 = vmul.f32 %v8630_v10, %v8630_v10  ;;  %v4175_v26 = vadd.f32 %v5825_v57, %v8453_v50 }
 0x4aa   : > { %v4322_v12 = vpop.f32.mrf.mxu1  ;;  %v8654_v20 = vadd.f32 %v5982_v18, %v4170_v34  ;;  %v5828_v63 = vadd.f32 %v9203_v15, %v9202_v51  ;;  %v4462_v50 = vmul.f32 %v8643_v21, %v8643_v21  ;;  %v9208_v51 = vld [vmem:[#allocation24_spill] sm:$0xff] }
 0x4ab   : > { %v4421_v28 = vadd.f32 %v4420_v25, %v8630_v10  ;;  %v4490_v11 = vadd.f32 %v4489_v62, %v4459_v56  ;;  %v8649_v13 = vadd.f32 %v4322_v12, %v4162_v14  ;;  %v5831_v56 = vadd.f32 %v8457_v23, %v9204_v35  ;;  %v9205_v14 = vld [vmem:[#allocation26_spill] sm:$0xff] }
 0x4ac   : > { %v5985_v6 = vpop.f32.mrf.mxu1  ;;  %v5834_v57 = vadd.f32 %v9206_v22, %v9205_v14  ;;  %v4463_v23 = vmul.f32 %v8654_v20, %v8654_v20  ;;  %v4178_v15 = vadd.f32 %v5828_v63, %v9208_v51 }
 0x4ad   : > { %v4491_v44 = vadd.f32 %v4490_v11, %v4460_v40  ;;  %v4422_v43 = vadd.f32 %v4421_v28, %v8649_v13  ;;  %v4461_v58 = vmul.f32 %v8649_v13, %v8649_v13  ;;  %v4183_v34 = vadd.f32 %v5831_v56, %v9207_v4  ;;  %v8671_v28 = vpop.f32.mrf.mxu0  ;;  %v9211_v4 = vld [vmem:[#allocation31_spill] sm:$0xff] }
 0x4ae   : > { %v4335_v62 = vpop.f32.mrf.mxu1 }
 0x4af   : > { %v4423_v25 = vadd.f32 %v4422_v43, %v8643_v21  ;;  %v4492_v7 = vadd.f32 %v4491_v44, %v4461_v58  ;;  %v8666_v18 = vadd.f32 %v4335_v62, %v4175_v26  ;;  %v9209_v44 = vld [vmem:[#allocation28_spill] sm:$0xff]  ;;  %v8679_v43 = vadd.f32 %v5985_v6, %v4183_v34  ;;  %v8688_v63 = vpop.f32.mrf.mxu0 }
 0x4b0   : > { %v5986_v12 = vpop.f32.mrf.mxu1  ;;  %v5837_v26 = vadd.f32 %v9209_v44, %v8469_v47  ;;  %v4186_v58 = vadd.f32 %v5834_v57, %v8474_v46  ;;  %v9210_v57 = vld [vmem:[#allocation29_spill] sm:$0xff]  ;;  %v9212_v44 = vld [vmem:[#allocation32_spill] sm:$0xff] }
 0x4b1   : > { %v4493_v40 = vadd.f32 %v4492_v7, %v4462_v50  ;;  %v4424_v11 = vadd.f32 %v4423_v25, %v8654_v20  ;;  %v4464_v62 = vmul.f32 %v8666_v18, %v8666_v18  ;;  %v5840_v34 = vadd.f32 %v9211_v4, %v9210_v57 }
 0x4b2   : > { %v4338_v35 = vpop.f32.mrf.mxu1  ;;  %v4191_v25 = vadd.f32 %v5837_v26, %v8479_v5  ;;  %v8690_v47 = vadd.f32 %v5986_v12, %v4186_v58  ;;  %v4466_v5 = vmul.f32 %v8679_v43, %v8679_v43 }
 0x4b3   : > { %v4425_v56 = vadd.f32 %v4424_v11, %v8666_v18  ;;  %v4494_v14 = vadd.f32 %v4493_v40, %v4463_v23  ;;  %v8685_v22 = vadd.f32 %v4338_v35, %v4178_v15  ;;  %v5843_v23 = vadd.f32 %v8491_v8, %v8486_v32  ;;  %v8707_v35 = vpop.f32.mrf.mxu0 }
 0x4b4   : > { %v5989_v50 = vpop.f32.mrf.mxu1  ;;  %v5846_v15 = vadd.f32 %v8501_v2, %v8496_v3  ;;  %v4467_v32 = vmul.f32 %v8690_v47, %v8690_v47 }
 0x4b5   : > { %v4495_v7 = vadd.f32 %v4494_v14, %v4464_v62  ;;  %v4426_v6 = vadd.f32 %v4425_v56, %v8685_v22  ;;  %v4465_v46 = vmul.f32 %v8685_v22, %v8685_v22  ;;  %v4199_v26 = vadd.f32 %v5843_v23, %v9212_v44  ;;  %v9213_v62 = vld [vmem:[#allocation30_spill] sm:$0xff] }
 0x4b6   : > { %v4351_v40 = vpop.f32.mrf.mxu1  ;;  %v4194_v14 = vadd.f32 %v5840_v34, %v9213_v62  ;;  %v8724_v34 = vpop.f32.mrf.mxu0  ;;  %v5855_v44 = vadd.f32 %v8531_v9, %v8526_v31  ;;  %v5858_v62 = vadd.f32 %v8541_v53, %v8536_v49  ;;  %v9217_v9 = vld [vmem:[#allocation35_spill] sm:$0xff] }
 0x4b7   : > { %v4427_v11 = vadd.f32 %v4426_v6, %v8679_v43  ;;  %v4496_v51 = vadd.f32 %v4495_v7, %v4465_v46  ;;  %v8702_v12 = vadd.f32 %v4351_v40, %v4191_v25  ;;  %v5849_v25 = vadd.f32 %v8511_v1, %v8506_v30  ;;  %v9214_v6 = vld [vmem:[#allocation40_spill] sm:$0xff] }
 0x4b8   : > { %v5990_v58 = vpop.f32.mrf.mxu1  ;;  %v8715_v7 = vadd.f32 %v5989_v50, %v4199_v26  ;;  %v4202_v3 = vadd.f32 %v5846_v15, %v9214_v6  ;;  %v5852_v15 = vadd.f32 %v8521_v33, %v8516_v60 }
 0x4b9   : > { %v4497_v8 = vadd.f32 %v4496_v51, %v4466_v5  ;;  %v4428_v56 = vadd.f32 %v4427_v11, %v8690_v47  ;;  %v4468_v57 = vmul.f32 %v8702_v12, %v8702_v12  ;;  %v9215_v5 = vld [vmem:[#allocation33_spill] sm:$0xff] }
 0x4ba   : > { %v4354_v2 = vpop.f32.mrf.mxu1  ;;  %v4207_v11 = vadd.f32 %v5849_v25, %v9215_v5  ;;  %v8726_v30 = vadd.f32 %v5990_v58, %v4202_v3  ;;  %v5877_v3 = vpop.f32.mrf.mxu0 }
 0x4bb   : > { %v4429_v46 = vadd.f32 %v4428_v56, %v8702_v12  ;;  %v4498_v4 = vadd.f32 %v4497_v8, %v4467_v32  ;;  %v8721_v23 = vadd.f32 %v4354_v2, %v4194_v14  ;;  %v4470_v32 = vmul.f32 %v8715_v7, %v8715_v7  ;;  %v9216_v14 = vld [vmem:[#allocation34_spill] sm:$0xff] }
 0x4bc   : > { %v5993_v40 = vpop.f32.mrf.mxu1  ;;  %v4215_v25 = vadd.f32 %v5855_v44, %v9216_v14  ;;  %v4471_v60 = vmul.f32 %v8726_v30, %v8726_v30  ;;  %v4210_v2 = vadd.f32 %v5852_v15, %v9217_v9  ;;  %v9219_v44 = vld [vmem:[#allocation37_spill] sm:$0xff]  ;;  %v5878_v15 = vpop.f32.mrf.mxu0 }
 0x4bd   : > { %v4499_v51 = vadd.f32 %v4498_v4, %v4468_v57  ;;  %v4430_v1 = vadd.f32 %v4429_v46, %v8721_v23  ;;  %v4469_v50 = vmul.f32 %v8721_v23, %v8721_v23  ;;  %v5861_v46 = vadd.f32 %v8551_v24, %v8546_v0  ;;  %v9218_v4 = vld [vmem:[#allocation36_spill] sm:$0xff] }
 0x4be   : > { %v4367_v26 = vpop.f32.mrf.mxu1  ;;  %v8749_v57 = vadd.f32 %v5993_v40, %v4215_v25  ;;  %v4218_v5 = vadd.f32 %v5858_v62, %v9218_v4  ;;  %v5864_v40 = vadd.f32 %v8577_v61, %v8562_v38 }
 0x4bf   : > { %v4431_v8 = vadd.f32 %v4430_v1, %v8715_v7  ;;  %v4500_v56 = vadd.f32 %v4499_v51, %v4469_v50  ;;  %v8738_v58 = vadd.f32 %v4367_v26, %v4207_v11  ;;  %v4223_v26 = vadd.f32 %v5861_v46, %v9219_v44  ;;  %v5880_v46 = vpop.f32.mrf.mxu0 }
 0x4c0   : > { %v5994_v6 = vpop.f32.mrf.mxu1  ;;  %v4474_v14 = vmul.f32 %v8749_v57, %v8749_v57 }
 0x4c1   : > { %v4501_v33 = vadd.f32 %v4500_v56, %v4470_v32  ;;  %v4432_v31 = vadd.f32 %v4431_v8, %v8726_v30  ;;  %v4472_v11 = vmul.f32 %v8738_v58, %v8738_v58  ;;  %v8758_v8 = vadd.f32 %v5994_v6, %v4218_v5 }
 0x4c2   : > { %v4370_v49 = vpop.f32.mrf.mxu1  ;;  %v5867_v56 = vadd.f32 %v8616_v55, %v8599_v17  ;;  %v9221_v55 = vld [vmem:[#allocation39_spill] sm:$0xff]  ;;  %v5873_v5 = vadd.f32 %v8688_v63, %v8671_v28 }
 0x4c3   : > { %v4433_v53 = vadd.f32 %v4432_v31, %v8738_v58  ;;  %v4502_v51 = vadd.f32 %v4501_v33, %v4471_v60  ;;  %v8755_v1 = vadd.f32 %v4370_v49, %v4210_v2  ;;  %v5870_v33 = vadd.f32 %v8652_v42, %v8635_v48  ;;  %v9220_v31 = vld [vmem:[#allocation38_spill] sm:$0xff] }
 0x4c4   : > { %v5997_v50 = vpop.f32.mrf.mxu1  ;;  %v4231_v9 = vadd.f32 %v5867_v56, %v9220_v31  ;;  %v4475_v38 = vmul.f32 %v8758_v8, %v8758_v8  ;;  %v4226_v4 = vadd.f32 %v5864_v40, %v9221_v55 }
 0x4c5   : > { %v4503_v32 = vadd.f32 %v4502_v51, %v4472_v11  ;;  %v4434_v0 = vadd.f32 %v4433_v53, %v8755_v1  ;;  %v4473_v24 = vmul.f32 %v8755_v1, %v8755_v1  ;;  %v9222_v53 = vld [vmem:[#allocation41_spill] sm:$0xff] }
 0x4c6   : > { %v4383_v62 = vpop.f32.mrf.mxu1  ;;  %v8781_v49 = vadd.f32 %v5997_v50, %v4231_v9  ;;  %v4234_v11 = vadd.f32 %v5870_v33, %v9222_v53  ;;  %v5876_v50 = vadd.f32 %v8724_v34, %v8707_v35 }
 0x4c7   : > { %v4435_v25 = vadd.f32 %v4434_v0, %v8749_v57  ;;  %v4504_v60 = vadd.f32 %v4503_v32, %v4473_v24  ;;  %v8770_v6 = vadd.f32 %v4383_v62, %v4223_v26  ;;  %v4239_v0 = vadd.f32 %v5873_v5, %v8539_v54  ;;  %v5881_v24 = vpop.f32.mrf.mxu0 }
 0x4c8   : > { %v5998_v2 = vpop.f32.mrf.mxu1  ;;  %v5879_v62 = vadd.f32 %v5878_v15, %v5877_v3  ;;  %v5882_v31 = vadd.f32 %v5881_v24, %v5880_v46  ;;  %v4242_v34 = vadd.f32 %v5876_v50, %v8544_v41 }
 0x4c9   : > { %v4505_v61 = vadd.f32 %v4504_v60, %v4474_v14  ;;  %v4436_v17 = vadd.f32 %v4435_v25, %v8758_v8  ;;  %v4476_v51 = vmul.f32 %v8770_v6, %v8770_v6  ;;  %v8790_v56 = vadd.f32 %v5998_v2, %v4234_v11 }
 0x4ca   : > { %v4386_v48 = vpop.f32.mrf.mxu1  ;;  %v4478_v25 = vmul.f32 %v8781_v49, %v8781_v49  ;;  %v4247_v9 = vadd.f32 %v5879_v62, %v8549_v52  ;;  %v4250_v15 = vadd.f32 %v5882_v31, %v8554_v39 }
 0x4cb   : > { %v4437_v42 = vadd.f32 %v4436_v17, %v8770_v6  ;;  %v4506_v44 = vadd.f32 %v4505_v61, %v4475_v38  ;;  %v8787_v26 = vadd.f32 %v4386_v48, %v4226_v4  ;;  %v4479_v38 = vmul.f32 %v8790_v56, %v8790_v56 }
 0x4cc   : > { %v6001_v32 = vpop.f32.mrf.mxu1 }
 0x4cd   : > { %v4507_v40 = vadd.f32 %v4506_v44, %v4476_v51  ;;  %v4438_v28 = vadd.f32 %v4437_v42, %v8787_v26  ;;  %v4477_v63 = vmul.f32 %v8787_v26, %v8787_v26  ;;  %v8807_v3 = vadd.f32 %v6001_v32, %v4247_v9 }
 0x4ce   : > { %v4399_v14 = vpop.f32.mrf.mxu1 }
 0x4cf   : > { %v4439_v60 = vadd.f32 %v4438_v28, %v8781_v49  ;;  %v4508_v54 = vadd.f32 %v4507_v40, %v4477_v63  ;;  %v8800_v33 = vadd.f32 %v4399_v14, %v4239_v0  ;;  %v4482_v39 = vmul.f32 %v8807_v3, %v8807_v3 }
 0x4d0   : > { %v6002_v2 = vpop.f32.mrf.mxu1 }
 0x4d1   : > { %v4509_v61 = vadd.f32 %v4508_v54, %v4478_v25  ;;  %v4440_v35 = vadd.f32 %v4439_v60, %v8790_v56  ;;  %v4480_v46 = vmul.f32 %v8800_v33, %v8800_v33  ;;  %v8815_v53 = vadd.f32 %v6002_v2, %v4250_v15 }
 0x4d2   : > { %v4402_v17 = vpop.f32.mrf.mxu1 }
 0x4d3   : > { %v4441_v55 = vadd.f32 %v4440_v35, %v8800_v33  ;;  %v4510_v52 = vadd.f32 %v4509_v61, %v4479_v38  ;;  %v8813_v4 = vadd.f32 %v4402_v17, %v4242_v34  ;;  %v4483_v51 = vmul.f32 %v8815_v53, %v8815_v53 }
 0x4d5   : > { %v4511_v5 = vadd.f32 %v4510_v52, %v4480_v46  ;;  %v4442_v11 = vadd.f32 %v4441_v55, %v8813_v4  ;;  %v4481_v41 = vmul.f32 %v8813_v4, %v8813_v4 }
 0x4d7   : > { %v4443_v48 = vadd.f32 %v4442_v11, %v8807_v3  ;;  %v4512_v42 = vadd.f32 %v4511_v5, %v4481_v41 }
 0x4d9   : > { %v4444_v44 = vadd.f32 %v4443_v48, %v8815_v53  ;;  %v4513_v32 = vadd.f32 %v4512_v42, %v4482_v39  ;;  %v9223_v48 = vld [vmem:[#allocation13_spill] sm:$0xff] }
 0x4db   : > { %v4445_v0 = vrot.slane %v4444_v44, 4  ;;  %v4514_v24 = vadd.f32 %v4513_v32, %v4483_v51 }
 0x4dd   : > { %v4446_v40 = vadd.f32 %v4445_v0, %v4444_v44  ;;  %v4515_v28 = vrot.slane %v4514_v24, 4 }
 0x4df   : > { %v4447_v63 = vrot.slane %v4446_v40, 2  ;;  %v4516_v50 = vadd.f32 %v4515_v28, %v4514_v24 }
 0x4e1   : > { %v4448_v62 = vadd.f32 %v4447_v63, %v4446_v40  ;;  %v4517_v14 = vrot.slane %v4516_v50, 2 }
 0x4e3   : > { %v4449_v25 = vrot.slane %v4448_v62, 1  ;;  %v4518_v60 = vadd.f32 %v4517_v14, %v4516_v50 }
 0x4e5   : > { %v4450_v54 = vadd.f32 %v4449_v25, %v4448_v62  ;;  %v4519_v31 = vrot.slane %v4518_v60, 1 }
 0x4e7   : > { %v8826_v9 = vmul.f32 0.00390625, %v4450_v54  ;;  %v4520_v2 = vadd.f32 %v4519_v31, %v4518_v60  ;;  %v6226_v54 = vld [vmem:[%s6581_s30 + $0xe8] sm:$0xff] }
 0x4e9   : > { %v4521_v38 = vmul.f32 0.00390625, %v4520_v2  ;;  %v4522_v61 = vmul.f32 %v8826_v9, %v8826_v9  ;;  %v4557_v35 = vsub.f32 %v8813_v4, %v8826_v9  ;;  %v4537_v15 = vsub.f32 %v8649_v13, %v8826_v9 }
 0x4ea   : > { %v4540_v55 = vsub.f32 %v8666_v18, %v8826_v9  ;;  %v4541_v46 = vsub.f32 %v8685_v22, %v8826_v9  ;;  %v4542_v52 = vsub.f32 %v8679_v43, %v8826_v9  ;;  %v4543_v5 = vsub.f32 %v8690_v47, %v8826_v9 }
 0x4eb   : > { %v4523_v34 = vsub.f32 %v4521_v38, %v4522_v61  ;;  %v4544_v4 = vsub.f32 %v8702_v12, %v8826_v9  ;;  %v4545_v11 = vsub.f32 %v8721_v23, %v8826_v9  ;;  %v4546_v13 = vsub.f32 %v8715_v7, %v8826_v9 }
 0x4ec   : > { %v4547_v18 = vsub.f32 %v8726_v30, %v8826_v9  ;;  %v4548_v22 = vsub.f32 %v8738_v58, %v8826_v9  ;;  %v4549_v43 = vsub.f32 %v8755_v1, %v8826_v9  ;;  %v4550_v47 = vsub.f32 %v8749_v57, %v8826_v9 }
 0x4ed   : > { %v4524_v17 = vmax.f32 %v4523_v34, 0.0  ;;  %v4551_v12 = vsub.f32 %v8758_v8, %v8826_v9  ;;  %v4552_v23 = vsub.f32 %v8770_v6, %v8826_v9  ;;  %v4553_v7 = vsub.f32 %v8787_v26, %v8826_v9  ;;  %v6224_v26 = vld [vmem:[%s9063_s3] sm:$0x1] }
 0x4ee   : > { %v4554_v30 = vsub.f32 %v8781_v49, %v8826_v9  ;;  %v4555_v58 = vsub.f32 %v8790_v56, %v8826_v9  ;;  %v4556_v1 = vsub.f32 %v8800_v33, %v8826_v9  ;;  %v4558_v57 = vsub.f32 %v8807_v3, %v8826_v9 }
 0x4ef   : > { %v4525_v41 = vadd.f32 1e-05, %v4524_v17  ;;  %v4559_v8 = vsub.f32 %v8815_v53, %v8826_v9  ;;  %v4528_v49 = vsub.f32 %v8566_v19, %v8826_v9  ;;  %v4529_v56 = vsub.f32 %v8574_v37, %v8826_v9 }
 0x4f0   : > { %v4530_v33 = vsub.f32 %v8571_v36, %v8826_v9  ;;  %v4531_v3 = vsub.f32 %v8581_v59, %v8826_v9  ;;  %v9224_v53 = vsub.s32 0, %v9223_v48  ;;  %v4532_v51 = vsub.f32 %v8594_v16, %v8826_v9 }
 0x4f1   : > { %6222 = vrsqrt.f32 %v4525_v41  ;;  %v4533_v44 = vsub.f32 %v8613_v45, %v8826_v9  ;;  %v4534_v19 = vsub.f32 %v8607_v29, %v8826_v9  ;;  %v4535_v37 = vsub.f32 %v8618_v27, %v8826_v9  ;;  %v6225_v27 = vld [vmem:[%s9064_s4] ss:$0 sm:$0xff] }
 0x4f2   : > { %v4536_v36 = vsub.f32 %v8630_v10, %v8826_v9  ;;  %v4538_v59 = vsub.f32 %v8643_v21, %v8826_v9  ;;  %v4539_v32 = vsub.f32 %v8654_v20, %v8826_v9 }
 0x4fe   : > { %v6223_v6 = vpop.eup %6222 }
 0x4ff   : > { %v4527_v39 = vmul.f32 %v6224_v26, %v6223_v6 }
 0x501   : > { %v4563_v42 = vrot.slane %v4527_v39, %v9224_v53 }
 0x503   : > { %v4593_v0 = vmul.f32 %v4563_v42, %v4557_v35  ;;  %v4564_v16 = vmul.f32 %v4563_v42, %v4528_v49  ;;  %v4565_v24 = vmul.f32 %v4563_v42, %v4529_v56  ;;  %v4566_v45 = vmul.f32 %v4563_v42, %v4530_v33 }
 0x504   : > { %v4567_v40 = vmul.f32 %v4563_v42, %v4531_v3  ;;  %v4568_v28 = vmul.f32 %v4563_v42, %v4532_v51  ;;  %v4569_v29 = vmul.f32 %v4563_v42, %v4533_v44  ;;  %v4570_v63 = vmul.f32 %v4563_v42, %v4534_v19 }
 0x505   : > { %v4625_v10 = vadd.f32 %v6225_v27, %v4593_v0  ;;  %v4571_v50 = vmul.f32 %v4563_v42, %v4535_v37  ;;  %v4572_v21 = vmul.f32 %v4563_v42, %v4536_v36  ;;  %v4573_v62 = vmul.f32 %v4563_v42, %v4537_v15 }
 0x506   : > { %v4574_v14 = vmul.f32 %v4563_v42, %v4538_v59  ;;  %v4575_v20 = vmul.f32 %v4563_v42, %v4539_v32  ;;  %v4576_v25 = vmul.f32 %v4563_v42, %v4540_v55  ;;  %v4577_v60 = vmul.f32 %v4563_v42, %v4541_v46 }
 0x507   : > { %v4657_v31 = vadd.f32 %v6226_v54, %v4625_v10  ;;  %v4578_v9 = vmul.f32 %v4563_v42, %v4542_v52  ;;  %v4579_v2 = vmul.f32 %v4563_v42, %v4543_v5  ;;  %v4580_v38 = vmul.f32 %v4563_v42, %v4544_v4  ;;  %v6234_v54 = vld [vmem:[%s6581_s30 + $0x38] sm:$0xff] }
 0x508   : > { %v4581_v61 = vmul.f32 %v4563_v42, %v4545_v11  ;;  %v4582_v35 = vmul.f32 %v4563_v42, %v4546_v13  ;;  %v4583_v34 = vmul.f32 %v4563_v42, %v4547_v18  ;;  %v4584_v17 = vmul.f32 %v4563_v42, %v4548_v22 }
 0x509   : > { %4689 = vst [vmem:[%s8905_s7 + $0xe8] sm:$0xff] %v4657_v31  ;;  %v4585_v41 = vmul.f32 %v4563_v42, %v4549_v43  ;;  %v4586_v15 = vmul.f32 %v4563_v42, %v4550_v47  ;;  %v4587_v6 = vmul.f32 %v4563_v42, %v4551_v12  ;;  %v4588_v26 = vmul.f32 %v4563_v42, %v4552_v23 }
 0x50a   : > { %v4589_v55 = vmul.f32 %v4563_v42, %v4553_v7  ;;  %v4590_v46 = vmul.f32 %v4563_v42, %v4554_v30  ;;  %v4591_v39 = vmul.f32 %v4563_v42, %v4555_v58  ;;  %v4592_v49 = vmul.f32 %v4563_v42, %v4556_v1 }
 0x50b   : > { %v4594_v52 = vmul.f32 %v4563_v42, %v4558_v57  ;;  %v4595_v5 = vmul.f32 %v4563_v42, %v4559_v8  ;;  %v4596_v4 = vadd.f32 %v6225_v27, %v4564_v16  ;;  %v4597_v11 = vadd.f32 %v6225_v27, %v4565_v24 }
 0x50c   : > { %v4598_v13 = vadd.f32 %v6225_v27, %v4566_v45  ;;  %v4599_v18 = vadd.f32 %v6225_v27, %v4567_v40  ;;  %v4600_v22 = vadd.f32 %v6225_v27, %v4568_v28  ;;  %v4601_v56 = vadd.f32 %v6225_v27, %v4569_v29  ;;  %v6227_v45 = vld [vmem:[%s6581_s30] sm:$0xff]  ;;  %v6228_v28 = vld [vmem:[%s6581_s30 + $0x8] sm:$0xff] }
 0x50d   : > { %v4602_v33 = vadd.f32 %v6225_v27, %v4570_v63  ;;  %v4603_v3 = vadd.f32 %v6225_v27, %v4571_v50  ;;  %v4604_v48 = vadd.f32 %v6225_v27, %v4572_v21  ;;  %v4605_v53 = vadd.f32 %v6225_v27, %v4573_v62  ;;  %v6229_v63 = vld [vmem:[%s6581_s30 + $0x10] sm:$0xff]  ;;  %v6230_v50 = vld [vmem:[%s6581_s30 + $0x18] sm:$0xff]  ;;  %v6231_v62 = vld [vmem:[%s6581_s30 + $0x20] sm:$0xff] }
 0x50e   : > { %v4606_v43 = vadd.f32 %v6225_v27, %v4574_v14  ;;  %v4607_v47 = vadd.f32 %v6225_v27, %v4575_v20  ;;  %v4608_v12 = vadd.f32 %v6225_v27, %v4576_v25  ;;  %v4609_v23 = vadd.f32 %v6225_v27, %v4577_v60  ;;  %v6232_v20 = vld [vmem:[%s6581_s30 + $0x28] sm:$0xff]  ;;  %v6233_v25 = vld [vmem:[%s6581_s30 + $0x30] sm:$0xff] }
 0x50f   : > { %v4610_v7 = vadd.f32 %v6225_v27, %v4578_v9  ;;  %v4611_v30 = vadd.f32 %v6225_v27, %v4579_v2  ;;  %v4612_v58 = vadd.f32 %v6225_v27, %v4580_v38  ;;  %v4613_v1 = vadd.f32 %v6225_v27, %v4581_v61  ;;  %v6235_v9 = vld [vmem:[%s6581_s30 + $0x40] sm:$0xff]  ;;  %v6236_v38 = vld [vmem:[%s6581_s30 + $0x48] sm:$0xff] }
 0x510   : > { %v4614_v57 = vadd.f32 %v6225_v27, %v4582_v35  ;;  %v8908_v8 = vadd.f32 %v6225_v27, %v4583_v34  ;;  %v8910_v42 = vadd.f32 %v6225_v27, %v4584_v17  ;;  %v8912_v51 = vadd.f32 %v6225_v27, %v4585_v41  ;;  %v6237_v35 = vld [vmem:[%s6581_s30 + $0x50] sm:$0xff]  ;;  %v6238_v17 = vld [vmem:[%s6581_s30 + $0x58] sm:$0xff] }
 0x511   : > { %v8914_v44 = vadd.f32 %v6225_v27, %v4586_v15  ;;  %v8916_v19 = vadd.f32 %v6225_v27, %v4587_v6  ;;  %v8918_v37 = vadd.f32 %v6225_v27, %v4588_v26  ;;  %v8920_v36 = vadd.f32 %v6225_v27, %v4589_v55  ;;  %v6239_v15 = vld [vmem:[%s6581_s30 + $0x60] sm:$0xff]  ;;  %v6240_v26 = vld [vmem:[%s6581_s30 + $0x68] sm:$0xff] }
 0x512   : > { %v8922_v59 = vadd.f32 %v6225_v27, %v4590_v46  ;;  %v8924_v32 = vadd.f32 %v6225_v27, %v4591_v39  ;;  %v8926_v0 = vadd.f32 %v6225_v27, %v4592_v49  ;;  %v8928_v16 = vadd.f32 %v6225_v27, %v4594_v52  ;;  %v6241_v46 = vld [vmem:[%s6581_s30 + $0x70] sm:$0xff]  ;;  %v6242_v49 = vld [vmem:[%s6581_s30 + $0x78] sm:$0xff] }
 0x513   : > { %v8930_v24 = vadd.f32 %v6225_v27, %v4595_v5  ;;  %v4628_v40 = vadd.f32 %v6227_v45, %v4596_v4  ;;  %v4629_v29 = vadd.f32 %v6228_v28, %v4597_v11  ;;  %v4630_v10 = vadd.f32 %v6229_v63, %v4598_v13  ;;  %v6243_v5 = vld [vmem:[%s6581_s30 + $0x80] sm:$0xff]  ;;  %v6244_v11 = vld [vmem:[%s6581_s30 + $0x88] sm:$0xff]  ;;  %v6257_v45 = vld [vmem:[%s6581_s30 + $0xf8] sm:$0xff] }
 0x514   : > { %v4631_v21 = vadd.f32 %v6230_v50, %v4599_v18  ;;  %v4632_v14 = vadd.f32 %v6231_v62, %v4600_v22  ;;  %v4633_v27 = vadd.f32 %v6232_v20, %v4601_v56  ;;  %v4634_v60 = vadd.f32 %v6233_v25, %v4602_v33  ;;  %v6245_v18 = vld [vmem:[%s6581_s30 + $0x90] sm:$0xff]  ;;  %v6246_v56 = vld [vmem:[%s6581_s30 + $0x98] sm:$0xff] }
 0x515   : > { %v4635_v31 = vadd.f32 %v6234_v54, %v4603_v3  ;;  %v4636_v2 = vadd.f32 %v6235_v9, %v4604_v48  ;;  %v4637_v61 = vadd.f32 %v6236_v38, %v4605_v53  ;;  %v4638_v34 = vadd.f32 %v6237_v35, %v4606_v43  ;;  %4660 = vst [vmem:[%s8905_s7] sm:$0xff] %v4628_v40  ;;  %v6247_v3 = vld [vmem:[%s6581_s30 + $0xa0] sm:$0xff]  ;;  %v6248_v53 = vld [vmem:[%s6581_s30 + $0xa8] sm:$0xff] }
 0x516   : > { %4661 = vst [vmem:[%s8905_s7 + $0x8] sm:$0xff] %v4629_v29  ;;  %4662 = vst [vmem:[%s8905_s7 + $0x10] sm:$0xff] %v4630_v10  ;;  %v4639_v41 = vadd.f32 %v6238_v17, %v4607_v47  ;;  %v4640_v6 = vadd.f32 %v6239_v15, %v4608_v12  ;;  %v4641_v55 = vadd.f32 %v6240_v26, %v4609_v23  ;;  %v6249_v47 = vld [vmem:[%s6581_s30 + $0xb0] sm:$0xff]  ;;  %v6250_v23 = vld [vmem:[%s6581_s30 + $0xb8] sm:$0xff] }
 0x517   : > { %v4642_v39 = vadd.f32 %v6241_v46, %v4610_v7  ;;  %4663 = vst [vmem:[%s8905_s7 + $0x18] sm:$0xff] %v4631_v21  ;;  %4664 = vst [vmem:[%s8905_s7 + $0x20] sm:$0xff] %v4632_v14  ;;  %v4643_v52 = vadd.f32 %v6242_v49, %v4611_v30  ;;  %v4644_v4 = vadd.f32 %v6243_v5, %v4612_v58  ;;  %v6251_v30 = vld [vmem:[%s6581_s30 + $0xc0] sm:$0xff] }
 0x518   : > { %4665 = vst [vmem:[%s8905_s7 + $0x28] sm:$0xff] %v4633_v27  ;;  %4666 = vst [vmem:[%s8905_s7 + $0x30] sm:$0xff] %v4634_v60  ;;  %v4645_v13 = vadd.f32 %v6244_v11, %v4613_v1  ;;  %v4646_v22 = vadd.f32 %v6245_v18, %v4614_v57  ;;  %v4647_v33 = vadd.f32 %v6246_v56, %v8908_v8  ;;  %v6252_v1 = vld [vmem:[%s6581_s30 + $0xc8] sm:$0xff]  ;;  %v6253_v8 = vld [vmem:[%s6581_s30 + $0xd0] sm:$0xff] }
 0x519   : > { %4667 = vst [vmem:[%s8905_s7 + $0x38] sm:$0xff] %v4635_v31  ;;  %4668 = vst [vmem:[%s8905_s7 + $0x40] sm:$0xff] %v4636_v2  ;;  %v4648_v48 = vadd.f32 %v6247_v3, %v8910_v42  ;;  %v4649_v43 = vadd.f32 %v6248_v53, %v8912_v51  ;;  %v4650_v12 = vadd.f32 %v6249_v47, %v8914_v44  ;;  %v6254_v51 = vld [vmem:[%s6581_s30 + $0xd8] sm:$0xff] }
 0x51a   : > { %4669 = vst [vmem:[%s8905_s7 + $0x48] sm:$0xff] %v4637_v61  ;;  %4670 = vst [vmem:[%s8905_s7 + $0x50] sm:$0xff] %v4638_v34  ;;  %v4651_v7 = vadd.f32 %v6250_v23, %v8916_v19  ;;  %v4652_v58 = vadd.f32 %v6251_v30, %v8918_v37  ;;  %v4653_v57 = vadd.f32 %v6252_v1, %v8920_v36  ;;  %v6255_v19 = vld [vmem:[%s6581_s30 + $0xe0] sm:$0xff]  ;;  %v6256_v36 = vld [vmem:[%s6581_s30 + $0xf0] sm:$0xff]  ;;  %s6415_s30 = smov [#allocation8]  }
 0x51b   : > { %4671 = vst [vmem:[%s8905_s7 + $0x58] sm:$0xff] %v4639_v41  ;;  %4672 = vst [vmem:[%s8905_s7 + $0x60] sm:$0xff] %v4640_v6  ;;  %v4654_v42 = vadd.f32 %v6253_v8, %v8922_v59  ;;  %v4655_v44 = vadd.f32 %v6254_v51, %v8924_v32  ;;  %v4656_v37 = vadd.f32 %v6255_v19, %v8926_v0  ;;  %s6342_s26 = sshll.u32 %s6415_s30, 4  ;;  %s6343_s26 = int_to_ptr.vmem [resolvable:$false] %s6342_s26 }
 0x51c   : > { %4673 = vst [vmem:[%s8905_s7 + $0x68] sm:$0xff] %v4641_v55  ;;  %4674 = vst [vmem:[%s8905_s7 + $0x70] sm:$0xff] %v4642_v39  ;;  %v4658_v59 = vadd.f32 %v6256_v36, %v8928_v16  ;;  %v4659_v40 = vadd.f32 %v6257_v45, %v8930_v24  ;;  %s6344_s8 = scalar_lea.vmem %s6343_s26, 8192  ;;  %p6345_p6 = scmp.lt.s32.totalorder %s8997_s13, %s6343_s26 }
 0x51d   : > { %4675 = vst [vmem:[%s8905_s7 + $0x78] sm:$0xff] %v4643_v52  ;;  %4676 = vst [vmem:[%s8905_s7 + $0x80] sm:$0xff] %v4644_v4  ;;  %p6346_p12 = scmp.lt.s32.totalorder %s6344_s8, %s6338_s24 }
 0x51e   : > { %4677 = vst [vmem:[%s8905_s7 + $0x88] sm:$0xff] %v4645_v13  ;;  %4678 = vst [vmem:[%s8905_s7 + $0x90] sm:$0xff] %v4646_v22 }
 0x51f   : > { %4679 = vst [vmem:[%s8905_s7 + $0x98] sm:$0xff] %v4647_v33  ;;  %4680 = vst [vmem:[%s8905_s7 + $0xa0] sm:$0xff] %v4648_v48  ;;  %p6347_p7 = por %p6346_p12, %p6345_p6 }
 0x520   : > { %4681 = vst [vmem:[%s8905_s7 + $0xa8] sm:$0xff] %v4649_v43  ;;  %4682 = vst [vmem:[%s8905_s7 + $0xb0] sm:$0xff] %v4650_v12 }
 0x521   : > { %4683 = vst [vmem:[%s8905_s7 + $0xb8] sm:$0xff] %v4651_v7  ;;  %4684 = vst [vmem:[%s8905_s7 + $0xc0] sm:$0xff] %v4652_v58  ;;  %p6348_p9 = pnand %p6347_p7, %p6341_p2 }
 0x522   : > { %4685 = vst [vmem:[%s8905_s7 + $0xc8] sm:$0xff] %v4653_v57  ;;  %4686 = vst [vmem:[%s8905_s7 + $0xd0] sm:$0xff] %v4654_v42 }
 0x523   : > { %4687 = vst [vmem:[%s8905_s7 + $0xd8] sm:$0xff] %v4655_v44  ;;  %4688 = vst [vmem:[%s8905_s7 + $0xe0] sm:$0xff] %v4656_v37 }
 0x524   : > { %4690 = vst [vmem:[%s8905_s7 + $0xf0] sm:$0xff] %v4658_v59  ;;  %4691 = vst [vmem:[%s8905_s7 + $0xf8] sm:$0xff] %v4659_v40 }
 0x525   : > { %6351 = shalt.err (!%p6348_p9)
}
 0x526   : > { %s6352_s10 = scalar_lea.hbm %s8993_s29, 4096  ;;  %s6356_s28 = scalar_lea.hbm %s9065_s5, 8192 }
 0x527   : > { %p6353_p13 = scmp.ne.s32.totalorder %s8993_s29, %s6352_s10  ;;  %p6357_p4 = scmp.lt.s32.totalorder %s8993_s29, %s9065_s5 }
 0x528   : > { %p6358_p8 = scmp.lt.s32.totalorder %s6356_s28, %s6352_s10 }
 0x529   : > { %p6354_p5 = pnand %p6353_p13, %p9225_p10 }
 0x52a   : > { %p6359_p3 = por %p6358_p8, %p6357_p4 }
 0x52b   : > { %p6355_p0 = pneg %p6354_p5 }
 0x52d   : > { %p6360_p11 = pnand %p6359_p3, %p6355_p0 }
 0x52f   : > { %6363 = shalt.err (!%p6360_p11)
}
 0x530   : > { %s6416_s9 = smov 128   ;;  %s6417_s14 = smov 8  }
 0x531   : > { %6013 = dma.vmem_to_hbm [thread:$0]  (%p9225_p10), %s8997_s13, 4096, %s8993_s29, %s4693_s22, %s6416_s9, %s6416_s9, %s6417_s14  }
 0x532 PF: > { %s4721_s17 = sand.u32 1, %s6394_s18   ;;  %p9226_p1 = scmp.ne.s32.totalorder %s9079_s25, 0 }
 0x533   : > { %p9227_p2 = scmp.ge.s32.totalorder %s6406_s21, 2  ;;  %s4722_s24 = scalar_lea.sflag [#allocation4], %s4721_s17 }
 0x535   : > { %p6027_p6 = pnand %p9227_p2, %p9226_p1 }
 0x537   : > { %p6028_p12 = pneg %p6027_p6 }
 0x539   : > { %6389 = dma.done.wait (%p6028_p12), %s4722_s24, 4096  }
 0x53a   : > { %6391 = vsyncadd (%p6028_p12), %s4722_s24, 4294963200  ;;  %p19_p7 = scmp.ge.s32.totalorder %s6520_s15, 4   ;;  %s9228_s18 = smov %s6398_s19 }
 0x53b   : > { %s9229_s19 = smov %s6402_s20  ;;  %s9230_s20 = smov %s6536_s27 }
 0x53c   : > { %s9231_s21 = smov %s6520_s15  ;;  %21 = sbr.rel (!%p19_p7) target bundleno = 6 (0x6), region = 93 }
 0x541   :  { %4727 = vsyncpa [#allocation3], 1 }
 0x542   :  { %4729 = vsyncpa [#allocation3 + $0x1], 1 }
 0x543   :  { %4730 = vsyncpa [#allocation6], 1 }
 0x544   :  { %4731 = vsyncpa [#allocation4], 1 }
 0x545   :  { %4733 = vsyncpa [#allocation4 + $0x1], 1 }

</bundles_post_ra>
